<compile_context>
chip_gen: v5e
topology: v5e:2x2
jax: 0.10.0
libtpu: 0.0.40
codegen_flags: <defaults>
</compile_context>

<pallas_src>
import math

import jax
import jax.numpy as jnp
from jax import lax
from jax.experimental import pallas as pl
from jax.experimental.pallas import tpu as pltpu


_VMEM = pl.BlockSpec(memory_space=pltpu.MemorySpace.VMEM)

# Fuse the embedding lookup (one-hot matmul) into the kernel only for small
# vocabularies; larger vocabularies keep the gather in XLA glue.
_EMBED_FUSE_MAX_VOCAB = 4096
# Fully unroll the time loop below this length (static indices, LLO sees the
# whole recurrence); above it use lax.fori_loop.
_UNROLL_MAX_T = 64


# ----------------------------------------------------------------------------
# Fused kernel
# ----------------------------------------------------------------------------
def _make_rnn_kernel(*, n_layers, num_dirs, T, B, fused_embed):
    """Builds the fused (embedding + stacked biLSTM + FC) kernel body."""
    n_lead = 3 if fused_embed else 2
    n_w = n_layers * num_dirs * 3
    n_in = n_lead + n_w + 2                      # + fc_w, fc_b
    n_seq = min(max(n_layers - 1, 0), 2)         # ping-pong seq scratch bufs

    def kernel(*refs):
        len_ref = refs[1]                        # (B, 1) int32 lengths
        w_refs = refs[n_lead:n_lead + n_w]       # per layer/dir: wih, whh, b
        fc_w_ref = refs[n_lead + n_w]            # (num_dirs*H, O_pad) f32
        fc_b_ref = refs[n_lead + n_w + 1]        # (1, O_pad) f32
        logits_ref = refs[n_in]                  # (B, O_pad) f32 output
        seq_refs = refs[n_in + 1:]               # intermediate layer outputs

        H = w_refs[1].shape[0]                   # whh: (H, 4H)
        TB = T * B
        lengths = len_ref[...]                   # (B, 1) int32

        # ------------------------- embedding -------------------------
        if fused_embed:
            tok_ref, emb_ref = refs[0], refs[2]  # (TB,1) i32, (Vp,E) bf16
            Vp = emb_ref.shape[0]
            vocab_ids = lax.broadcasted_iota(jnp.int32, (TB, Vp), 1)
            onehot = jnp.where(tok_ref[...] == vocab_ids,
                               1.0, 0.0).astype(jnp.bfloat16)
            layer_x = jnp.dot(onehot, emb_ref[...],
                              preferred_element_type=jnp.float32
                              ).astype(jnp.bfloat16)          # (TB, E)
        else:
            layer_x = refs[0][...]               # (TB, E) bf16 (XLA gather)

        # --------------------- one LSTM direction --------------------
        def run_direction(x_flat, wih_ref, whh_ref, b_ref, out_ref, col,
                          reverse):
            # Input projection hoisted out of the recurrence.
            xz = jnp.dot(x_flat, wih_ref[...],
                         preferred_element_type=jnp.float32)
            xz = (xz + b_ref[...]).reshape(T, B, 4 * H)        # f32
            whh = whh_ref[...]                                 # (H, 4H) bf16

            def cell(t, h, c, xz_t):
                z = xz_t + jnp.dot(h.astype(jnp.bfloat16), whh,
                                   preferred_element_type=jnp.float32)
                i_g = jax.nn.sigmoid(z[:, 0 * H:1 * H])
                f_g = jax.nn.sigmoid(z[:, 1 * H:2 * H])
                g_g = jnp.tanh(z[:, 2 * H:3 * H])
                o_g = jax.nn.sigmoid(z[:, 3 * H:4 * H])
                c_new = f_g * c + i_g * g_g
                h_new = o_g * jnp.tanh(c_new)
                keep = t < lengths               # (B, 1) packed-seq mask
                return (jnp.where(keep, h_new, h),
                        jnp.where(keep, c_new, c),
                        jnp.where(keep, h_new, 0.0))

            h = jnp.zeros((B, H), jnp.float32)
            c = jnp.zeros((B, H), jnp.float32)

            if T <= _UNROLL_MAX_T:
                # Fully unrolled: all indices static.
                for s in range(T):
                    t = (T - 1 - s) if reverse else s
                    h, c, out_t = cell(t, h, c, xz[t])
                    if out_ref is not None:
                        out_ref[t, :, col:col + H] = out_t.astype(out_ref.dtype)
            else:
                def body(s, carry):
                    h, c = carry
                    t = (T - 1 - s) if reverse else s
                    xz_t = lax.dynamic_index_in_dim(xz, t, 0, keepdims=False)
                    h, c, out_t = cell(t, h, c, xz_t)
                    if out_ref is not None:
                        out_ref[t, :, col:col + H] = out_t.astype(out_ref.dtype)
                    return (h, c)
                h, c = lax.fori_loop(0, T, body, (h, c))

            # fwd: state frozen at t = len-1; bwd: state after t = 0.
            return h

        # ---------------------- stacked (bi)LSTM ----------------------
        wi = 0
        h_fin = []
        for layer in range(n_layers):
            is_last = layer == n_layers - 1
            out_ref = None if is_last else seq_refs[layer % n_seq]
            h_fin = []
            for d in range(num_dirs):
                wih_ref, whh_ref, b_ref = (w_refs[wi], w_refs[wi + 1],
                                           w_refs[wi + 2])
                wi += 3
                h_fin.append(run_direction(layer_x, wih_ref, whh_ref, b_ref,
                                           out_ref, d * H, reverse=(d == 1)))
            if not is_last:
                layer_x = out_ref[...].reshape(TB, num_dirs * H)
            # Inter-layer LSTM dropout is identity in eval mode.

        # self.dropout on the hidden is identity in eval mode.
        # -------- final Linear on cat(fwd, bwd) -- split matmul, no concat ---
        logits = fc_b_ref[...]
        for d in range(num_dirs):
            logits = logits + jnp.dot(h_fin[d],
                                      fc_w_ref[d * H:(d + 1) * H, :],
                                      preferred_element_type=jnp.float32)
        logits_ref[...] = logits

    return kernel


# ----------------------------------------------------------------------------
# Parameters (stored directly in kernel layout) & forward pass
# ----------------------------------------------------------------------------
def init_params(key, vocab_size, embedding_dim, hidden_dim, output_dim,
                n_layers, bidirectional):
    num_dirs = 2 if bidirectional else 1
    params = {}

    k_emb, key = jax.random.split(key)
    emb = jax.random.normal(k_emb, (vocab_size, embedding_dim), jnp.float32)
    v_pad = ((vocab_size + 127) // 128) * 128
    params["embedding"] = jnp.pad(
        emb, ((0, v_pad - vocab_size), (0, 0))).astype(jnp.bfloat16)

    std = 1.0 / math.sqrt(hidden_dim)
    lstm = []
    for layer in range(n_layers):
        in_dim = embedding_dim if layer == 0 else hidden_dim * num_dirs
        dirs = []
        for _ in range(num_dirs):
            key, k1, k2, k3, k4 = jax.random.split(key, 5)
            w_ih = jax.random.uniform(k1, (4 * hidden_dim, in_dim),
                                      jnp.float32, -std, std)
            w_hh = jax.random.uniform(k2, (4 * hidden_dim, hidden_dim),
                                      jnp.float32, -std, std)
            b_ih = jax.random.uniform(k3, (4 * hidden_dim,),
                                      jnp.float32, -std, std)
            b_hh = jax.random.uniform(k4, (4 * hidden_dim,),
                                      jnp.float32, -std, std)
            # Fused-gate kernel layout: (4H, in) -> (in, 4H); PyTorch gate
            # order (i, f, g, o) is preserved along the output columns.
            dirs.append((w_ih.T.astype(jnp.bfloat16),            # (in, 4H)
                         w_hh.T.astype(jnp.bfloat16),            # (H, 4H)
                         (b_ih + b_hh).reshape(1, 4 * hidden_dim)))  # f32
        lstm.append(tuple(dirs))
    params["lstm"] = lstm

    fc_in = hidden_dim * num_dirs
    key, k1, k2 = jax.random.split(key, 3)
    std_fc = 1.0 / math.sqrt(fc_in)
    fc_w = jax.random.uniform(k1, (fc_in, output_dim), jnp.float32,
                              -std_fc, std_fc)
    fc_b = jax.random.uniform(k2, (output_dim,), jnp.float32, -std_fc, std_fc)
    o_pad = ((output_dim + 127) // 128) * 128
    params["fc_w"] = jnp.pad(fc_w, ((0, 0), (0, o_pad - output_dim)))
    params["fc_b"] = jnp.pad(fc_b.reshape(1, -1),
                             ((0, 0), (0, o_pad - output_dim)))
    return params


def rnn_model_forward(params, text, text_lengths, *, bidirectional,
                      output_dim):
    """text: (B, T) int32 (batch_first, like the PyTorch module);
    text_lengths: (B,) int32.  Eval-mode forward (dropout = identity)."""
    B, T = text.shape
    num_dirs = 2 if bidirectional else 1
    lstm = params["lstm"]
    n_layers = len(lstm)
    H = lstm[0][0][1].shape[0]                       # whh: (H, 4H)
    emb = params["embedding"]                        # (Vp, E) bf16
    v_pad, E = emb.shape

    # Pad the batch to a sublane-aligned size.  Padded rows have length 0, so
    # the in-kernel mask keeps their state at zero.
    B_pad = max(8, ((B + 7) // 8) * 8)
    pad_b = B_pad - B
    text_p = jnp.pad(text.astype(jnp.int32), ((0, pad_b), (0, 0)))
    lengths_p = jnp.pad(text_lengths.astype(jnp.int32),
                        (0, pad_b)).reshape(B_pad, 1)

    tokens_tm = jnp.transpose(text_p, (1, 0))        # time-major (T, B_pad)

    fused_embed = v_pad <= _EMBED_FUSE_MAX_VOCAB
    if fused_embed:
        lead_args = [tokens_tm.reshape(T * B_pad, 1), lengths_p, emb]
    else:
        # TODO(synk): large-vocab embedding gather stays in XLA glue; an
        # in-kernel DMA gather would be needed to fuse it.
        x = jnp.take(emb, tokens_tm, axis=0)         # (T, B_pad, E) bf16
        lead_args = [x.reshape(T * B_pad, E), lengths_p]

    w_args = []
    for layer in lstm:
        for (wih, whh, b) in layer:
            w_args += [wih, whh, b]

    args = lead_args + w_args + [params["fc_w"], params["fc_b"]]
    o_pad = params["fc_w"].shape[1]

    n_seq = min(max(n_layers - 1, 0), 2)
    scratch = [pltpu.VMEM((T, B_pad, num_dirs * H), jnp.bfloat16)
               for _ in range(n_seq)]

    kernel = _make_rnn_kernel(n_layers=n_layers, num_dirs=num_dirs,
                              T=T, B=B_pad, fused_embed=fused_embed)

    logits = pl.pallas_call(
        kernel,
        out_shape=jax.ShapeDtypeStruct((B_pad, o_pad), jnp.float32),
        in_specs=[_VMEM] * len(args),
        out_specs=_VMEM,
        scratch_shapes=scratch,
    )(*args)
    return logits[:B, :output_dim]


# ----------------------------------------------------------------------------
if __name__ == "__main__":
    VOCAB = 50
    EMB = 32
    HID = 32
    OUT = 4
    N_LAYERS = 2
    BIDIR = True
    B, T = 2, 8

    key = jax.random.PRNGKey(0)
    k_p, k_text = jax.random.split(key)
    params = init_params(k_p, VOCAB, EMB, HID, OUT, N_LAYERS, BIDIR)

    text = jax.random.randint(k_text, (B, T), 0, VOCAB, dtype=jnp.int32)
    # pack_padded_sequence default requires lengths sorted descending.
    text_lengths = jnp.array([8, 5], dtype=jnp.int32)

    fwd = jax.jit(lambda p, t, l: rnn_model_forward(
        p, t, l, bidirectional=BIDIR, output_dim=OUT))
    out = jax.block_until_ready(fwd(params, text, text_lengths))
    assert out.shape == (B, OUT)
    assert bool(jnp.all(jnp.isfinite(out)))
    print("KERNEL_OK")
</pallas_src>

<mosaic_0001>
module attributes {stable_mosaic.version = 11 : i64} {
  func.func @kernel(%arg0: memref<64x1xi32, #tpu.memory_space<vmem>>, %arg1: memref<8x1xi32, #tpu.memory_space<vmem>>, %arg2: memref<128x32xbf16, #tpu.memory_space<vmem>>, %arg3: memref<32x128xbf16, #tpu.memory_space<vmem>>, %arg4: memref<32x128xbf16, #tpu.memory_space<vmem>>, %arg5: memref<1x128xf32, #tpu.memory_space<vmem>>, %arg6: memref<32x128xbf16, #tpu.memory_space<vmem>>, %arg7: memref<32x128xbf16, #tpu.memory_space<vmem>>, %arg8: memref<1x128xf32, #tpu.memory_space<vmem>>, %arg9: memref<64x128xbf16, #tpu.memory_space<vmem>>, %arg10: memref<32x128xbf16, #tpu.memory_space<vmem>>, %arg11: memref<1x128xf32, #tpu.memory_space<vmem>>, %arg12: memref<64x128xbf16, #tpu.memory_space<vmem>>, %arg13: memref<32x128xbf16, #tpu.memory_space<vmem>>, %arg14: memref<1x128xf32, #tpu.memory_space<vmem>>, %arg15: memref<64x128xf32, #tpu.memory_space<vmem>>, %arg16: memref<1x128xf32, #tpu.memory_space<vmem>>, %arg17: memref<8x128xf32, #tpu.memory_space<vmem>>, %arg18: memref<8x8x64xbf16, #tpu.memory_space<vmem>>) attributes {dimension_semantics = [], scalar_prefetch = 0 : i64, scratch_operands = 1 : i64, tpu.core_type = #tpu.core_type<tc>} {
    %c0 = arith.constant 0 : index
    %c0_0 = arith.constant 0 : index
    %0 = vector.load %arg1[%c0, %c0_0] : memref<8x1xi32, #tpu.memory_space<vmem>>, vector<8x1xi32>
    %1 = tpu.iota {dimensions = array<i32: 1>} : vector<64x128xi32>
    %c0_1 = arith.constant 0 : index
    %c0_2 = arith.constant 0 : index
    %2 = vector.load %arg0[%c0_1, %c0_2] : memref<64x1xi32, #tpu.memory_space<vmem>>, vector<64x1xi32>
    %3 = vector.broadcast %2 : vector<64x1xi32> to vector<64x128xi32>
    %4 = arith.cmpi eq, %3, %1 : vector<64x128xi32>
    %cst = arith.constant 1.000000e+00 : f32
    %cst_3 = arith.constant 0.000000e+00 : f32
    %5 = vector.broadcast %cst : f32 to vector<64x128xf32>
    %6 = vector.broadcast %cst_3 : f32 to vector<64x128xf32>
    %7 = arith.select %4, %5, %6 : vector<64x128xi1>, vector<64x128xf32>
    %8 = arith.truncf %7 : vector<64x128xf32> to vector<64x128xbf16>
    %c0_4 = arith.constant 0 : index
    %c0_5 = arith.constant 0 : index
    %9 = vector.load %arg2[%c0_4, %c0_5] : memref<128x32xbf16, #tpu.memory_space<vmem>>, vector<128x32xbf16>
    %cst_6 = arith.constant dense<0.000000e+00> : vector<64x32xf32>
    %10 = tpu.matmul %8, %9, %cst_6 {dimension_numbers = #tpu.dot_dimension_numbers<[1], [0], [0], [1], [0, 0, 1, 1], [], []>} : vector<64x128xbf16>, vector<128x32xbf16>, vector<64x32xf32> -> vector<64x32xf32>
    %11 = arith.truncf %10 : vector<64x32xf32> to vector<64x32xbf16>
    %c0_7 = arith.constant 0 : index
    %c0_8 = arith.constant 0 : index
    %12 = vector.load %arg3[%c0_7, %c0_8] : memref<32x128xbf16, #tpu.memory_space<vmem>>, vector<32x128xbf16>
    %cst_9 = arith.constant dense<0.000000e+00> : vector<64x128xf32>
    %13 = tpu.matmul %11, %12, %cst_9 {dimension_numbers = #tpu.dot_dimension_numbers<[1], [0], [0], [1], [0, 0, 1, 1], [], []>} : vector<64x32xbf16>, vector<32x128xbf16>, vector<64x128xf32> -> vector<64x128xf32>
    %c0_10 = arith.constant 0 : index
    %c0_11 = arith.constant 0 : index
    %14 = vector.load %arg5[%c0_10, %c0_11] : memref<1x128xf32, #tpu.memory_space<vmem>>, vector<1x128xf32>
    %15 = vector.broadcast %14 : vector<1x128xf32> to vector<64x128xf32>
    %16 = arith.addf %13, %15 : vector<64x128xf32>
    %17 = vector.shape_cast %16 : vector<64x128xf32> to vector<8x8x128xf32>
    %c0_12 = arith.constant 0 : index
    %c0_13 = arith.constant 0 : index
    %18 = vector.load %arg4[%c0_12, %c0_13] : memref<32x128xbf16, #tpu.memory_space<vmem>>, vector<32x128xbf16>
    %cst_14 = arith.constant 0.000000e+00 : f32
    %19 = vector.broadcast %cst_14 : f32 to vector<8x32xf32>
    %cst_15 = arith.constant 0.000000e+00 : f32
    %20 = vector.broadcast %cst_15 : f32 to vector<8x32xf32>
    %21 = vector.extract_strided_slice %17 {offsets = [0, 0, 0], sizes = [1, 8, 128], strides = [1, 1, 1]} : vector<8x8x128xf32> to vector<1x8x128xf32>
    %22 = vector.shape_cast %21 : vector<1x8x128xf32> to vector<8x128xf32>
    %23 = arith.truncf %19 : vector<8x32xf32> to vector<8x32xbf16>
    %cst_16 = arith.constant dense<0.000000e+00> : vector<8x128xf32>
    %24 = tpu.matmul %23, %18, %cst_16 {dimension_numbers = #tpu.dot_dimension_numbers<[1], [0], [0], [1], [0, 0, 1, 1], [], []>} : vector<8x32xbf16>, vector<32x128xbf16>, vector<8x128xf32> -> vector<8x128xf32>
    %25 = arith.addf %22, %24 : vector<8x128xf32>
    %26 = vector.extract_strided_slice %25 {offsets = [0, 0], sizes = [8, 32], strides = [1, 1]} : vector<8x128xf32> to vector<8x32xf32>
    %27 = arith.negf %26 : vector<8x32xf32>
    %28 = math.exp %27 : vector<8x32xf32>
    %cst_17 = arith.constant 1.000000e+00 : f32
    %29 = vector.broadcast %cst_17 : f32 to vector<8x32xf32>
    %30 = arith.addf %29, %28 : vector<8x32xf32>
    %31 = arith.divf %29, %30 : vector<8x32xf32>
    %32 = vector.extract_strided_slice %25 {offsets = [0, 32], sizes = [8, 32], strides = [1, 1]} : vector<8x128xf32> to vector<8x32xf32>
    %33 = arith.negf %32 : vector<8x32xf32>
    %34 = math.exp %33 : vector<8x32xf32>
    %cst_18 = arith.constant 1.000000e+00 : f32
    %35 = vector.broadcast %cst_18 : f32 to vector<8x32xf32>
    %36 = arith.addf %35, %34 : vector<8x32xf32>
    %37 = arith.divf %35, %36 : vector<8x32xf32>
    %38 = vector.extract_strided_slice %25 {offsets = [0, 64], sizes = [8, 32], strides = [1, 1]} : vector<8x128xf32> to vector<8x32xf32>
    %39 = math.tanh %38 : vector<8x32xf32>
    %40 = vector.extract_strided_slice %25 {offsets = [0, 96], sizes = [8, 32], strides = [1, 1]} : vector<8x128xf32> to vector<8x32xf32>
    %41 = arith.negf %40 : vector<8x32xf32>
    %42 = math.exp %41 : vector<8x32xf32>
    %cst_19 = arith.constant 1.000000e+00 : f32
    %43 = vector.broadcast %cst_19 : f32 to vector<8x32xf32>
    %44 = arith.addf %43, %42 : vector<8x32xf32>
    %45 = arith.divf %43, %44 : vector<8x32xf32>
    %46 = arith.mulf %37, %20 : vector<8x32xf32>
    %47 = arith.mulf %31, %39 : vector<8x32xf32>
    %48 = arith.addf %46, %47 : vector<8x32xf32>
    %49 = math.tanh %48 : vector<8x32xf32>
    %50 = arith.mulf %45, %49 : vector<8x32xf32>
    %c0_i32 = arith.constant 0 : i32
    %51 = vector.broadcast %c0_i32 : i32 to vector<8x1xi32>
    %52 = arith.cmpi sgt, %0, %51 : vector<8x1xi32>
    %53 = vector.shape_cast %52 : vector<8x1xi1> to vector<8x1xi1>
    %54 = vector.broadcast %53 : vector<8x1xi1> to vector<8x32xi1>
    %55 = arith.select %54, %50, %19 : vector<8x32xi1>, vector<8x32xf32>
    %56 = vector.shape_cast %52 : vector<8x1xi1> to vector<8x1xi1>
    %57 = vector.broadcast %56 : vector<8x1xi1> to vector<8x32xi1>
    %58 = arith.select %57, %48, %20 : vector<8x32xi1>, vector<8x32xf32>
    %cst_20 = arith.constant 0.000000e+00 : f32
    %59 = vector.shape_cast %52 : vector<8x1xi1> to vector<8x1xi1>
    %60 = vector.broadcast %59 : vector<8x1xi1> to vector<8x32xi1>
    %61 = vector.broadcast %cst_20 : f32 to vector<8x32xf32>
    %62 = arith.select %60, %50, %61 : vector<8x32xi1>, vector<8x32xf32>
    %63 = arith.truncf %62 : vector<8x32xf32> to vector<8x32xbf16>
    %c0_21 = arith.constant 0 : index
    %c0_22 = arith.constant 0 : index
    %c0_23 = arith.constant 0 : index
    %64 = vector.load %arg18[%c0_21, %c0_22, %c0_23] : memref<8x8x64xbf16, #tpu.memory_space<vmem>>, vector<1x8x32xbf16>
    %65 = vector.shape_cast %64 : vector<1x8x32xbf16> to vector<8x32xbf16>
    %66 = vector.shape_cast %63 : vector<8x32xbf16> to vector<1x8x32xbf16>
    tpu.vector_store %arg18[%c0_21, %c0_22, %c0_23], %66 {strides = array<i32>} : memref<8x8x64xbf16, #tpu.memory_space<vmem>>, vector<1x8x32xbf16>,
    %67 = vector.extract_strided_slice %17 {offsets = [1, 0, 0], sizes = [1, 8, 128], strides = [1, 1, 1]} : vector<8x8x128xf32> to vector<1x8x128xf32>
    %68 = vector.shape_cast %67 : vector<1x8x128xf32> to vector<8x128xf32>
    %69 = arith.truncf %55 : vector<8x32xf32> to vector<8x32xbf16>
    %cst_24 = arith.constant dense<0.000000e+00> : vector<8x128xf32>
    %70 = tpu.matmul %69, %18, %cst_24 {dimension_numbers = #tpu.dot_dimension_numbers<[1], [0], [0], [1], [0, 0, 1, 1], [], []>} : vector<8x32xbf16>, vector<32x128xbf16>, vector<8x128xf32> -> vector<8x128xf32>
    %71 = arith.addf %68, %70 : vector<8x128xf32>
    %72 = vector.extract_strided_slice %71 {offsets = [0, 0], sizes = [8, 32], strides = [1, 1]} : vector<8x128xf32> to vector<8x32xf32>
    %73 = arith.negf %72 : vector<8x32xf32>
    %74 = math.exp %73 : vector<8x32xf32>
    %cst_25 = arith.constant 1.000000e+00 : f32
    %75 = vector.broadcast %cst_25 : f32 to vector<8x32xf32>
    %76 = arith.addf %75, %74 : vector<8x32xf32>
    %77 = arith.divf %75, %76 : vector<8x32xf32>
    %78 = vector.extract_strided_slice %71 {offsets = [0, 32], sizes = [8, 32], strides = [1, 1]} : vector<8x128xf32> to vector<8x32xf32>
    %79 = arith.negf %78 : vector<8x32xf32>
    %80 = math.exp %79 : vector<8x32xf32>
    %cst_26 = arith.constant 1.000000e+00 : f32
    %81 = vector.broadcast %cst_26 : f32 to vector<8x32xf32>
    %82 = arith.addf %81, %80 : vector<8x32xf32>
    %83 = arith.divf %81, %82 : vector<8x32xf32>
    %84 = vector.extract_strided_slice %71 {offsets = [0, 64], sizes = [8, 32], strides = [1, 1]} : vector<8x128xf32> to vector<8x32xf32>
    %85 = math.tanh %84 : vector<8x32xf32>
    %86 = vector.extract_strided_slice %71 {offsets = [0, 96], sizes = [8, 32], strides = [1, 1]} : vector<8x128xf32> to vector<8x32xf32>
    %87 = arith.negf %86 : vector<8x32xf32>
    %88 = math.exp %87 : vector<8x32xf32>
    %cst_27 = arith.constant 1.000000e+00 : f32
    %89 = vector.broadcast %cst_27 : f32 to vector<8x32xf32>
    %90 = arith.addf %89, %88 : vector<8x32xf32>
    %91 = arith.divf %89, %90 : vector<8x32xf32>
    %92 = arith.mulf %83, %58 : vector<8x32xf32>
    %93 = arith.mulf %77, %85 : vector<8x32xf32>
    %94 = arith.addf %92, %93 : vector<8x32xf32>
    %95 = math.tanh %94 : vector<8x32xf32>
    %96 = arith.mulf %91, %95 : vector<8x32xf32>
    %c1_i32 = arith.constant 1 : i32
    %97 = vector.broadcast %c1_i32 : i32 to vector<8x1xi32>
    %98 = arith.cmpi sgt, %0, %97 : vector<8x1xi32>
    %99 = vector.shape_cast %98 : vector<8x1xi1> to vector<8x1xi1>
    %100 = vector.broadcast %99 : vector<8x1xi1> to vector<8x32xi1>
    %101 = arith.select %100, %96, %55 : vector<8x32xi1>, vector<8x32xf32>
    %102 = vector.shape_cast %98 : vector<8x1xi1> to vector<8x1xi1>
    %103 = vector.broadcast %102 : vector<8x1xi1> to vector<8x32xi1>
    %104 = arith.select %103, %94, %58 : vector<8x32xi1>, vector<8x32xf32>
    %cst_28 = arith.constant 0.000000e+00 : f32
    %105 = vector.shape_cast %98 : vector<8x1xi1> to vector<8x1xi1>
    %106 = vector.broadcast %105 : vector<8x1xi1> to vector<8x32xi1>
    %107 = vector.broadcast %cst_28 : f32 to vector<8x32xf32>
    %108 = arith.select %106, %96, %107 : vector<8x32xi1>, vector<8x32xf32>
    %109 = arith.truncf %108 : vector<8x32xf32> to vector<8x32xbf16>
    %c1 = arith.constant 1 : index
    %c0_29 = arith.constant 0 : index
    %c0_30 = arith.constant 0 : index
    %110 = vector.load %arg18[%c1, %c0_29, %c0_30] : memref<8x8x64xbf16, #tpu.memory_space<vmem>>, vector<1x8x32xbf16>
    %111 = vector.shape_cast %110 : vector<1x8x32xbf16> to vector<8x32xbf16>
    %112 = vector.shape_cast %109 : vector<8x32xbf16> to vector<1x8x32xbf16>
    tpu.vector_store %arg18[%c1, %c0_29, %c0_30], %112 {strides = array<i32>} : memref<8x8x64xbf16, #tpu.memory_space<vmem>>, vector<1x8x32xbf16>,
    %113 = vector.extract_strided_slice %17 {offsets = [2, 0, 0], sizes = [1, 8, 128], strides = [1, 1, 1]} : vector<8x8x128xf32> to vector<1x8x128xf32>
    %114 = vector.shape_cast %113 : vector<1x8x128xf32> to vector<8x128xf32>
    %115 = arith.truncf %101 : vector<8x32xf32> to vector<8x32xbf16>
    %cst_31 = arith.constant dense<0.000000e+00> : vector<8x128xf32>
    %116 = tpu.matmul %115, %18, %cst_31 {dimension_numbers = #tpu.dot_dimension_numbers<[1], [0], [0], [1], [0, 0, 1, 1], [], []>} : vector<8x32xbf16>, vector<32x128xbf16>, vector<8x128xf32> -> vector<8x128xf32>
    %117 = arith.addf %114, %116 : vector<8x128xf32>
    %118 = vector.extract_strided_slice %117 {offsets = [0, 0], sizes = [8, 32], strides = [1, 1]} : vector<8x128xf32> to vector<8x32xf32>
    %119 = arith.negf %118 : vector<8x32xf32>
    %120 = math.exp %119 : vector<8x32xf32>
    %cst_32 = arith.constant 1.000000e+00 : f32
    %121 = vector.broadcast %cst_32 : f32 to vector<8x32xf32>
    %122 = arith.addf %121, %120 : vector<8x32xf32>
    %123 = arith.divf %121, %122 : vector<8x32xf32>
    %124 = vector.extract_strided_slice %117 {offsets = [0, 32], sizes = [8, 32], strides = [1, 1]} : vector<8x128xf32> to vector<8x32xf32>
    %125 = arith.negf %124 : vector<8x32xf32>
    %126 = math.exp %125 : vector<8x32xf32>
    %cst_33 = arith.constant 1.000000e+00 : f32
    %127 = vector.broadcast %cst_33 : f32 to vector<8x32xf32>
    %128 = arith.addf %127, %126 : vector<8x32xf32>
    %129 = arith.divf %127, %128 : vector<8x32xf32>
    %130 = vector.extract_strided_slice %117 {offsets = [0, 64], sizes = [8, 32], strides = [1, 1]} : vector<8x128xf32> to vector<8x32xf32>
    %131 = math.tanh %130 : vector<8x32xf32>
    %132 = vector.extract_strided_slice %117 {offsets = [0, 96], sizes = [8, 32], strides = [1, 1]} : vector<8x128xf32> to vector<8x32xf32>
    %133 = arith.negf %132 : vector<8x32xf32>
    %134 = math.exp %133 : vector<8x32xf32>
    %cst_34 = arith.constant 1.000000e+00 : f32
    %135 = vector.broadcast %cst_34 : f32 to vector<8x32xf32>
    %136 = arith.addf %135, %134 : vector<8x32xf32>
    %137 = arith.divf %135, %136 : vector<8x32xf32>
    %138 = arith.mulf %129, %104 : vector<8x32xf32>
    %139 = arith.mulf %123, %131 : vector<8x32xf32>
    %140 = arith.addf %138, %139 : vector<8x32xf32>
    %141 = math.tanh %140 : vector<8x32xf32>
    %142 = arith.mulf %137, %141 : vector<8x32xf32>
    %c2_i32 = arith.constant 2 : i32
    %143 = vector.broadcast %c2_i32 : i32 to vector<8x1xi32>
    %144 = arith.cmpi sgt, %0, %143 : vector<8x1xi32>
    %145 = vector.shape_cast %144 : vector<8x1xi1> to vector<8x1xi1>
    %146 = vector.broadcast %145 : vector<8x1xi1> to vector<8x32xi1>
    %147 = arith.select %146, %142, %101 : vector<8x32xi1>, vector<8x32xf32>
    %148 = vector.shape_cast %144 : vector<8x1xi1> to vector<8x1xi1>
    %149 = vector.broadcast %148 : vector<8x1xi1> to vector<8x32xi1>
    %150 = arith.select %149, %140, %104 : vector<8x32xi1>, vector<8x32xf32>
    %cst_35 = arith.constant 0.000000e+00 : f32
    %151 = vector.shape_cast %144 : vector<8x1xi1> to vector<8x1xi1>
    %152 = vector.broadcast %151 : vector<8x1xi1> to vector<8x32xi1>
    %153 = vector.broadcast %cst_35 : f32 to vector<8x32xf32>
    %154 = arith.select %152, %142, %153 : vector<8x32xi1>, vector<8x32xf32>
    %155 = arith.truncf %154 : vector<8x32xf32> to vector<8x32xbf16>
    %c2 = arith.constant 2 : index
    %c0_36 = arith.constant 0 : index
    %c0_37 = arith.constant 0 : index
    %156 = vector.load %arg18[%c2, %c0_36, %c0_37] : memref<8x8x64xbf16, #tpu.memory_space<vmem>>, vector<1x8x32xbf16>
    %157 = vector.shape_cast %156 : vector<1x8x32xbf16> to vector<8x32xbf16>
    %158 = vector.shape_cast %155 : vector<8x32xbf16> to vector<1x8x32xbf16>
    tpu.vector_store %arg18[%c2, %c0_36, %c0_37], %158 {strides = array<i32>} : memref<8x8x64xbf16, #tpu.memory_space<vmem>>, vector<1x8x32xbf16>,
    %159 = vector.extract_strided_slice %17 {offsets = [3, 0, 0], sizes = [1, 8, 128], strides = [1, 1, 1]} : vector<8x8x128xf32> to vector<1x8x128xf32>
    %160 = vector.shape_cast %159 : vector<1x8x128xf32> to vector<8x128xf32>
    %161 = arith.truncf %147 : vector<8x32xf32> to vector<8x32xbf16>
    %cst_38 = arith.constant dense<0.000000e+00> : vector<8x128xf32>
    %162 = tpu.matmul %161, %18, %cst_38 {dimension_numbers = #tpu.dot_dimension_numbers<[1], [0], [0], [1], [0, 0, 1, 1], [], []>} : vector<8x32xbf16>, vector<32x128xbf16>, vector<8x128xf32> -> vector<8x128xf32>
    %163 = arith.addf %160, %162 : vector<8x128xf32>
    %164 = vector.extract_strided_slice %163 {offsets = [0, 0], sizes = [8, 32], strides = [1, 1]} : vector<8x128xf32> to vector<8x32xf32>
    %165 = arith.negf %164 : vector<8x32xf32>
    %166 = math.exp %165 : vector<8x32xf32>
    %cst_39 = arith.constant 1.000000e+00 : f32
    %167 = vector.broadcast %cst_39 : f32 to vector<8x32xf32>
    %168 = arith.addf %167, %166 : vector<8x32xf32>
    %169 = arith.divf %167, %168 : vector<8x32xf32>
    %170 = vector.extract_strided_slice %163 {offsets = [0, 32], sizes = [8, 32], strides = [1, 1]} : vector<8x128xf32> to vector<8x32xf32>
    %171 = arith.negf %170 : vector<8x32xf32>
    %172 = math.exp %171 : vector<8x32xf32>
    %cst_40 = arith.constant 1.000000e+00 : f32
    %173 = vector.broadcast %cst_40 : f32 to vector<8x32xf32>
    %174 = arith.addf %173, %172 : vector<8x32xf32>
    %175 = arith.divf %173, %174 : vector<8x32xf32>
    %176 = vector.extract_strided_slice %163 {offsets = [0, 64], sizes = [8, 32], strides = [1, 1]} : vector<8x128xf32> to vector<8x32xf32>
    %177 = math.tanh %176 : vector<8x32xf32>
    %178 = vector.extract_strided_slice %163 {offsets = [0, 96], sizes = [8, 32], strides = [1, 1]} : vector<8x128xf32> to vector<8x32xf32>
    %179 = arith.negf %178 : vector<8x32xf32>
    %180 = math.exp %179 : vector<8x32xf32>
    %cst_41 = arith.constant 1.000000e+00 : f32
    %181 = vector.broadcast %cst_41 : f32 to vector<8x32xf32>
    %182 = arith.addf %181, %180 : vector<8x32xf32>
    %183 = arith.divf %181, %182 : vector<8x32xf32>
    %184 = arith.mulf %175, %150 : vector<8x32xf32>
    %185 = arith.mulf %169, %177 : vector<8x32xf32>
    %186 = arith.addf %184, %185 : vector<8x32xf32>
    %187 = math.tanh %186 : vector<8x32xf32>
    %188 = arith.mulf %183, %187 : vector<8x32xf32>
    %c3_i32 = arith.constant 3 : i32
    %189 = vector.broadcast %c3_i32 : i32 to vector<8x1xi32>
    %190 = arith.cmpi sgt, %0, %189 : vector<8x1xi32>
    %191 = vector.shape_cast %190 : vector<8x1xi1> to vector<8x1xi1>
    %192 = vector.broadcast %191 : vector<8x1xi1> to vector<8x32xi1>
    %193 = arith.select %192, %188, %147 : vector<8x32xi1>, vector<8x32xf32>
    %194 = vector.shape_cast %190 : vector<8x1xi1> to vector<8x1xi1>
    %195 = vector.broadcast %194 : vector<8x1xi1> to vector<8x32xi1>
    %196 = arith.select %195, %186, %150 : vector<8x32xi1>, vector<8x32xf32>
    %cst_42 = arith.constant 0.000000e+00 : f32
    %197 = vector.shape_cast %190 : vector<8x1xi1> to vector<8x1xi1>
    %198 = vector.broadcast %197 : vector<8x1xi1> to vector<8x32xi1>
    %199 = vector.broadcast %cst_42 : f32 to vector<8x32xf32>
    %200 = arith.select %198, %188, %199 : vector<8x32xi1>, vector<8x32xf32>
    %201 = arith.truncf %200 : vector<8x32xf32> to vector<8x32xbf16>
    %c3 = arith.constant 3 : index
    %c0_43 = arith.constant 0 : index
    %c0_44 = arith.constant 0 : index
    %202 = vector.load %arg18[%c3, %c0_43, %c0_44] : memref<8x8x64xbf16, #tpu.memory_space<vmem>>, vector<1x8x32xbf16>
    %203 = vector.shape_cast %202 : vector<1x8x32xbf16> to vector<8x32xbf16>
    %204 = vector.shape_cast %201 : vector<8x32xbf16> to vector<1x8x32xbf16>
    tpu.vector_store %arg18[%c3, %c0_43, %c0_44], %204 {strides = array<i32>} : memref<8x8x64xbf16, #tpu.memory_space<vmem>>, vector<1x8x32xbf16>,
    %205 = vector.extract_strided_slice %17 {offsets = [4, 0, 0], sizes = [1, 8, 128], strides = [1, 1, 1]} : vector<8x8x128xf32> to vector<1x8x128xf32>
    %206 = vector.shape_cast %205 : vector<1x8x128xf32> to vector<8x128xf32>
    %207 = arith.truncf %193 : vector<8x32xf32> to vector<8x32xbf16>
    %cst_45 = arith.constant dense<0.000000e+00> : vector<8x128xf32>
    %208 = tpu.matmul %207, %18, %cst_45 {dimension_numbers = #tpu.dot_dimension_numbers<[1], [0], [0], [1], [0, 0, 1, 1], [], []>} : vector<8x32xbf16>, vector<32x128xbf16>, vector<8x128xf32> -> vector<8x128xf32>
    %209 = arith.addf %206, %208 : vector<8x128xf32>
    %210 = vector.extract_strided_slice %209 {offsets = [0, 0], sizes = [8, 32], strides = [1, 1]} : vector<8x128xf32> to vector<8x32xf32>
    %211 = arith.negf %210 : vector<8x32xf32>
    %212 = math.exp %211 : vector<8x32xf32>
    %cst_46 = arith.constant 1.000000e+00 : f32
    %213 = vector.broadcast %cst_46 : f32 to vector<8x32xf32>
    %214 = arith.addf %213, %212 : vector<8x32xf32>
    %215 = arith.divf %213, %214 : vector<8x32xf32>
    %216 = vector.extract_strided_slice %209 {offsets = [0, 32], sizes = [8, 32], strides = [1, 1]} : vector<8x128xf32> to vector<8x32xf32>
    %217 = arith.negf %216 : vector<8x32xf32>
    %218 = math.exp %217 : vector<8x32xf32>
    %cst_47 = arith.constant 1.000000e+00 : f32
    %219 = vector.broadcast %cst_47 : f32 to vector<8x32xf32>
    %220 = arith.addf %219, %218 : vector<8x32xf32>
    %221 = arith.divf %219, %220 : vector<8x32xf32>
    %222 = vector.extract_strided_slice %209 {offsets = [0, 64], sizes = [8, 32], strides = [1, 1]} : vector<8x128xf32> to vector<8x32xf32>
    %223 = math.tanh %222 : vector<8x32xf32>
    %224 = vector.extract_strided_slice %209 {offsets = [0, 96], sizes = [8, 32], strides = [1, 1]} : vector<8x128xf32> to vector<8x32xf32>
    %225 = arith.negf %224 : vector<8x32xf32>
    %226 = math.exp %225 : vector<8x32xf32>
    %cst_48 = arith.constant 1.000000e+00 : f32
    %227 = vector.broadcast %cst_48 : f32 to vector<8x32xf32>
    %228 = arith.addf %227, %226 : vector<8x32xf32>
    %229 = arith.divf %227, %228 : vector<8x32xf32>
    %230 = arith.mulf %221, %196 : vector<8x32xf32>
    %231 = arith.mulf %215, %223 : vector<8x32xf32>
    %232 = arith.addf %230, %231 : vector<8x32xf32>
    %233 = math.tanh %232 : vector<8x32xf32>
    %234 = arith.mulf %229, %233 : vector<8x32xf32>
    %c4_i32 = arith.constant 4 : i32
    %235 = vector.broadcast %c4_i32 : i32 to vector<8x1xi32>
    %236 = arith.cmpi sgt, %0, %235 : vector<8x1xi32>
    %237 = vector.shape_cast %236 : vector<8x1xi1> to vector<8x1xi1>
    %238 = vector.broadcast %237 : vector<8x1xi1> to vector<8x32xi1>
    %239 = arith.select %238, %234, %193 : vector<8x32xi1>, vector<8x32xf32>
    %240 = vector.shape_cast %236 : vector<8x1xi1> to vector<8x1xi1>
    %241 = vector.broadcast %240 : vector<8x1xi1> to vector<8x32xi1>
    %242 = arith.select %241, %232, %196 : vector<8x32xi1>, vector<8x32xf32>
    %cst_49 = arith.constant 0.000000e+00 : f32
    %243 = vector.shape_cast %236 : vector<8x1xi1> to vector<8x1xi1>
    %244 = vector.broadcast %243 : vector<8x1xi1> to vector<8x32xi1>
    %245 = vector.broadcast %cst_49 : f32 to vector<8x32xf32>
    %246 = arith.select %244, %234, %245 : vector<8x32xi1>, vector<8x32xf32>
    %247 = arith.truncf %246 : vector<8x32xf32> to vector<8x32xbf16>
    %c4 = arith.constant 4 : index
    %c0_50 = arith.constant 0 : index
    %c0_51 = arith.constant 0 : index
    %248 = vector.load %arg18[%c4, %c0_50, %c0_51] : memref<8x8x64xbf16, #tpu.memory_space<vmem>>, vector<1x8x32xbf16>
    %249 = vector.shape_cast %248 : vector<1x8x32xbf16> to vector<8x32xbf16>
    %250 = vector.shape_cast %247 : vector<8x32xbf16> to vector<1x8x32xbf16>
    tpu.vector_store %arg18[%c4, %c0_50, %c0_51], %250 {strides = array<i32>} : memref<8x8x64xbf16, #tpu.memory_space<vmem>>, vector<1x8x32xbf16>,
    %251 = vector.extract_strided_slice %17 {offsets = [5, 0, 0], sizes = [1, 8, 128], strides = [1, 1, 1]} : vector<8x8x128xf32> to vector<1x8x128xf32>
    %252 = vector.shape_cast %251 : vector<1x8x128xf32> to vector<8x128xf32>
    %253 = arith.truncf %239 : vector<8x32xf32> to vector<8x32xbf16>
    %cst_52 = arith.constant dense<0.000000e+00> : vector<8x128xf32>
    %254 = tpu.matmul %253, %18, %cst_52 {dimension_numbers = #tpu.dot_dimension_numbers<[1], [0], [0], [1], [0, 0, 1, 1], [], []>} : vector<8x32xbf16>, vector<32x128xbf16>, vector<8x128xf32> -> vector<8x128xf32>
    %255 = arith.addf %252, %254 : vector<8x128xf32>
    %256 = vector.extract_strided_slice %255 {offsets = [0, 0], sizes = [8, 32], strides = [1, 1]} : vector<8x128xf32> to vector<8x32xf32>
    %257 = arith.negf %256 : vector<8x32xf32>
    %258 = math.exp %257 : vector<8x32xf32>
    %cst_53 = arith.constant 1.000000e+00 : f32
    %259 = vector.broadcast %cst_53 : f32 to vector<8x32xf32>
    %260 = arith.addf %259, %258 : vector<8x32xf32>
    %261 = arith.divf %259, %260 : vector<8x32xf32>
    %262 = vector.extract_strided_slice %255 {offsets = [0, 32], sizes = [8, 32], strides = [1, 1]} : vector<8x128xf32> to vector<8x32xf32>
    %263 = arith.negf %262 : vector<8x32xf32>
    %264 = math.exp %263 : vector<8x32xf32>
    %cst_54 = arith.constant 1.000000e+00 : f32
    %265 = vector.broadcast %cst_54 : f32 to vector<8x32xf32>
    %266 = arith.addf %265, %264 : vector<8x32xf32>
    %267 = arith.divf %265, %266 : vector<8x32xf32>
    %268 = vector.extract_strided_slice %255 {offsets = [0, 64], sizes = [8, 32], strides = [1, 1]} : vector<8x128xf32> to vector<8x32xf32>
    %269 = math.tanh %268 : vector<8x32xf32>
    %270 = vector.extract_strided_slice %255 {offsets = [0, 96], sizes = [8, 32], strides = [1, 1]} : vector<8x128xf32> to vector<8x32xf32>
    %271 = arith.negf %270 : vector<8x32xf32>
    %272 = math.exp %271 : vector<8x32xf32>
    %cst_55 = arith.constant 1.000000e+00 : f32
    %273 = vector.broadcast %cst_55 : f32 to vector<8x32xf32>
    %274 = arith.addf %273, %272 : vector<8x32xf32>
    %275 = arith.divf %273, %274 : vector<8x32xf32>
    %276 = arith.mulf %267, %242 : vector<8x32xf32>
    %277 = arith.mulf %261, %269 : vector<8x32xf32>
    %278 = arith.addf %276, %277 : vector<8x32xf32>
    %279 = math.tanh %278 : vector<8x32xf32>
    %280 = arith.mulf %275, %279 : vector<8x32xf32>
    %c5_i32 = arith.constant 5 : i32
    %281 = vector.broadcast %c5_i32 : i32 to vector<8x1xi32>
    %282 = arith.cmpi sgt, %0, %281 : vector<8x1xi32>
    %283 = vector.shape_cast %282 : vector<8x1xi1> to vector<8x1xi1>
    %284 = vector.broadcast %283 : vector<8x1xi1> to vector<8x32xi1>
    %285 = arith.select %284, %280, %239 : vector<8x32xi1>, vector<8x32xf32>
    %286 = vector.shape_cast %282 : vector<8x1xi1> to vector<8x1xi1>
    %287 = vector.broadcast %286 : vector<8x1xi1> to vector<8x32xi1>
    %288 = arith.select %287, %278, %242 : vector<8x32xi1>, vector<8x32xf32>
    %cst_56 = arith.constant 0.000000e+00 : f32
    %289 = vector.shape_cast %282 : vector<8x1xi1> to vector<8x1xi1>
    %290 = vector.broadcast %289 : vector<8x1xi1> to vector<8x32xi1>
    %291 = vector.broadcast %cst_56 : f32 to vector<8x32xf32>
    %292 = arith.select %290, %280, %291 : vector<8x32xi1>, vector<8x32xf32>
    %293 = arith.truncf %292 : vector<8x32xf32> to vector<8x32xbf16>
    %c5 = arith.constant 5 : index
    %c0_57 = arith.constant 0 : index
    %c0_58 = arith.constant 0 : index
    %294 = vector.load %arg18[%c5, %c0_57, %c0_58] : memref<8x8x64xbf16, #tpu.memory_space<vmem>>, vector<1x8x32xbf16>
    %295 = vector.shape_cast %294 : vector<1x8x32xbf16> to vector<8x32xbf16>
    %296 = vector.shape_cast %293 : vector<8x32xbf16> to vector<1x8x32xbf16>
    tpu.vector_store %arg18[%c5, %c0_57, %c0_58], %296 {strides = array<i32>} : memref<8x8x64xbf16, #tpu.memory_space<vmem>>, vector<1x8x32xbf16>,
    %297 = vector.extract_strided_slice %17 {offsets = [6, 0, 0], sizes = [1, 8, 128], strides = [1, 1, 1]} : vector<8x8x128xf32> to vector<1x8x128xf32>
    %298 = vector.shape_cast %297 : vector<1x8x128xf32> to vector<8x128xf32>
    %299 = arith.truncf %285 : vector<8x32xf32> to vector<8x32xbf16>
    %cst_59 = arith.constant dense<0.000000e+00> : vector<8x128xf32>
    %300 = tpu.matmul %299, %18, %cst_59 {dimension_numbers = #tpu.dot_dimension_numbers<[1], [0], [0], [1], [0, 0, 1, 1], [], []>} : vector<8x32xbf16>, vector<32x128xbf16>, vector<8x128xf32> -> vector<8x128xf32>
    %301 = arith.addf %298, %300 : vector<8x128xf32>
    %302 = vector.extract_strided_slice %301 {offsets = [0, 0], sizes = [8, 32], strides = [1, 1]} : vector<8x128xf32> to vector<8x32xf32>
    %303 = arith.negf %302 : vector<8x32xf32>
    %304 = math.exp %303 : vector<8x32xf32>
    %cst_60 = arith.constant 1.000000e+00 : f32
    %305 = vector.broadcast %cst_60 : f32 to vector<8x32xf32>
    %306 = arith.addf %305, %304 : vector<8x32xf32>
    %307 = arith.divf %305, %306 : vector<8x32xf32>
    %308 = vector.extract_strided_slice %301 {offsets = [0, 32], sizes = [8, 32], strides = [1, 1]} : vector<8x128xf32> to vector<8x32xf32>
    %309 = arith.negf %308 : vector<8x32xf32>
    %310 = math.exp %309 : vector<8x32xf32>
    %cst_61 = arith.constant 1.000000e+00 : f32
    %311 = vector.broadcast %cst_61 : f32 to vector<8x32xf32>
    %312 = arith.addf %311, %310 : vector<8x32xf32>
    %313 = arith.divf %311, %312 : vector<8x32xf32>
    %314 = vector.extract_strided_slice %301 {offsets = [0, 64], sizes = [8, 32], strides = [1, 1]} : vector<8x128xf32> to vector<8x32xf32>
    %315 = math.tanh %314 : vector<8x32xf32>
    %316 = vector.extract_strided_slice %301 {offsets = [0, 96], sizes = [8, 32], strides = [1, 1]} : vector<8x128xf32> to vector<8x32xf32>
    %317 = arith.negf %316 : vector<8x32xf32>
    %318 = math.exp %317 : vector<8x32xf32>
    %cst_62 = arith.constant 1.000000e+00 : f32
    %319 = vector.broadcast %cst_62 : f32 to vector<8x32xf32>
    %320 = arith.addf %319, %318 : vector<8x32xf32>
    %321 = arith.divf %319, %320 : vector<8x32xf32>
    %322 = arith.mulf %313, %288 : vector<8x32xf32>
    %323 = arith.mulf %307, %315 : vector<8x32xf32>
    %324 = arith.addf %322, %323 : vector<8x32xf32>
    %325 = math.tanh %324 : vector<8x32xf32>
    %326 = arith.mulf %321, %325 : vector<8x32xf32>
    %c6_i32 = arith.constant 6 : i32
    %327 = vector.broadcast %c6_i32 : i32 to vector<8x1xi32>
    %328 = arith.cmpi sgt, %0, %327 : vector<8x1xi32>
    %329 = vector.shape_cast %328 : vector<8x1xi1> to vector<8x1xi1>
    %330 = vector.broadcast %329 : vector<8x1xi1> to vector<8x32xi1>
    %331 = arith.select %330, %326, %285 : vector<8x32xi1>, vector<8x32xf32>
    %332 = vector.shape_cast %328 : vector<8x1xi1> to vector<8x1xi1>
    %333 = vector.broadcast %332 : vector<8x1xi1> to vector<8x32xi1>
    %334 = arith.select %333, %324, %288 : vector<8x32xi1>, vector<8x32xf32>
    %cst_63 = arith.constant 0.000000e+00 : f32
    %335 = vector.shape_cast %328 : vector<8x1xi1> to vector<8x1xi1>
    %336 = vector.broadcast %335 : vector<8x1xi1> to vector<8x32xi1>
    %337 = vector.broadcast %cst_63 : f32 to vector<8x32xf32>
    %338 = arith.select %336, %326, %337 : vector<8x32xi1>, vector<8x32xf32>
    %339 = arith.truncf %338 : vector<8x32xf32> to vector<8x32xbf16>
    %c6 = arith.constant 6 : index
    %c0_64 = arith.constant 0 : index
    %c0_65 = arith.constant 0 : index
    %340 = vector.load %arg18[%c6, %c0_64, %c0_65] : memref<8x8x64xbf16, #tpu.memory_space<vmem>>, vector<1x8x32xbf16>
    %341 = vector.shape_cast %340 : vector<1x8x32xbf16> to vector<8x32xbf16>
    %342 = vector.shape_cast %339 : vector<8x32xbf16> to vector<1x8x32xbf16>
    tpu.vector_store %arg18[%c6, %c0_64, %c0_65], %342 {strides = array<i32>} : memref<8x8x64xbf16, #tpu.memory_space<vmem>>, vector<1x8x32xbf16>,
    %343 = vector.extract_strided_slice %17 {offsets = [7, 0, 0], sizes = [1, 8, 128], strides = [1, 1, 1]} : vector<8x8x128xf32> to vector<1x8x128xf32>
    %344 = vector.shape_cast %343 : vector<1x8x128xf32> to vector<8x128xf32>
    %345 = arith.truncf %331 : vector<8x32xf32> to vector<8x32xbf16>
    %cst_66 = arith.constant dense<0.000000e+00> : vector<8x128xf32>
    %346 = tpu.matmul %345, %18, %cst_66 {dimension_numbers = #tpu.dot_dimension_numbers<[1], [0], [0], [1], [0, 0, 1, 1], [], []>} : vector<8x32xbf16>, vector<32x128xbf16>, vector<8x128xf32> -> vector<8x128xf32>
    %347 = arith.addf %344, %346 : vector<8x128xf32>
    %348 = vector.extract_strided_slice %347 {offsets = [0, 0], sizes = [8, 32], strides = [1, 1]} : vector<8x128xf32> to vector<8x32xf32>
    %349 = arith.negf %348 : vector<8x32xf32>
    %350 = math.exp %349 : vector<8x32xf32>
    %cst_67 = arith.constant 1.000000e+00 : f32
    %351 = vector.broadcast %cst_67 : f32 to vector<8x32xf32>
    %352 = arith.addf %351, %350 : vector<8x32xf32>
    %353 = arith.divf %351, %352 : vector<8x32xf32>
    %354 = vector.extract_strided_slice %347 {offsets = [0, 32], sizes = [8, 32], strides = [1, 1]} : vector<8x128xf32> to vector<8x32xf32>
    %355 = arith.negf %354 : vector<8x32xf32>
    %356 = math.exp %355 : vector<8x32xf32>
    %cst_68 = arith.constant 1.000000e+00 : f32
    %357 = vector.broadcast %cst_68 : f32 to vector<8x32xf32>
    %358 = arith.addf %357, %356 : vector<8x32xf32>
    %359 = arith.divf %357, %358 : vector<8x32xf32>
    %360 = vector.extract_strided_slice %347 {offsets = [0, 64], sizes = [8, 32], strides = [1, 1]} : vector<8x128xf32> to vector<8x32xf32>
    %361 = math.tanh %360 : vector<8x32xf32>
    %362 = vector.extract_strided_slice %347 {offsets = [0, 96], sizes = [8, 32], strides = [1, 1]} : vector<8x128xf32> to vector<8x32xf32>
    %363 = arith.negf %362 : vector<8x32xf32>
    %364 = math.exp %363 : vector<8x32xf32>
    %cst_69 = arith.constant 1.000000e+00 : f32
    %365 = vector.broadcast %cst_69 : f32 to vector<8x32xf32>
    %366 = arith.addf %365, %364 : vector<8x32xf32>
    %367 = arith.divf %365, %366 : vector<8x32xf32>
    %368 = arith.mulf %359, %334 : vector<8x32xf32>
    %369 = arith.mulf %353, %361 : vector<8x32xf32>
    %370 = arith.addf %368, %369 : vector<8x32xf32>
    %371 = math.tanh %370 : vector<8x32xf32>
    %372 = arith.mulf %367, %371 : vector<8x32xf32>
    %c7_i32 = arith.constant 7 : i32
    %373 = vector.broadcast %c7_i32 : i32 to vector<8x1xi32>
    %374 = arith.cmpi sgt, %0, %373 : vector<8x1xi32>
    %cst_70 = arith.constant 0.000000e+00 : f32
    %375 = vector.shape_cast %374 : vector<8x1xi1> to vector<8x1xi1>
    %376 = vector.broadcast %375 : vector<8x1xi1> to vector<8x32xi1>
    %377 = vector.broadcast %cst_70 : f32 to vector<8x32xf32>
    %378 = arith.select %376, %372, %377 : vector<8x32xi1>, vector<8x32xf32>
    %379 = arith.truncf %378 : vector<8x32xf32> to vector<8x32xbf16>
    %c7 = arith.constant 7 : index
    %c0_71 = arith.constant 0 : index
    %c0_72 = arith.constant 0 : index
    %380 = vector.load %arg18[%c7, %c0_71, %c0_72] : memref<8x8x64xbf16, #tpu.memory_space<vmem>>, vector<1x8x32xbf16>
    %381 = vector.shape_cast %380 : vector<1x8x32xbf16> to vector<8x32xbf16>
    %382 = vector.shape_cast %379 : vector<8x32xbf16> to vector<1x8x32xbf16>
    tpu.vector_store %arg18[%c7, %c0_71, %c0_72], %382 {strides = array<i32>} : memref<8x8x64xbf16, #tpu.memory_space<vmem>>, vector<1x8x32xbf16>,
    %c0_73 = arith.constant 0 : index
    %c0_74 = arith.constant 0 : index
    %383 = vector.load %arg6[%c0_73, %c0_74] : memref<32x128xbf16, #tpu.memory_space<vmem>>, vector<32x128xbf16>
    %cst_75 = arith.constant dense<0.000000e+00> : vector<64x128xf32>
    %384 = tpu.matmul %11, %383, %cst_75 {dimension_numbers = #tpu.dot_dimension_numbers<[1], [0], [0], [1], [0, 0, 1, 1], [], []>} : vector<64x32xbf16>, vector<32x128xbf16>, vector<64x128xf32> -> vector<64x128xf32>
    %c0_76 = arith.constant 0 : index
    %c0_77 = arith.constant 0 : index
    %385 = vector.load %arg8[%c0_76, %c0_77] : memref<1x128xf32, #tpu.memory_space<vmem>>, vector<1x128xf32>
    %386 = vector.broadcast %385 : vector<1x128xf32> to vector<64x128xf32>
    %387 = arith.addf %384, %386 : vector<64x128xf32>
    %388 = vector.shape_cast %387 : vector<64x128xf32> to vector<8x8x128xf32>
    %c0_78 = arith.constant 0 : index
    %c0_79 = arith.constant 0 : index
    %389 = vector.load %arg7[%c0_78, %c0_79] : memref<32x128xbf16, #tpu.memory_space<vmem>>, vector<32x128xbf16>
    %cst_80 = arith.constant 0.000000e+00 : f32
    %390 = vector.broadcast %cst_80 : f32 to vector<8x32xf32>
    %cst_81 = arith.constant 0.000000e+00 : f32
    %391 = vector.broadcast %cst_81 : f32 to vector<8x32xf32>
    %392 = vector.extract_strided_slice %388 {offsets = [7, 0, 0], sizes = [1, 8, 128], strides = [1, 1, 1]} : vector<8x8x128xf32> to vector<1x8x128xf32>
    %393 = vector.shape_cast %392 : vector<1x8x128xf32> to vector<8x128xf32>
    %394 = arith.truncf %390 : vector<8x32xf32> to vector<8x32xbf16>
    %cst_82 = arith.constant dense<0.000000e+00> : vector<8x128xf32>
    %395 = tpu.matmul %394, %389, %cst_82 {dimension_numbers = #tpu.dot_dimension_numbers<[1], [0], [0], [1], [0, 0, 1, 1], [], []>} : vector<8x32xbf16>, vector<32x128xbf16>, vector<8x128xf32> -> vector<8x128xf32>
    %396 = arith.addf %393, %395 : vector<8x128xf32>
    %397 = vector.extract_strided_slice %396 {offsets = [0, 0], sizes = [8, 32], strides = [1, 1]} : vector<8x128xf32> to vector<8x32xf32>
    %398 = arith.negf %397 : vector<8x32xf32>
    %399 = math.exp %398 : vector<8x32xf32>
    %cst_83 = arith.constant 1.000000e+00 : f32
    %400 = vector.broadcast %cst_83 : f32 to vector<8x32xf32>
    %401 = arith.addf %400, %399 : vector<8x32xf32>
    %402 = arith.divf %400, %401 : vector<8x32xf32>
    %403 = vector.extract_strided_slice %396 {offsets = [0, 32], sizes = [8, 32], strides = [1, 1]} : vector<8x128xf32> to vector<8x32xf32>
    %404 = arith.negf %403 : vector<8x32xf32>
    %405 = math.exp %404 : vector<8x32xf32>
    %cst_84 = arith.constant 1.000000e+00 : f32
    %406 = vector.broadcast %cst_84 : f32 to vector<8x32xf32>
    %407 = arith.addf %406, %405 : vector<8x32xf32>
    %408 = arith.divf %406, %407 : vector<8x32xf32>
    %409 = vector.extract_strided_slice %396 {offsets = [0, 64], sizes = [8, 32], strides = [1, 1]} : vector<8x128xf32> to vector<8x32xf32>
    %410 = math.tanh %409 : vector<8x32xf32>
    %411 = vector.extract_strided_slice %396 {offsets = [0, 96], sizes = [8, 32], strides = [1, 1]} : vector<8x128xf32> to vector<8x32xf32>
    %412 = arith.negf %411 : vector<8x32xf32>
    %413 = math.exp %412 : vector<8x32xf32>
    %cst_85 = arith.constant 1.000000e+00 : f32
    %414 = vector.broadcast %cst_85 : f32 to vector<8x32xf32>
    %415 = arith.addf %414, %413 : vector<8x32xf32>
    %416 = arith.divf %414, %415 : vector<8x32xf32>
    %417 = arith.mulf %408, %391 : vector<8x32xf32>
    %418 = arith.mulf %402, %410 : vector<8x32xf32>
    %419 = arith.addf %417, %418 : vector<8x32xf32>
    %420 = math.tanh %419 : vector<8x32xf32>
    %421 = arith.mulf %416, %420 : vector<8x32xf32>
    %c7_i32_86 = arith.constant 7 : i32
    %422 = vector.broadcast %c7_i32_86 : i32 to vector<8x1xi32>
    %423 = arith.cmpi sgt, %0, %422 : vector<8x1xi32>
    %424 = vector.shape_cast %423 : vector<8x1xi1> to vector<8x1xi1>
    %425 = vector.broadcast %424 : vector<8x1xi1> to vector<8x32xi1>
    %426 = arith.select %425, %421, %390 : vector<8x32xi1>, vector<8x32xf32>
    %427 = vector.shape_cast %423 : vector<8x1xi1> to vector<8x1xi1>
    %428 = vector.broadcast %427 : vector<8x1xi1> to vector<8x32xi1>
    %429 = arith.select %428, %419, %391 : vector<8x32xi1>, vector<8x32xf32>
    %cst_87 = arith.constant 0.000000e+00 : f32
    %430 = vector.shape_cast %423 : vector<8x1xi1> to vector<8x1xi1>
    %431 = vector.broadcast %430 : vector<8x1xi1> to vector<8x32xi1>
    %432 = vector.broadcast %cst_87 : f32 to vector<8x32xf32>
    %433 = arith.select %431, %421, %432 : vector<8x32xi1>, vector<8x32xf32>
    %434 = arith.truncf %433 : vector<8x32xf32> to vector<8x32xbf16>
    %c7_88 = arith.constant 7 : index
    %c0_89 = arith.constant 0 : index
    %c32 = arith.constant 32 : index
    %435 = vector.load %arg18[%c7_88, %c0_89, %c32] : memref<8x8x64xbf16, #tpu.memory_space<vmem>>, vector<1x8x32xbf16>
    %436 = vector.shape_cast %435 : vector<1x8x32xbf16> to vector<8x32xbf16>
    %437 = vector.shape_cast %434 : vector<8x32xbf16> to vector<1x8x32xbf16>
    tpu.vector_store %arg18[%c7_88, %c0_89, %c32], %437 {strides = array<i32>} : memref<8x8x64xbf16, #tpu.memory_space<vmem>>, vector<1x8x32xbf16>,
    %438 = vector.extract_strided_slice %388 {offsets = [6, 0, 0], sizes = [1, 8, 128], strides = [1, 1, 1]} : vector<8x8x128xf32> to vector<1x8x128xf32>
    %439 = vector.shape_cast %438 : vector<1x8x128xf32> to vector<8x128xf32>
    %440 = arith.truncf %426 : vector<8x32xf32> to vector<8x32xbf16>
    %cst_90 = arith.constant dense<0.000000e+00> : vector<8x128xf32>
    %441 = tpu.matmul %440, %389, %cst_90 {dimension_numbers = #tpu.dot_dimension_numbers<[1], [0], [0], [1], [0, 0, 1, 1], [], []>} : vector<8x32xbf16>, vector<32x128xbf16>, vector<8x128xf32> -> vector<8x128xf32>
    %442 = arith.addf %439, %441 : vector<8x128xf32>
    %443 = vector.extract_strided_slice %442 {offsets = [0, 0], sizes = [8, 32], strides = [1, 1]} : vector<8x128xf32> to vector<8x32xf32>
    %444 = arith.negf %443 : vector<8x32xf32>
    %445 = math.exp %444 : vector<8x32xf32>
    %cst_91 = arith.constant 1.000000e+00 : f32
    %446 = vector.broadcast %cst_91 : f32 to vector<8x32xf32>
    %447 = arith.addf %446, %445 : vector<8x32xf32>
    %448 = arith.divf %446, %447 : vector<8x32xf32>
    %449 = vector.extract_strided_slice %442 {offsets = [0, 32], sizes = [8, 32], strides = [1, 1]} : vector<8x128xf32> to vector<8x32xf32>
    %450 = arith.negf %449 : vector<8x32xf32>
    %451 = math.exp %450 : vector<8x32xf32>
    %cst_92 = arith.constant 1.000000e+00 : f32
    %452 = vector.broadcast %cst_92 : f32 to vector<8x32xf32>
    %453 = arith.addf %452, %451 : vector<8x32xf32>
    %454 = arith.divf %452, %453 : vector<8x32xf32>
    %455 = vector.extract_strided_slice %442 {offsets = [0, 64], sizes = [8, 32], strides = [1, 1]} : vector<8x128xf32> to vector<8x32xf32>
    %456 = math.tanh %455 : vector<8x32xf32>
    %457 = vector.extract_strided_slice %442 {offsets = [0, 96], sizes = [8, 32], strides = [1, 1]} : vector<8x128xf32> to vector<8x32xf32>
    %458 = arith.negf %457 : vector<8x32xf32>
    %459 = math.exp %458 : vector<8x32xf32>
    %cst_93 = arith.constant 1.000000e+00 : f32
    %460 = vector.broadcast %cst_93 : f32 to vector<8x32xf32>
    %461 = arith.addf %460, %459 : vector<8x32xf32>
    %462 = arith.divf %460, %461 : vector<8x32xf32>
    %463 = arith.mulf %454, %429 : vector<8x32xf32>
    %464 = arith.mulf %448, %456 : vector<8x32xf32>
    %465 = arith.addf %463, %464 : vector<8x32xf32>
    %466 = math.tanh %465 : vector<8x32xf32>
    %467 = arith.mulf %462, %466 : vector<8x32xf32>
    %c6_i32_94 = arith.constant 6 : i32
    %468 = vector.broadcast %c6_i32_94 : i32 to vector<8x1xi32>
    %469 = arith.cmpi sgt, %0, %468 : vector<8x1xi32>
    %470 = vector.shape_cast %469 : vector<8x1xi1> to vector<8x1xi1>
    %471 = vector.broadcast %470 : vector<8x1xi1> to vector<8x32xi1>
    %472 = arith.select %471, %467, %426 : vector<8x32xi1>, vector<8x32xf32>
    %473 = vector.shape_cast %469 : vector<8x1xi1> to vector<8x1xi1>
    %474 = vector.broadcast %473 : vector<8x1xi1> to vector<8x32xi1>
    %475 = arith.select %474, %465, %429 : vector<8x32xi1>, vector<8x32xf32>
    %cst_95 = arith.constant 0.000000e+00 : f32
    %476 = vector.shape_cast %469 : vector<8x1xi1> to vector<8x1xi1>
    %477 = vector.broadcast %476 : vector<8x1xi1> to vector<8x32xi1>
    %478 = vector.broadcast %cst_95 : f32 to vector<8x32xf32>
    %479 = arith.select %477, %467, %478 : vector<8x32xi1>, vector<8x32xf32>
    %480 = arith.truncf %479 : vector<8x32xf32> to vector<8x32xbf16>
    %c6_96 = arith.constant 6 : index
    %c0_97 = arith.constant 0 : index
    %c32_98 = arith.constant 32 : index
    %481 = vector.load %arg18[%c6_96, %c0_97, %c32_98] : memref<8x8x64xbf16, #tpu.memory_space<vmem>>, vector<1x8x32xbf16>
    %482 = vector.shape_cast %481 : vector<1x8x32xbf16> to vector<8x32xbf16>
    %483 = vector.shape_cast %480 : vector<8x32xbf16> to vector<1x8x32xbf16>
    tpu.vector_store %arg18[%c6_96, %c0_97, %c32_98], %483 {strides = array<i32>} : memref<8x8x64xbf16, #tpu.memory_space<vmem>>, vector<1x8x32xbf16>,
    %484 = vector.extract_strided_slice %388 {offsets = [5, 0, 0], sizes = [1, 8, 128], strides = [1, 1, 1]} : vector<8x8x128xf32> to vector<1x8x128xf32>
    %485 = vector.shape_cast %484 : vector<1x8x128xf32> to vector<8x128xf32>
    %486 = arith.truncf %472 : vector<8x32xf32> to vector<8x32xbf16>
    %cst_99 = arith.constant dense<0.000000e+00> : vector<8x128xf32>
    %487 = tpu.matmul %486, %389, %cst_99 {dimension_numbers = #tpu.dot_dimension_numbers<[1], [0], [0], [1], [0, 0, 1, 1], [], []>} : vector<8x32xbf16>, vector<32x128xbf16>, vector<8x128xf32> -> vector<8x128xf32>
    %488 = arith.addf %485, %487 : vector<8x128xf32>
    %489 = vector.extract_strided_slice %488 {offsets = [0, 0], sizes = [8, 32], strides = [1, 1]} : vector<8x128xf32> to vector<8x32xf32>
    %490 = arith.negf %489 : vector<8x32xf32>
    %491 = math.exp %490 : vector<8x32xf32>
    %cst_100 = arith.constant 1.000000e+00 : f32
    %492 = vector.broadcast %cst_100 : f32 to vector<8x32xf32>
    %493 = arith.addf %492, %491 : vector<8x32xf32>
    %494 = arith.divf %492, %493 : vector<8x32xf32>
    %495 = vector.extract_strided_slice %488 {offsets = [0, 32], sizes = [8, 32], strides = [1, 1]} : vector<8x128xf32> to vector<8x32xf32>
    %496 = arith.negf %495 : vector<8x32xf32>
    %497 = math.exp %496 : vector<8x32xf32>
    %cst_101 = arith.constant 1.000000e+00 : f32
    %498 = vector.broadcast %cst_101 : f32 to vector<8x32xf32>
    %499 = arith.addf %498, %497 : vector<8x32xf32>
    %500 = arith.divf %498, %499 : vector<8x32xf32>
    %501 = vector.extract_strided_slice %488 {offsets = [0, 64], sizes = [8, 32], strides = [1, 1]} : vector<8x128xf32> to vector<8x32xf32>
    %502 = math.tanh %501 : vector<8x32xf32>
    %503 = vector.extract_strided_slice %488 {offsets = [0, 96], sizes = [8, 32], strides = [1, 1]} : vector<8x128xf32> to vector<8x32xf32>
    %504 = arith.negf %503 : vector<8x32xf32>
    %505 = math.exp %504 : vector<8x32xf32>
    %cst_102 = arith.constant 1.000000e+00 : f32
    %506 = vector.broadcast %cst_102 : f32 to vector<8x32xf32>
    %507 = arith.addf %506, %505 : vector<8x32xf32>
    %508 = arith.divf %506, %507 : vector<8x32xf32>
    %509 = arith.mulf %500, %475 : vector<8x32xf32>
    %510 = arith.mulf %494, %502 : vector<8x32xf32>
    %511 = arith.addf %509, %510 : vector<8x32xf32>
    %512 = math.tanh %511 : vector<8x32xf32>
    %513 = arith.mulf %508, %512 : vector<8x32xf32>
    %c5_i32_103 = arith.constant 5 : i32
    %514 = vector.broadcast %c5_i32_103 : i32 to vector<8x1xi32>
    %515 = arith.cmpi sgt, %0, %514 : vector<8x1xi32>
    %516 = vector.shape_cast %515 : vector<8x1xi1> to vector<8x1xi1>
    %517 = vector.broadcast %516 : vector<8x1xi1> to vector<8x32xi1>
    %518 = arith.select %517, %513, %472 : vector<8x32xi1>, vector<8x32xf32>
    %519 = vector.shape_cast %515 : vector<8x1xi1> to vector<8x1xi1>
    %520 = vector.broadcast %519 : vector<8x1xi1> to vector<8x32xi1>
    %521 = arith.select %520, %511, %475 : vector<8x32xi1>, vector<8x32xf32>
    %cst_104 = arith.constant 0.000000e+00 : f32
    %522 = vector.shape_cast %515 : vector<8x1xi1> to vector<8x1xi1>
    %523 = vector.broadcast %522 : vector<8x1xi1> to vector<8x32xi1>
    %524 = vector.broadcast %cst_104 : f32 to vector<8x32xf32>
    %525 = arith.select %523, %513, %524 : vector<8x32xi1>, vector<8x32xf32>
    %526 = arith.truncf %525 : vector<8x32xf32> to vector<8x32xbf16>
    %c5_105 = arith.constant 5 : index
    %c0_106 = arith.constant 0 : index
    %c32_107 = arith.constant 32 : index
    %527 = vector.load %arg18[%c5_105, %c0_106, %c32_107] : memref<8x8x64xbf16, #tpu.memory_space<vmem>>, vector<1x8x32xbf16>
    %528 = vector.shape_cast %527 : vector<1x8x32xbf16> to vector<8x32xbf16>
    %529 = vector.shape_cast %526 : vector<8x32xbf16> to vector<1x8x32xbf16>
    tpu.vector_store %arg18[%c5_105, %c0_106, %c32_107], %529 {strides = array<i32>} : memref<8x8x64xbf16, #tpu.memory_space<vmem>>, vector<1x8x32xbf16>,
    %530 = vector.extract_strided_slice %388 {offsets = [4, 0, 0], sizes = [1, 8, 128], strides = [1, 1, 1]} : vector<8x8x128xf32> to vector<1x8x128xf32>
    %531 = vector.shape_cast %530 : vector<1x8x128xf32> to vector<8x128xf32>
    %532 = arith.truncf %518 : vector<8x32xf32> to vector<8x32xbf16>
    %cst_108 = arith.constant dense<0.000000e+00> : vector<8x128xf32>
    %533 = tpu.matmul %532, %389, %cst_108 {dimension_numbers = #tpu.dot_dimension_numbers<[1], [0], [0], [1], [0, 0, 1, 1], [], []>} : vector<8x32xbf16>, vector<32x128xbf16>, vector<8x128xf32> -> vector<8x128xf32>
    %534 = arith.addf %531, %533 : vector<8x128xf32>
    %535 = vector.extract_strided_slice %534 {offsets = [0, 0], sizes = [8, 32], strides = [1, 1]} : vector<8x128xf32> to vector<8x32xf32>
    %536 = arith.negf %535 : vector<8x32xf32>
    %537 = math.exp %536 : vector<8x32xf32>
    %cst_109 = arith.constant 1.000000e+00 : f32
    %538 = vector.broadcast %cst_109 : f32 to vector<8x32xf32>
    %539 = arith.addf %538, %537 : vector<8x32xf32>
    %540 = arith.divf %538, %539 : vector<8x32xf32>
    %541 = vector.extract_strided_slice %534 {offsets = [0, 32], sizes = [8, 32], strides = [1, 1]} : vector<8x128xf32> to vector<8x32xf32>
    %542 = arith.negf %541 : vector<8x32xf32>
    %543 = math.exp %542 : vector<8x32xf32>
    %cst_110 = arith.constant 1.000000e+00 : f32
    %544 = vector.broadcast %cst_110 : f32 to vector<8x32xf32>
    %545 = arith.addf %544, %543 : vector<8x32xf32>
    %546 = arith.divf %544, %545 : vector<8x32xf32>
    %547 = vector.extract_strided_slice %534 {offsets = [0, 64], sizes = [8, 32], strides = [1, 1]} : vector<8x128xf32> to vector<8x32xf32>
    %548 = math.tanh %547 : vector<8x32xf32>
    %549 = vector.extract_strided_slice %534 {offsets = [0, 96], sizes = [8, 32], strides = [1, 1]} : vector<8x128xf32> to vector<8x32xf32>
    %550 = arith.negf %549 : vector<8x32xf32>
    %551 = math.exp %550 : vector<8x32xf32>
    %cst_111 = arith.constant 1.000000e+00 : f32
    %552 = vector.broadcast %cst_111 : f32 to vector<8x32xf32>
    %553 = arith.addf %552, %551 : vector<8x32xf32>
    %554 = arith.divf %552, %553 : vector<8x32xf32>
    %555 = arith.mulf %546, %521 : vector<8x32xf32>
    %556 = arith.mulf %540, %548 : vector<8x32xf32>
    %557 = arith.addf %555, %556 : vector<8x32xf32>
    %558 = math.tanh %557 : vector<8x32xf32>
    %559 = arith.mulf %554, %558 : vector<8x32xf32>
    %c4_i32_112 = arith.constant 4 : i32
    %560 = vector.broadcast %c4_i32_112 : i32 to vector<8x1xi32>
    %561 = arith.cmpi sgt, %0, %560 : vector<8x1xi32>
    %562 = vector.shape_cast %561 : vector<8x1xi1> to vector<8x1xi1>
    %563 = vector.broadcast %562 : vector<8x1xi1> to vector<8x32xi1>
    %564 = arith.select %563, %559, %518 : vector<8x32xi1>, vector<8x32xf32>
    %565 = vector.shape_cast %561 : vector<8x1xi1> to vector<8x1xi1>
    %566 = vector.broadcast %565 : vector<8x1xi1> to vector<8x32xi1>
    %567 = arith.select %566, %557, %521 : vector<8x32xi1>, vector<8x32xf32>
    %cst_113 = arith.constant 0.000000e+00 : f32
    %568 = vector.shape_cast %561 : vector<8x1xi1> to vector<8x1xi1>
    %569 = vector.broadcast %568 : vector<8x1xi1> to vector<8x32xi1>
    %570 = vector.broadcast %cst_113 : f32 to vector<8x32xf32>
    %571 = arith.select %569, %559, %570 : vector<8x32xi1>, vector<8x32xf32>
    %572 = arith.truncf %571 : vector<8x32xf32> to vector<8x32xbf16>
    %c4_114 = arith.constant 4 : index
    %c0_115 = arith.constant 0 : index
    %c32_116 = arith.constant 32 : index
    %573 = vector.load %arg18[%c4_114, %c0_115, %c32_116] : memref<8x8x64xbf16, #tpu.memory_space<vmem>>, vector<1x8x32xbf16>
    %574 = vector.shape_cast %573 : vector<1x8x32xbf16> to vector<8x32xbf16>
    %575 = vector.shape_cast %572 : vector<8x32xbf16> to vector<1x8x32xbf16>
    tpu.vector_store %arg18[%c4_114, %c0_115, %c32_116], %575 {strides = array<i32>} : memref<8x8x64xbf16, #tpu.memory_space<vmem>>, vector<1x8x32xbf16>,
    %576 = vector.extract_strided_slice %388 {offsets = [3, 0, 0], sizes = [1, 8, 128], strides = [1, 1, 1]} : vector<8x8x128xf32> to vector<1x8x128xf32>
    %577 = vector.shape_cast %576 : vector<1x8x128xf32> to vector<8x128xf32>
    %578 = arith.truncf %564 : vector<8x32xf32> to vector<8x32xbf16>
    %cst_117 = arith.constant dense<0.000000e+00> : vector<8x128xf32>
    %579 = tpu.matmul %578, %389, %cst_117 {dimension_numbers = #tpu.dot_dimension_numbers<[1], [0], [0], [1], [0, 0, 1, 1], [], []>} : vector<8x32xbf16>, vector<32x128xbf16>, vector<8x128xf32> -> vector<8x128xf32>
    %580 = arith.addf %577, %579 : vector<8x128xf32>
    %581 = vector.extract_strided_slice %580 {offsets = [0, 0], sizes = [8, 32], strides = [1, 1]} : vector<8x128xf32> to vector<8x32xf32>
    %582 = arith.negf %581 : vector<8x32xf32>
    %583 = math.exp %582 : vector<8x32xf32>
    %cst_118 = arith.constant 1.000000e+00 : f32
    %584 = vector.broadcast %cst_118 : f32 to vector<8x32xf32>
    %585 = arith.addf %584, %583 : vector<8x32xf32>
    %586 = arith.divf %584, %585 : vector<8x32xf32>
    %587 = vector.extract_strided_slice %580 {offsets = [0, 32], sizes = [8, 32], strides = [1, 1]} : vector<8x128xf32> to vector<8x32xf32>
    %588 = arith.negf %587 : vector<8x32xf32>
    %589 = math.exp %588 : vector<8x32xf32>
    %cst_119 = arith.constant 1.000000e+00 : f32
    %590 = vector.broadcast %cst_119 : f32 to vector<8x32xf32>
    %591 = arith.addf %590, %589 : vector<8x32xf32>
    %592 = arith.divf %590, %591 : vector<8x32xf32>
    %593 = vector.extract_strided_slice %580 {offsets = [0, 64], sizes = [8, 32], strides = [1, 1]} : vector<8x128xf32> to vector<8x32xf32>
    %594 = math.tanh %593 : vector<8x32xf32>
    %595 = vector.extract_strided_slice %580 {offsets = [0, 96], sizes = [8, 32], strides = [1, 1]} : vector<8x128xf32> to vector<8x32xf32>
    %596 = arith.negf %595 : vector<8x32xf32>
    %597 = math.exp %596 : vector<8x32xf32>
    %cst_120 = arith.constant 1.000000e+00 : f32
    %598 = vector.broadcast %cst_120 : f32 to vector<8x32xf32>
    %599 = arith.addf %598, %597 : vector<8x32xf32>
    %600 = arith.divf %598, %599 : vector<8x32xf32>
    %601 = arith.mulf %592, %567 : vector<8x32xf32>
    %602 = arith.mulf %586, %594 : vector<8x32xf32>
    %603 = arith.addf %601, %602 : vector<8x32xf32>
    %604 = math.tanh %603 : vector<8x32xf32>
    %605 = arith.mulf %600, %604 : vector<8x32xf32>
    %c3_i32_121 = arith.constant 3 : i32
    %606 = vector.broadcast %c3_i32_121 : i32 to vector<8x1xi32>
    %607 = arith.cmpi sgt, %0, %606 : vector<8x1xi32>
    %608 = vector.shape_cast %607 : vector<8x1xi1> to vector<8x1xi1>
    %609 = vector.broadcast %608 : vector<8x1xi1> to vector<8x32xi1>
    %610 = arith.select %609, %605, %564 : vector<8x32xi1>, vector<8x32xf32>
    %611 = vector.shape_cast %607 : vector<8x1xi1> to vector<8x1xi1>
    %612 = vector.broadcast %611 : vector<8x1xi1> to vector<8x32xi1>
    %613 = arith.select %612, %603, %567 : vector<8x32xi1>, vector<8x32xf32>
    %cst_122 = arith.constant 0.000000e+00 : f32
    %614 = vector.shape_cast %607 : vector<8x1xi1> to vector<8x1xi1>
    %615 = vector.broadcast %614 : vector<8x1xi1> to vector<8x32xi1>
    %616 = vector.broadcast %cst_122 : f32 to vector<8x32xf32>
    %617 = arith.select %615, %605, %616 : vector<8x32xi1>, vector<8x32xf32>
    %618 = arith.truncf %617 : vector<8x32xf32> to vector<8x32xbf16>
    %c3_123 = arith.constant 3 : index
    %c0_124 = arith.constant 0 : index
    %c32_125 = arith.constant 32 : index
    %619 = vector.load %arg18[%c3_123, %c0_124, %c32_125] : memref<8x8x64xbf16, #tpu.memory_space<vmem>>, vector<1x8x32xbf16>
    %620 = vector.shape_cast %619 : vector<1x8x32xbf16> to vector<8x32xbf16>
    %621 = vector.shape_cast %618 : vector<8x32xbf16> to vector<1x8x32xbf16>
    tpu.vector_store %arg18[%c3_123, %c0_124, %c32_125], %621 {strides = array<i32>} : memref<8x8x64xbf16, #tpu.memory_space<vmem>>, vector<1x8x32xbf16>,
    %622 = vector.extract_strided_slice %388 {offsets = [2, 0, 0], sizes = [1, 8, 128], strides = [1, 1, 1]} : vector<8x8x128xf32> to vector<1x8x128xf32>
    %623 = vector.shape_cast %622 : vector<1x8x128xf32> to vector<8x128xf32>
    %624 = arith.truncf %610 : vector<8x32xf32> to vector<8x32xbf16>
    %cst_126 = arith.constant dense<0.000000e+00> : vector<8x128xf32>
    %625 = tpu.matmul %624, %389, %cst_126 {dimension_numbers = #tpu.dot_dimension_numbers<[1], [0], [0], [1], [0, 0, 1, 1], [], []>} : vector<8x32xbf16>, vector<32x128xbf16>, vector<8x128xf32> -> vector<8x128xf32>
    %626 = arith.addf %623, %625 : vector<8x128xf32>
    %627 = vector.extract_strided_slice %626 {offsets = [0, 0], sizes = [8, 32], strides = [1, 1]} : vector<8x128xf32> to vector<8x32xf32>
    %628 = arith.negf %627 : vector<8x32xf32>
    %629 = math.exp %628 : vector<8x32xf32>
    %cst_127 = arith.constant 1.000000e+00 : f32
    %630 = vector.broadcast %cst_127 : f32 to vector<8x32xf32>
    %631 = arith.addf %630, %629 : vector<8x32xf32>
    %632 = arith.divf %630, %631 : vector<8x32xf32>
    %633 = vector.extract_strided_slice %626 {offsets = [0, 32], sizes = [8, 32], strides = [1, 1]} : vector<8x128xf32> to vector<8x32xf32>
    %634 = arith.negf %633 : vector<8x32xf32>
    %635 = math.exp %634 : vector<8x32xf32>
    %cst_128 = arith.constant 1.000000e+00 : f32
    %636 = vector.broadcast %cst_128 : f32 to vector<8x32xf32>
    %637 = arith.addf %636, %635 : vector<8x32xf32>
    %638 = arith.divf %636, %637 : vector<8x32xf32>
    %639 = vector.extract_strided_slice %626 {offsets = [0, 64], sizes = [8, 32], strides = [1, 1]} : vector<8x128xf32> to vector<8x32xf32>
    %640 = math.tanh %639 : vector<8x32xf32>
    %641 = vector.extract_strided_slice %626 {offsets = [0, 96], sizes = [8, 32], strides = [1, 1]} : vector<8x128xf32> to vector<8x32xf32>
    %642 = arith.negf %641 : vector<8x32xf32>
    %643 = math.exp %642 : vector<8x32xf32>
    %cst_129 = arith.constant 1.000000e+00 : f32
    %644 = vector.broadcast %cst_129 : f32 to vector<8x32xf32>
    %645 = arith.addf %644, %643 : vector<8x32xf32>
    %646 = arith.divf %644, %645 : vector<8x32xf32>
    %647 = arith.mulf %638, %613 : vector<8x32xf32>
    %648 = arith.mulf %632, %640 : vector<8x32xf32>
    %649 = arith.addf %647, %648 : vector<8x32xf32>
    %650 = math.tanh %649 : vector<8x32xf32>
    %651 = arith.mulf %646, %650 : vector<8x32xf32>
    %c2_i32_130 = arith.constant 2 : i32
    %652 = vector.broadcast %c2_i32_130 : i32 to vector<8x1xi32>
    %653 = arith.cmpi sgt, %0, %652 : vector<8x1xi32>
    %654 = vector.shape_cast %653 : vector<8x1xi1> to vector<8x1xi1>
    %655 = vector.broadcast %654 : vector<8x1xi1> to vector<8x32xi1>
    %656 = arith.select %655, %651, %610 : vector<8x32xi1>, vector<8x32xf32>
    %657 = vector.shape_cast %653 : vector<8x1xi1> to vector<8x1xi1>
    %658 = vector.broadcast %657 : vector<8x1xi1> to vector<8x32xi1>
    %659 = arith.select %658, %649, %613 : vector<8x32xi1>, vector<8x32xf32>
    %cst_131 = arith.constant 0.000000e+00 : f32
    %660 = vector.shape_cast %653 : vector<8x1xi1> to vector<8x1xi1>
    %661 = vector.broadcast %660 : vector<8x1xi1> to vector<8x32xi1>
    %662 = vector.broadcast %cst_131 : f32 to vector<8x32xf32>
    %663 = arith.select %661, %651, %662 : vector<8x32xi1>, vector<8x32xf32>
    %664 = arith.truncf %663 : vector<8x32xf32> to vector<8x32xbf16>
    %c2_132 = arith.constant 2 : index
    %c0_133 = arith.constant 0 : index
    %c32_134 = arith.constant 32 : index
    %665 = vector.load %arg18[%c2_132, %c0_133, %c32_134] : memref<8x8x64xbf16, #tpu.memory_space<vmem>>, vector<1x8x32xbf16>
    %666 = vector.shape_cast %665 : vector<1x8x32xbf16> to vector<8x32xbf16>
    %667 = vector.shape_cast %664 : vector<8x32xbf16> to vector<1x8x32xbf16>
    tpu.vector_store %arg18[%c2_132, %c0_133, %c32_134], %667 {strides = array<i32>} : memref<8x8x64xbf16, #tpu.memory_space<vmem>>, vector<1x8x32xbf16>,
    %668 = vector.extract_strided_slice %388 {offsets = [1, 0, 0], sizes = [1, 8, 128], strides = [1, 1, 1]} : vector<8x8x128xf32> to vector<1x8x128xf32>
    %669 = vector.shape_cast %668 : vector<1x8x128xf32> to vector<8x128xf32>
    %670 = arith.truncf %656 : vector<8x32xf32> to vector<8x32xbf16>
    %cst_135 = arith.constant dense<0.000000e+00> : vector<8x128xf32>
    %671 = tpu.matmul %670, %389, %cst_135 {dimension_numbers = #tpu.dot_dimension_numbers<[1], [0], [0], [1], [0, 0, 1, 1], [], []>} : vector<8x32xbf16>, vector<32x128xbf16>, vector<8x128xf32> -> vector<8x128xf32>
    %672 = arith.addf %669, %671 : vector<8x128xf32>
    %673 = vector.extract_strided_slice %672 {offsets = [0, 0], sizes = [8, 32], strides = [1, 1]} : vector<8x128xf32> to vector<8x32xf32>
    %674 = arith.negf %673 : vector<8x32xf32>
    %675 = math.exp %674 : vector<8x32xf32>
    %cst_136 = arith.constant 1.000000e+00 : f32
    %676 = vector.broadcast %cst_136 : f32 to vector<8x32xf32>
    %677 = arith.addf %676, %675 : vector<8x32xf32>
    %678 = arith.divf %676, %677 : vector<8x32xf32>
    %679 = vector.extract_strided_slice %672 {offsets = [0, 32], sizes = [8, 32], strides = [1, 1]} : vector<8x128xf32> to vector<8x32xf32>
    %680 = arith.negf %679 : vector<8x32xf32>
    %681 = math.exp %680 : vector<8x32xf32>
    %cst_137 = arith.constant 1.000000e+00 : f32
    %682 = vector.broadcast %cst_137 : f32 to vector<8x32xf32>
    %683 = arith.addf %682, %681 : vector<8x32xf32>
    %684 = arith.divf %682, %683 : vector<8x32xf32>
    %685 = vector.extract_strided_slice %672 {offsets = [0, 64], sizes = [8, 32], strides = [1, 1]} : vector<8x128xf32> to vector<8x32xf32>
    %686 = math.tanh %685 : vector<8x32xf32>
    %687 = vector.extract_strided_slice %672 {offsets = [0, 96], sizes = [8, 32], strides = [1, 1]} : vector<8x128xf32> to vector<8x32xf32>
    %688 = arith.negf %687 : vector<8x32xf32>
    %689 = math.exp %688 : vector<8x32xf32>
    %cst_138 = arith.constant 1.000000e+00 : f32
    %690 = vector.broadcast %cst_138 : f32 to vector<8x32xf32>
    %691 = arith.addf %690, %689 : vector<8x32xf32>
    %692 = arith.divf %690, %691 : vector<8x32xf32>
    %693 = arith.mulf %684, %659 : vector<8x32xf32>
    %694 = arith.mulf %678, %686 : vector<8x32xf32>
    %695 = arith.addf %693, %694 : vector<8x32xf32>
    %696 = math.tanh %695 : vector<8x32xf32>
    %697 = arith.mulf %692, %696 : vector<8x32xf32>
    %c1_i32_139 = arith.constant 1 : i32
    %698 = vector.broadcast %c1_i32_139 : i32 to vector<8x1xi32>
    %699 = arith.cmpi sgt, %0, %698 : vector<8x1xi32>
    %700 = vector.shape_cast %699 : vector<8x1xi1> to vector<8x1xi1>
    %701 = vector.broadcast %700 : vector<8x1xi1> to vector<8x32xi1>
    %702 = arith.select %701, %697, %656 : vector<8x32xi1>, vector<8x32xf32>
    %703 = vector.shape_cast %699 : vector<8x1xi1> to vector<8x1xi1>
    %704 = vector.broadcast %703 : vector<8x1xi1> to vector<8x32xi1>
    %705 = arith.select %704, %695, %659 : vector<8x32xi1>, vector<8x32xf32>
    %cst_140 = arith.constant 0.000000e+00 : f32
    %706 = vector.shape_cast %699 : vector<8x1xi1> to vector<8x1xi1>
    %707 = vector.broadcast %706 : vector<8x1xi1> to vector<8x32xi1>
    %708 = vector.broadcast %cst_140 : f32 to vector<8x32xf32>
    %709 = arith.select %707, %697, %708 : vector<8x32xi1>, vector<8x32xf32>
    %710 = arith.truncf %709 : vector<8x32xf32> to vector<8x32xbf16>
    %c1_141 = arith.constant 1 : index
    %c0_142 = arith.constant 0 : index
    %c32_143 = arith.constant 32 : index
    %711 = vector.load %arg18[%c1_141, %c0_142, %c32_143] : memref<8x8x64xbf16, #tpu.memory_space<vmem>>, vector<1x8x32xbf16>
    %712 = vector.shape_cast %711 : vector<1x8x32xbf16> to vector<8x32xbf16>
    %713 = vector.shape_cast %710 : vector<8x32xbf16> to vector<1x8x32xbf16>
    tpu.vector_store %arg18[%c1_141, %c0_142, %c32_143], %713 {strides = array<i32>} : memref<8x8x64xbf16, #tpu.memory_space<vmem>>, vector<1x8x32xbf16>,
    %714 = vector.extract_strided_slice %388 {offsets = [0, 0, 0], sizes = [1, 8, 128], strides = [1, 1, 1]} : vector<8x8x128xf32> to vector<1x8x128xf32>
    %715 = vector.shape_cast %714 : vector<1x8x128xf32> to vector<8x128xf32>
    %716 = arith.truncf %702 : vector<8x32xf32> to vector<8x32xbf16>
    %cst_144 = arith.constant dense<0.000000e+00> : vector<8x128xf32>
    %717 = tpu.matmul %716, %389, %cst_144 {dimension_numbers = #tpu.dot_dimension_numbers<[1], [0], [0], [1], [0, 0, 1, 1], [], []>} : vector<8x32xbf16>, vector<32x128xbf16>, vector<8x128xf32> -> vector<8x128xf32>
    %718 = arith.addf %715, %717 : vector<8x128xf32>
    %719 = vector.extract_strided_slice %718 {offsets = [0, 0], sizes = [8, 32], strides = [1, 1]} : vector<8x128xf32> to vector<8x32xf32>
    %720 = arith.negf %719 : vector<8x32xf32>
    %721 = math.exp %720 : vector<8x32xf32>
    %cst_145 = arith.constant 1.000000e+00 : f32
    %722 = vector.broadcast %cst_145 : f32 to vector<8x32xf32>
    %723 = arith.addf %722, %721 : vector<8x32xf32>
    %724 = arith.divf %722, %723 : vector<8x32xf32>
    %725 = vector.extract_strided_slice %718 {offsets = [0, 32], sizes = [8, 32], strides = [1, 1]} : vector<8x128xf32> to vector<8x32xf32>
    %726 = arith.negf %725 : vector<8x32xf32>
    %727 = math.exp %726 : vector<8x32xf32>
    %cst_146 = arith.constant 1.000000e+00 : f32
    %728 = vector.broadcast %cst_146 : f32 to vector<8x32xf32>
    %729 = arith.addf %728, %727 : vector<8x32xf32>
    %730 = arith.divf %728, %729 : vector<8x32xf32>
    %731 = vector.extract_strided_slice %718 {offsets = [0, 64], sizes = [8, 32], strides = [1, 1]} : vector<8x128xf32> to vector<8x32xf32>
    %732 = math.tanh %731 : vector<8x32xf32>
    %733 = vector.extract_strided_slice %718 {offsets = [0, 96], sizes = [8, 32], strides = [1, 1]} : vector<8x128xf32> to vector<8x32xf32>
    %734 = arith.negf %733 : vector<8x32xf32>
    %735 = math.exp %734 : vector<8x32xf32>
    %cst_147 = arith.constant 1.000000e+00 : f32
    %736 = vector.broadcast %cst_147 : f32 to vector<8x32xf32>
    %737 = arith.addf %736, %735 : vector<8x32xf32>
    %738 = arith.divf %736, %737 : vector<8x32xf32>
    %739 = arith.mulf %730, %705 : vector<8x32xf32>
    %740 = arith.mulf %724, %732 : vector<8x32xf32>
    %741 = arith.addf %739, %740 : vector<8x32xf32>
    %742 = math.tanh %741 : vector<8x32xf32>
    %743 = arith.mulf %738, %742 : vector<8x32xf32>
    %c0_i32_148 = arith.constant 0 : i32
    %744 = vector.broadcast %c0_i32_148 : i32 to vector<8x1xi32>
    %745 = arith.cmpi sgt, %0, %744 : vector<8x1xi32>
    %cst_149 = arith.constant 0.000000e+00 : f32
    %746 = vector.shape_cast %745 : vector<8x1xi1> to vector<8x1xi1>
    %747 = vector.broadcast %746 : vector<8x1xi1> to vector<8x32xi1>
    %748 = vector.broadcast %cst_149 : f32 to vector<8x32xf32>
    %749 = arith.select %747, %743, %748 : vector<8x32xi1>, vector<8x32xf32>
    %750 = arith.truncf %749 : vector<8x32xf32> to vector<8x32xbf16>
    %c0_150 = arith.constant 0 : index
    %c0_151 = arith.constant 0 : index
    %c32_152 = arith.constant 32 : index
    %751 = vector.load %arg18[%c0_150, %c0_151, %c32_152] : memref<8x8x64xbf16, #tpu.memory_space<vmem>>, vector<1x8x32xbf16>
    %752 = vector.shape_cast %751 : vector<1x8x32xbf16> to vector<8x32xbf16>
    %753 = vector.shape_cast %750 : vector<8x32xbf16> to vector<1x8x32xbf16>
    tpu.vector_store %arg18[%c0_150, %c0_151, %c32_152], %753 {strides = array<i32>} : memref<8x8x64xbf16, #tpu.memory_space<vmem>>, vector<1x8x32xbf16>,
    %c0_153 = arith.constant 0 : index
    %c0_154 = arith.constant 0 : index
    %c0_155 = arith.constant 0 : index
    %754 = vector.load %arg18[%c0_153, %c0_154, %c0_155] : memref<8x8x64xbf16, #tpu.memory_space<vmem>>, vector<8x8x64xbf16>
    %755 = vector.shape_cast %754 : vector<8x8x64xbf16> to vector<64x64xbf16>
    %c0_156 = arith.constant 0 : index
    %c0_157 = arith.constant 0 : index
    %756 = vector.load %arg9[%c0_156, %c0_157] : memref<64x128xbf16, #tpu.memory_space<vmem>>, vector<64x128xbf16>
    %cst_158 = arith.constant dense<0.000000e+00> : vector<64x128xf32>
    %757 = tpu.matmul %755, %756, %cst_158 {dimension_numbers = #tpu.dot_dimension_numbers<[1], [0], [0], [1], [0, 0, 1, 1], [], []>} : vector<64x64xbf16>, vector<64x128xbf16>, vector<64x128xf32> -> vector<64x128xf32>
    %c0_159 = arith.constant 0 : index
    %c0_160 = arith.constant 0 : index
    %758 = vector.load %arg11[%c0_159, %c0_160] : memref<1x128xf32, #tpu.memory_space<vmem>>, vector<1x128xf32>
    %759 = vector.broadcast %758 : vector<1x128xf32> to vector<64x128xf32>
    %760 = arith.addf %757, %759 : vector<64x128xf32>
    %761 = vector.shape_cast %760 : vector<64x128xf32> to vector<8x8x128xf32>
    %c0_161 = arith.constant 0 : index
    %c0_162 = arith.constant 0 : index
    %762 = vector.load %arg10[%c0_161, %c0_162] : memref<32x128xbf16, #tpu.memory_space<vmem>>, vector<32x128xbf16>
    %cst_163 = arith.constant 0.000000e+00 : f32
    %763 = vector.broadcast %cst_163 : f32 to vector<8x32xf32>
    %cst_164 = arith.constant 0.000000e+00 : f32
    %764 = vector.broadcast %cst_164 : f32 to vector<8x32xf32>
    %765 = vector.extract_strided_slice %761 {offsets = [0, 0, 0], sizes = [1, 8, 128], strides = [1, 1, 1]} : vector<8x8x128xf32> to vector<1x8x128xf32>
    %766 = vector.shape_cast %765 : vector<1x8x128xf32> to vector<8x128xf32>
    %767 = arith.truncf %763 : vector<8x32xf32> to vector<8x32xbf16>
    %cst_165 = arith.constant dense<0.000000e+00> : vector<8x128xf32>
    %768 = tpu.matmul %767, %762, %cst_165 {dimension_numbers = #tpu.dot_dimension_numbers<[1], [0], [0], [1], [0, 0, 1, 1], [], []>} : vector<8x32xbf16>, vector<32x128xbf16>, vector<8x128xf32> -> vector<8x128xf32>
    %769 = arith.addf %766, %768 : vector<8x128xf32>
    %770 = vector.extract_strided_slice %769 {offsets = [0, 0], sizes = [8, 32], strides = [1, 1]} : vector<8x128xf32> to vector<8x32xf32>
    %771 = arith.negf %770 : vector<8x32xf32>
    %772 = math.exp %771 : vector<8x32xf32>
    %cst_166 = arith.constant 1.000000e+00 : f32
    %773 = vector.broadcast %cst_166 : f32 to vector<8x32xf32>
    %774 = arith.addf %773, %772 : vector<8x32xf32>
    %775 = arith.divf %773, %774 : vector<8x32xf32>
    %776 = vector.extract_strided_slice %769 {offsets = [0, 32], sizes = [8, 32], strides = [1, 1]} : vector<8x128xf32> to vector<8x32xf32>
    %777 = arith.negf %776 : vector<8x32xf32>
    %778 = math.exp %777 : vector<8x32xf32>
    %cst_167 = arith.constant 1.000000e+00 : f32
    %779 = vector.broadcast %cst_167 : f32 to vector<8x32xf32>
    %780 = arith.addf %779, %778 : vector<8x32xf32>
    %781 = arith.divf %779, %780 : vector<8x32xf32>
    %782 = vector.extract_strided_slice %769 {offsets = [0, 64], sizes = [8, 32], strides = [1, 1]} : vector<8x128xf32> to vector<8x32xf32>
    %783 = math.tanh %782 : vector<8x32xf32>
    %784 = vector.extract_strided_slice %769 {offsets = [0, 96], sizes = [8, 32], strides = [1, 1]} : vector<8x128xf32> to vector<8x32xf32>
    %785 = arith.negf %784 : vector<8x32xf32>
    %786 = math.exp %785 : vector<8x32xf32>
    %cst_168 = arith.constant 1.000000e+00 : f32
    %787 = vector.broadcast %cst_168 : f32 to vector<8x32xf32>
    %788 = arith.addf %787, %786 : vector<8x32xf32>
    %789 = arith.divf %787, %788 : vector<8x32xf32>
    %790 = arith.mulf %781, %764 : vector<8x32xf32>
    %791 = arith.mulf %775, %783 : vector<8x32xf32>
    %792 = arith.addf %790, %791 : vector<8x32xf32>
    %793 = math.tanh %792 : vector<8x32xf32>
    %794 = arith.mulf %789, %793 : vector<8x32xf32>
    %c0_i32_169 = arith.constant 0 : i32
    %795 = vector.broadcast %c0_i32_169 : i32 to vector<8x1xi32>
    %796 = arith.cmpi sgt, %0, %795 : vector<8x1xi32>
    %797 = vector.shape_cast %796 : vector<8x1xi1> to vector<8x1xi1>
    %798 = vector.broadcast %797 : vector<8x1xi1> to vector<8x32xi1>
    %799 = arith.select %798, %794, %763 : vector<8x32xi1>, vector<8x32xf32>
    %800 = vector.shape_cast %796 : vector<8x1xi1> to vector<8x1xi1>
    %801 = vector.broadcast %800 : vector<8x1xi1> to vector<8x32xi1>
    %802 = arith.select %801, %792, %764 : vector<8x32xi1>, vector<8x32xf32>
    %803 = vector.extract_strided_slice %761 {offsets = [1, 0, 0], sizes = [1, 8, 128], strides = [1, 1, 1]} : vector<8x8x128xf32> to vector<1x8x128xf32>
    %804 = vector.shape_cast %803 : vector<1x8x128xf32> to vector<8x128xf32>
    %805 = arith.truncf %799 : vector<8x32xf32> to vector<8x32xbf16>
    %cst_170 = arith.constant dense<0.000000e+00> : vector<8x128xf32>
    %806 = tpu.matmul %805, %762, %cst_170 {dimension_numbers = #tpu.dot_dimension_numbers<[1], [0], [0], [1], [0, 0, 1, 1], [], []>} : vector<8x32xbf16>, vector<32x128xbf16>, vector<8x128xf32> -> vector<8x128xf32>
    %807 = arith.addf %804, %806 : vector<8x128xf32>
    %808 = vector.extract_strided_slice %807 {offsets = [0, 0], sizes = [8, 32], strides = [1, 1]} : vector<8x128xf32> to vector<8x32xf32>
    %809 = arith.negf %808 : vector<8x32xf32>
    %810 = math.exp %809 : vector<8x32xf32>
    %cst_171 = arith.constant 1.000000e+00 : f32
    %811 = vector.broadcast %cst_171 : f32 to vector<8x32xf32>
    %812 = arith.addf %811, %810 : vector<8x32xf32>
    %813 = arith.divf %811, %812 : vector<8x32xf32>
    %814 = vector.extract_strided_slice %807 {offsets = [0, 32], sizes = [8, 32], strides = [1, 1]} : vector<8x128xf32> to vector<8x32xf32>
    %815 = arith.negf %814 : vector<8x32xf32>
    %816 = math.exp %815 : vector<8x32xf32>
    %cst_172 = arith.constant 1.000000e+00 : f32
    %817 = vector.broadcast %cst_172 : f32 to vector<8x32xf32>
    %818 = arith.addf %817, %816 : vector<8x32xf32>
    %819 = arith.divf %817, %818 : vector<8x32xf32>
    %820 = vector.extract_strided_slice %807 {offsets = [0, 64], sizes = [8, 32], strides = [1, 1]} : vector<8x128xf32> to vector<8x32xf32>
    %821 = math.tanh %820 : vector<8x32xf32>
    %822 = vector.extract_strided_slice %807 {offsets = [0, 96], sizes = [8, 32], strides = [1, 1]} : vector<8x128xf32> to vector<8x32xf32>
    %823 = arith.negf %822 : vector<8x32xf32>
    %824 = math.exp %823 : vector<8x32xf32>
    %cst_173 = arith.constant 1.000000e+00 : f32
    %825 = vector.broadcast %cst_173 : f32 to vector<8x32xf32>
    %826 = arith.addf %825, %824 : vector<8x32xf32>
    %827 = arith.divf %825, %826 : vector<8x32xf32>
    %828 = arith.mulf %819, %802 : vector<8x32xf32>
    %829 = arith.mulf %813, %821 : vector<8x32xf32>
    %830 = arith.addf %828, %829 : vector<8x32xf32>
    %831 = math.tanh %830 : vector<8x32xf32>
    %832 = arith.mulf %827, %831 : vector<8x32xf32>
    %c1_i32_174 = arith.constant 1 : i32
    %833 = vector.broadcast %c1_i32_174 : i32 to vector<8x1xi32>
    %834 = arith.cmpi sgt, %0, %833 : vector<8x1xi32>
    %835 = vector.shape_cast %834 : vector<8x1xi1> to vector<8x1xi1>
    %836 = vector.broadcast %835 : vector<8x1xi1> to vector<8x32xi1>
    %837 = arith.select %836, %832, %799 : vector<8x32xi1>, vector<8x32xf32>
    %838 = vector.shape_cast %834 : vector<8x1xi1> to vector<8x1xi1>
    %839 = vector.broadcast %838 : vector<8x1xi1> to vector<8x32xi1>
    %840 = arith.select %839, %830, %802 : vector<8x32xi1>, vector<8x32xf32>
    %841 = vector.extract_strided_slice %761 {offsets = [2, 0, 0], sizes = [1, 8, 128], strides = [1, 1, 1]} : vector<8x8x128xf32> to vector<1x8x128xf32>
    %842 = vector.shape_cast %841 : vector<1x8x128xf32> to vector<8x128xf32>
    %843 = arith.truncf %837 : vector<8x32xf32> to vector<8x32xbf16>
    %cst_175 = arith.constant dense<0.000000e+00> : vector<8x128xf32>
    %844 = tpu.matmul %843, %762, %cst_175 {dimension_numbers = #tpu.dot_dimension_numbers<[1], [0], [0], [1], [0, 0, 1, 1], [], []>} : vector<8x32xbf16>, vector<32x128xbf16>, vector<8x128xf32> -> vector<8x128xf32>
    %845 = arith.addf %842, %844 : vector<8x128xf32>
    %846 = vector.extract_strided_slice %845 {offsets = [0, 0], sizes = [8, 32], strides = [1, 1]} : vector<8x128xf32> to vector<8x32xf32>
    %847 = arith.negf %846 : vector<8x32xf32>
    %848 = math.exp %847 : vector<8x32xf32>
    %cst_176 = arith.constant 1.000000e+00 : f32
    %849 = vector.broadcast %cst_176 : f32 to vector<8x32xf32>
    %850 = arith.addf %849, %848 : vector<8x32xf32>
    %851 = arith.divf %849, %850 : vector<8x32xf32>
    %852 = vector.extract_strided_slice %845 {offsets = [0, 32], sizes = [8, 32], strides = [1, 1]} : vector<8x128xf32> to vector<8x32xf32>
    %853 = arith.negf %852 : vector<8x32xf32>
    %854 = math.exp %853 : vector<8x32xf32>
    %cst_177 = arith.constant 1.000000e+00 : f32
    %855 = vector.broadcast %cst_177 : f32 to vector<8x32xf32>
    %856 = arith.addf %855, %854 : vector<8x32xf32>
    %857 = arith.divf %855, %856 : vector<8x32xf32>
    %858 = vector.extract_strided_slice %845 {offsets = [0, 64], sizes = [8, 32], strides = [1, 1]} : vector<8x128xf32> to vector<8x32xf32>
    %859 = math.tanh %858 : vector<8x32xf32>
    %860 = vector.extract_strided_slice %845 {offsets = [0, 96], sizes = [8, 32], strides = [1, 1]} : vector<8x128xf32> to vector<8x32xf32>
    %861 = arith.negf %860 : vector<8x32xf32>
    %862 = math.exp %861 : vector<8x32xf32>
    %cst_178 = arith.constant 1.000000e+00 : f32
    %863 = vector.broadcast %cst_178 : f32 to vector<8x32xf32>
    %864 = arith.addf %863, %862 : vector<8x32xf32>
    %865 = arith.divf %863, %864 : vector<8x32xf32>
    %866 = arith.mulf %857, %840 : vector<8x32xf32>
    %867 = arith.mulf %851, %859 : vector<8x32xf32>
    %868 = arith.addf %866, %867 : vector<8x32xf32>
    %869 = math.tanh %868 : vector<8x32xf32>
    %870 = arith.mulf %865, %869 : vector<8x32xf32>
    %c2_i32_179 = arith.constant 2 : i32
    %871 = vector.broadcast %c2_i32_179 : i32 to vector<8x1xi32>
    %872 = arith.cmpi sgt, %0, %871 : vector<8x1xi32>
    %873 = vector.shape_cast %872 : vector<8x1xi1> to vector<8x1xi1>
    %874 = vector.broadcast %873 : vector<8x1xi1> to vector<8x32xi1>
    %875 = arith.select %874, %870, %837 : vector<8x32xi1>, vector<8x32xf32>
    %876 = vector.shape_cast %872 : vector<8x1xi1> to vector<8x1xi1>
    %877 = vector.broadcast %876 : vector<8x1xi1> to vector<8x32xi1>
    %878 = arith.select %877, %868, %840 : vector<8x32xi1>, vector<8x32xf32>
    %879 = vector.extract_strided_slice %761 {offsets = [3, 0, 0], sizes = [1, 8, 128], strides = [1, 1, 1]} : vector<8x8x128xf32> to vector<1x8x128xf32>
    %880 = vector.shape_cast %879 : vector<1x8x128xf32> to vector<8x128xf32>
    %881 = arith.truncf %875 : vector<8x32xf32> to vector<8x32xbf16>
    %cst_180 = arith.constant dense<0.000000e+00> : vector<8x128xf32>
    %882 = tpu.matmul %881, %762, %cst_180 {dimension_numbers = #tpu.dot_dimension_numbers<[1], [0], [0], [1], [0, 0, 1, 1], [], []>} : vector<8x32xbf16>, vector<32x128xbf16>, vector<8x128xf32> -> vector<8x128xf32>
    %883 = arith.addf %880, %882 : vector<8x128xf32>
    %884 = vector.extract_strided_slice %883 {offsets = [0, 0], sizes = [8, 32], strides = [1, 1]} : vector<8x128xf32> to vector<8x32xf32>
    %885 = arith.negf %884 : vector<8x32xf32>
    %886 = math.exp %885 : vector<8x32xf32>
    %cst_181 = arith.constant 1.000000e+00 : f32
    %887 = vector.broadcast %cst_181 : f32 to vector<8x32xf32>
    %888 = arith.addf %887, %886 : vector<8x32xf32>
    %889 = arith.divf %887, %888 : vector<8x32xf32>
    %890 = vector.extract_strided_slice %883 {offsets = [0, 32], sizes = [8, 32], strides = [1, 1]} : vector<8x128xf32> to vector<8x32xf32>
    %891 = arith.negf %890 : vector<8x32xf32>
    %892 = math.exp %891 : vector<8x32xf32>
    %cst_182 = arith.constant 1.000000e+00 : f32
    %893 = vector.broadcast %cst_182 : f32 to vector<8x32xf32>
    %894 = arith.addf %893, %892 : vector<8x32xf32>
    %895 = arith.divf %893, %894 : vector<8x32xf32>
    %896 = vector.extract_strided_slice %883 {offsets = [0, 64], sizes = [8, 32], strides = [1, 1]} : vector<8x128xf32> to vector<8x32xf32>
    %897 = math.tanh %896 : vector<8x32xf32>
    %898 = vector.extract_strided_slice %883 {offsets = [0, 96], sizes = [8, 32], strides = [1, 1]} : vector<8x128xf32> to vector<8x32xf32>
    %899 = arith.negf %898 : vector<8x32xf32>
    %900 = math.exp %899 : vector<8x32xf32>
    %cst_183 = arith.constant 1.000000e+00 : f32
    %901 = vector.broadcast %cst_183 : f32 to vector<8x32xf32>
    %902 = arith.addf %901, %900 : vector<8x32xf32>
    %903 = arith.divf %901, %902 : vector<8x32xf32>
    %904 = arith.mulf %895, %878 : vector<8x32xf32>
    %905 = arith.mulf %889, %897 : vector<8x32xf32>
    %906 = arith.addf %904, %905 : vector<8x32xf32>
    %907 = math.tanh %906 : vector<8x32xf32>
    %908 = arith.mulf %903, %907 : vector<8x32xf32>
    %c3_i32_184 = arith.constant 3 : i32
    %909 = vector.broadcast %c3_i32_184 : i32 to vector<8x1xi32>
    %910 = arith.cmpi sgt, %0, %909 : vector<8x1xi32>
    %911 = vector.shape_cast %910 : vector<8x1xi1> to vector<8x1xi1>
    %912 = vector.broadcast %911 : vector<8x1xi1> to vector<8x32xi1>
    %913 = arith.select %912, %908, %875 : vector<8x32xi1>, vector<8x32xf32>
    %914 = vector.shape_cast %910 : vector<8x1xi1> to vector<8x1xi1>
    %915 = vector.broadcast %914 : vector<8x1xi1> to vector<8x32xi1>
    %916 = arith.select %915, %906, %878 : vector<8x32xi1>, vector<8x32xf32>
    %917 = vector.extract_strided_slice %761 {offsets = [4, 0, 0], sizes = [1, 8, 128], strides = [1, 1, 1]} : vector<8x8x128xf32> to vector<1x8x128xf32>
    %918 = vector.shape_cast %917 : vector<1x8x128xf32> to vector<8x128xf32>
    %919 = arith.truncf %913 : vector<8x32xf32> to vector<8x32xbf16>
    %cst_185 = arith.constant dense<0.000000e+00> : vector<8x128xf32>
    %920 = tpu.matmul %919, %762, %cst_185 {dimension_numbers = #tpu.dot_dimension_numbers<[1], [0], [0], [1], [0, 0, 1, 1], [], []>} : vector<8x32xbf16>, vector<32x128xbf16>, vector<8x128xf32> -> vector<8x128xf32>
    %921 = arith.addf %918, %920 : vector<8x128xf32>
    %922 = vector.extract_strided_slice %921 {offsets = [0, 0], sizes = [8, 32], strides = [1, 1]} : vector<8x128xf32> to vector<8x32xf32>
    %923 = arith.negf %922 : vector<8x32xf32>
    %924 = math.exp %923 : vector<8x32xf32>
    %cst_186 = arith.constant 1.000000e+00 : f32
    %925 = vector.broadcast %cst_186 : f32 to vector<8x32xf32>
    %926 = arith.addf %925, %924 : vector<8x32xf32>
    %927 = arith.divf %925, %926 : vector<8x32xf32>
    %928 = vector.extract_strided_slice %921 {offsets = [0, 32], sizes = [8, 32], strides = [1, 1]} : vector<8x128xf32> to vector<8x32xf32>
    %929 = arith.negf %928 : vector<8x32xf32>
    %930 = math.exp %929 : vector<8x32xf32>
    %cst_187 = arith.constant 1.000000e+00 : f32
    %931 = vector.broadcast %cst_187 : f32 to vector<8x32xf32>
    %932 = arith.addf %931, %930 : vector<8x32xf32>
    %933 = arith.divf %931, %932 : vector<8x32xf32>
    %934 = vector.extract_strided_slice %921 {offsets = [0, 64], sizes = [8, 32], strides = [1, 1]} : vector<8x128xf32> to vector<8x32xf32>
    %935 = math.tanh %934 : vector<8x32xf32>
    %936 = vector.extract_strided_slice %921 {offsets = [0, 96], sizes = [8, 32], strides = [1, 1]} : vector<8x128xf32> to vector<8x32xf32>
    %937 = arith.negf %936 : vector<8x32xf32>
    %938 = math.exp %937 : vector<8x32xf32>
    %cst_188 = arith.constant 1.000000e+00 : f32
    %939 = vector.broadcast %cst_188 : f32 to vector<8x32xf32>
    %940 = arith.addf %939, %938 : vector<8x32xf32>
    %941 = arith.divf %939, %940 : vector<8x32xf32>
    %942 = arith.mulf %933, %916 : vector<8x32xf32>
    %943 = arith.mulf %927, %935 : vector<8x32xf32>
    %944 = arith.addf %942, %943 : vector<8x32xf32>
    %945 = math.tanh %944 : vector<8x32xf32>
    %946 = arith.mulf %941, %945 : vector<8x32xf32>
    %c4_i32_189 = arith.constant 4 : i32
    %947 = vector.broadcast %c4_i32_189 : i32 to vector<8x1xi32>
    %948 = arith.cmpi sgt, %0, %947 : vector<8x1xi32>
    %949 = vector.shape_cast %948 : vector<8x1xi1> to vector<8x1xi1>
    %950 = vector.broadcast %949 : vector<8x1xi1> to vector<8x32xi1>
    %951 = arith.select %950, %946, %913 : vector<8x32xi1>, vector<8x32xf32>
    %952 = vector.shape_cast %948 : vector<8x1xi1> to vector<8x1xi1>
    %953 = vector.broadcast %952 : vector<8x1xi1> to vector<8x32xi1>
    %954 = arith.select %953, %944, %916 : vector<8x32xi1>, vector<8x32xf32>
    %955 = vector.extract_strided_slice %761 {offsets = [5, 0, 0], sizes = [1, 8, 128], strides = [1, 1, 1]} : vector<8x8x128xf32> to vector<1x8x128xf32>
    %956 = vector.shape_cast %955 : vector<1x8x128xf32> to vector<8x128xf32>
    %957 = arith.truncf %951 : vector<8x32xf32> to vector<8x32xbf16>
    %cst_190 = arith.constant dense<0.000000e+00> : vector<8x128xf32>
    %958 = tpu.matmul %957, %762, %cst_190 {dimension_numbers = #tpu.dot_dimension_numbers<[1], [0], [0], [1], [0, 0, 1, 1], [], []>} : vector<8x32xbf16>, vector<32x128xbf16>, vector<8x128xf32> -> vector<8x128xf32>
    %959 = arith.addf %956, %958 : vector<8x128xf32>
    %960 = vector.extract_strided_slice %959 {offsets = [0, 0], sizes = [8, 32], strides = [1, 1]} : vector<8x128xf32> to vector<8x32xf32>
    %961 = arith.negf %960 : vector<8x32xf32>
    %962 = math.exp %961 : vector<8x32xf32>
    %cst_191 = arith.constant 1.000000e+00 : f32
    %963 = vector.broadcast %cst_191 : f32 to vector<8x32xf32>
    %964 = arith.addf %963, %962 : vector<8x32xf32>
    %965 = arith.divf %963, %964 : vector<8x32xf32>
    %966 = vector.extract_strided_slice %959 {offsets = [0, 32], sizes = [8, 32], strides = [1, 1]} : vector<8x128xf32> to vector<8x32xf32>
    %967 = arith.negf %966 : vector<8x32xf32>
    %968 = math.exp %967 : vector<8x32xf32>
    %cst_192 = arith.constant 1.000000e+00 : f32
    %969 = vector.broadcast %cst_192 : f32 to vector<8x32xf32>
    %970 = arith.addf %969, %968 : vector<8x32xf32>
    %971 = arith.divf %969, %970 : vector<8x32xf32>
    %972 = vector.extract_strided_slice %959 {offsets = [0, 64], sizes = [8, 32], strides = [1, 1]} : vector<8x128xf32> to vector<8x32xf32>
    %973 = math.tanh %972 : vector<8x32xf32>
    %974 = vector.extract_strided_slice %959 {offsets = [0, 96], sizes = [8, 32], strides = [1, 1]} : vector<8x128xf32> to vector<8x32xf32>
    %975 = arith.negf %974 : vector<8x32xf32>
    %976 = math.exp %975 : vector<8x32xf32>
    %cst_193 = arith.constant 1.000000e+00 : f32
    %977 = vector.broadcast %cst_193 : f32 to vector<8x32xf32>
    %978 = arith.addf %977, %976 : vector<8x32xf32>
    %979 = arith.divf %977, %978 : vector<8x32xf32>
    %980 = arith.mulf %971, %954 : vector<8x32xf32>
    %981 = arith.mulf %965, %973 : vector<8x32xf32>
    %982 = arith.addf %980, %981 : vector<8x32xf32>
    %983 = math.tanh %982 : vector<8x32xf32>
    %984 = arith.mulf %979, %983 : vector<8x32xf32>
    %c5_i32_194 = arith.constant 5 : i32
    %985 = vector.broadcast %c5_i32_194 : i32 to vector<8x1xi32>
    %986 = arith.cmpi sgt, %0, %985 : vector<8x1xi32>
    %987 = vector.shape_cast %986 : vector<8x1xi1> to vector<8x1xi1>
    %988 = vector.broadcast %987 : vector<8x1xi1> to vector<8x32xi1>
    %989 = arith.select %988, %984, %951 : vector<8x32xi1>, vector<8x32xf32>
    %990 = vector.shape_cast %986 : vector<8x1xi1> to vector<8x1xi1>
    %991 = vector.broadcast %990 : vector<8x1xi1> to vector<8x32xi1>
    %992 = arith.select %991, %982, %954 : vector<8x32xi1>, vector<8x32xf32>
    %993 = vector.extract_strided_slice %761 {offsets = [6, 0, 0], sizes = [1, 8, 128], strides = [1, 1, 1]} : vector<8x8x128xf32> to vector<1x8x128xf32>
    %994 = vector.shape_cast %993 : vector<1x8x128xf32> to vector<8x128xf32>
    %995 = arith.truncf %989 : vector<8x32xf32> to vector<8x32xbf16>
    %cst_195 = arith.constant dense<0.000000e+00> : vector<8x128xf32>
    %996 = tpu.matmul %995, %762, %cst_195 {dimension_numbers = #tpu.dot_dimension_numbers<[1], [0], [0], [1], [0, 0, 1, 1], [], []>} : vector<8x32xbf16>, vector<32x128xbf16>, vector<8x128xf32> -> vector<8x128xf32>
    %997 = arith.addf %994, %996 : vector<8x128xf32>
    %998 = vector.extract_strided_slice %997 {offsets = [0, 0], sizes = [8, 32], strides = [1, 1]} : vector<8x128xf32> to vector<8x32xf32>
    %999 = arith.negf %998 : vector<8x32xf32>
    %1000 = math.exp %999 : vector<8x32xf32>
    %cst_196 = arith.constant 1.000000e+00 : f32
    %1001 = vector.broadcast %cst_196 : f32 to vector<8x32xf32>
    %1002 = arith.addf %1001, %1000 : vector<8x32xf32>
    %1003 = arith.divf %1001, %1002 : vector<8x32xf32>
    %1004 = vector.extract_strided_slice %997 {offsets = [0, 32], sizes = [8, 32], strides = [1, 1]} : vector<8x128xf32> to vector<8x32xf32>
    %1005 = arith.negf %1004 : vector<8x32xf32>
    %1006 = math.exp %1005 : vector<8x32xf32>
    %cst_197 = arith.constant 1.000000e+00 : f32
    %1007 = vector.broadcast %cst_197 : f32 to vector<8x32xf32>
    %1008 = arith.addf %1007, %1006 : vector<8x32xf32>
    %1009 = arith.divf %1007, %1008 : vector<8x32xf32>
    %1010 = vector.extract_strided_slice %997 {offsets = [0, 64], sizes = [8, 32], strides = [1, 1]} : vector<8x128xf32> to vector<8x32xf32>
    %1011 = math.tanh %1010 : vector<8x32xf32>
    %1012 = vector.extract_strided_slice %997 {offsets = [0, 96], sizes = [8, 32], strides = [1, 1]} : vector<8x128xf32> to vector<8x32xf32>
    %1013 = arith.negf %1012 : vector<8x32xf32>
    %1014 = math.exp %1013 : vector<8x32xf32>
    %cst_198 = arith.constant 1.000000e+00 : f32
    %1015 = vector.broadcast %cst_198 : f32 to vector<8x32xf32>
    %1016 = arith.addf %1015, %1014 : vector<8x32xf32>
    %1017 = arith.divf %1015, %1016 : vector<8x32xf32>
    %1018 = arith.mulf %1009, %992 : vector<8x32xf32>
    %1019 = arith.mulf %1003, %1011 : vector<8x32xf32>
    %1020 = arith.addf %1018, %1019 : vector<8x32xf32>
    %1021 = math.tanh %1020 : vector<8x32xf32>
    %1022 = arith.mulf %1017, %1021 : vector<8x32xf32>
    %c6_i32_199 = arith.constant 6 : i32
    %1023 = vector.broadcast %c6_i32_199 : i32 to vector<8x1xi32>
    %1024 = arith.cmpi sgt, %0, %1023 : vector<8x1xi32>
    %1025 = vector.shape_cast %1024 : vector<8x1xi1> to vector<8x1xi1>
    %1026 = vector.broadcast %1025 : vector<8x1xi1> to vector<8x32xi1>
    %1027 = arith.select %1026, %1022, %989 : vector<8x32xi1>, vector<8x32xf32>
    %1028 = vector.shape_cast %1024 : vector<8x1xi1> to vector<8x1xi1>
    %1029 = vector.broadcast %1028 : vector<8x1xi1> to vector<8x32xi1>
    %1030 = arith.select %1029, %1020, %992 : vector<8x32xi1>, vector<8x32xf32>
    %1031 = vector.extract_strided_slice %761 {offsets = [7, 0, 0], sizes = [1, 8, 128], strides = [1, 1, 1]} : vector<8x8x128xf32> to vector<1x8x128xf32>
    %1032 = vector.shape_cast %1031 : vector<1x8x128xf32> to vector<8x128xf32>
    %1033 = arith.truncf %1027 : vector<8x32xf32> to vector<8x32xbf16>
    %cst_200 = arith.constant dense<0.000000e+00> : vector<8x128xf32>
    %1034 = tpu.matmul %1033, %762, %cst_200 {dimension_numbers = #tpu.dot_dimension_numbers<[1], [0], [0], [1], [0, 0, 1, 1], [], []>} : vector<8x32xbf16>, vector<32x128xbf16>, vector<8x128xf32> -> vector<8x128xf32>
    %1035 = arith.addf %1032, %1034 : vector<8x128xf32>
    %1036 = vector.extract_strided_slice %1035 {offsets = [0, 0], sizes = [8, 32], strides = [1, 1]} : vector<8x128xf32> to vector<8x32xf32>
    %1037 = arith.negf %1036 : vector<8x32xf32>
    %1038 = math.exp %1037 : vector<8x32xf32>
    %cst_201 = arith.constant 1.000000e+00 : f32
    %1039 = vector.broadcast %cst_201 : f32 to vector<8x32xf32>
    %1040 = arith.addf %1039, %1038 : vector<8x32xf32>
    %1041 = arith.divf %1039, %1040 : vector<8x32xf32>
    %1042 = vector.extract_strided_slice %1035 {offsets = [0, 32], sizes = [8, 32], strides = [1, 1]} : vector<8x128xf32> to vector<8x32xf32>
    %1043 = arith.negf %1042 : vector<8x32xf32>
    %1044 = math.exp %1043 : vector<8x32xf32>
    %cst_202 = arith.constant 1.000000e+00 : f32
    %1045 = vector.broadcast %cst_202 : f32 to vector<8x32xf32>
    %1046 = arith.addf %1045, %1044 : vector<8x32xf32>
    %1047 = arith.divf %1045, %1046 : vector<8x32xf32>
    %1048 = vector.extract_strided_slice %1035 {offsets = [0, 64], sizes = [8, 32], strides = [1, 1]} : vector<8x128xf32> to vector<8x32xf32>
    %1049 = math.tanh %1048 : vector<8x32xf32>
    %1050 = vector.extract_strided_slice %1035 {offsets = [0, 96], sizes = [8, 32], strides = [1, 1]} : vector<8x128xf32> to vector<8x32xf32>
    %1051 = arith.negf %1050 : vector<8x32xf32>
    %1052 = math.exp %1051 : vector<8x32xf32>
    %cst_203 = arith.constant 1.000000e+00 : f32
    %1053 = vector.broadcast %cst_203 : f32 to vector<8x32xf32>
    %1054 = arith.addf %1053, %1052 : vector<8x32xf32>
    %1055 = arith.divf %1053, %1054 : vector<8x32xf32>
    %1056 = arith.mulf %1047, %1030 : vector<8x32xf32>
    %1057 = arith.mulf %1041, %1049 : vector<8x32xf32>
    %1058 = arith.addf %1056, %1057 : vector<8x32xf32>
    %1059 = math.tanh %1058 : vector<8x32xf32>
    %1060 = arith.mulf %1055, %1059 : vector<8x32xf32>
    %c7_i32_204 = arith.constant 7 : i32
    %1061 = vector.broadcast %c7_i32_204 : i32 to vector<8x1xi32>
    %1062 = arith.cmpi sgt, %0, %1061 : vector<8x1xi32>
    %1063 = vector.shape_cast %1062 : vector<8x1xi1> to vector<8x1xi1>
    %1064 = vector.broadcast %1063 : vector<8x1xi1> to vector<8x32xi1>
    %1065 = arith.select %1064, %1060, %1027 : vector<8x32xi1>, vector<8x32xf32>
    %c0_205 = arith.constant 0 : index
    %c0_206 = arith.constant 0 : index
    %1066 = vector.load %arg12[%c0_205, %c0_206] : memref<64x128xbf16, #tpu.memory_space<vmem>>, vector<64x128xbf16>
    %cst_207 = arith.constant dense<0.000000e+00> : vector<64x128xf32>
    %1067 = tpu.matmul %755, %1066, %cst_207 {dimension_numbers = #tpu.dot_dimension_numbers<[1], [0], [0], [1], [0, 0, 1, 1], [], []>} : vector<64x64xbf16>, vector<64x128xbf16>, vector<64x128xf32> -> vector<64x128xf32>
    %c0_208 = arith.constant 0 : index
    %c0_209 = arith.constant 0 : index
    %1068 = vector.load %arg14[%c0_208, %c0_209] : memref<1x128xf32, #tpu.memory_space<vmem>>, vector<1x128xf32>
    %1069 = vector.broadcast %1068 : vector<1x128xf32> to vector<64x128xf32>
    %1070 = arith.addf %1067, %1069 : vector<64x128xf32>
    %1071 = vector.shape_cast %1070 : vector<64x128xf32> to vector<8x8x128xf32>
    %c0_210 = arith.constant 0 : index
    %c0_211 = arith.constant 0 : index
    %1072 = vector.load %arg13[%c0_210, %c0_211] : memref<32x128xbf16, #tpu.memory_space<vmem>>, vector<32x128xbf16>
    %cst_212 = arith.constant 0.000000e+00 : f32
    %1073 = vector.broadcast %cst_212 : f32 to vector<8x32xf32>
    %cst_213 = arith.constant 0.000000e+00 : f32
    %1074 = vector.broadcast %cst_213 : f32 to vector<8x32xf32>
    %1075 = vector.extract_strided_slice %1071 {offsets = [7, 0, 0], sizes = [1, 8, 128], strides = [1, 1, 1]} : vector<8x8x128xf32> to vector<1x8x128xf32>
    %1076 = vector.shape_cast %1075 : vector<1x8x128xf32> to vector<8x128xf32>
    %1077 = arith.truncf %1073 : vector<8x32xf32> to vector<8x32xbf16>
    %cst_214 = arith.constant dense<0.000000e+00> : vector<8x128xf32>
    %1078 = tpu.matmul %1077, %1072, %cst_214 {dimension_numbers = #tpu.dot_dimension_numbers<[1], [0], [0], [1], [0, 0, 1, 1], [], []>} : vector<8x32xbf16>, vector<32x128xbf16>, vector<8x128xf32> -> vector<8x128xf32>
    %1079 = arith.addf %1076, %1078 : vector<8x128xf32>
    %1080 = vector.extract_strided_slice %1079 {offsets = [0, 0], sizes = [8, 32], strides = [1, 1]} : vector<8x128xf32> to vector<8x32xf32>
    %1081 = arith.negf %1080 : vector<8x32xf32>
    %1082 = math.exp %1081 : vector<8x32xf32>
    %cst_215 = arith.constant 1.000000e+00 : f32
    %1083 = vector.broadcast %cst_215 : f32 to vector<8x32xf32>
    %1084 = arith.addf %1083, %1082 : vector<8x32xf32>
    %1085 = arith.divf %1083, %1084 : vector<8x32xf32>
    %1086 = vector.extract_strided_slice %1079 {offsets = [0, 32], sizes = [8, 32], strides = [1, 1]} : vector<8x128xf32> to vector<8x32xf32>
    %1087 = arith.negf %1086 : vector<8x32xf32>
    %1088 = math.exp %1087 : vector<8x32xf32>
    %cst_216 = arith.constant 1.000000e+00 : f32
    %1089 = vector.broadcast %cst_216 : f32 to vector<8x32xf32>
    %1090 = arith.addf %1089, %1088 : vector<8x32xf32>
    %1091 = arith.divf %1089, %1090 : vector<8x32xf32>
    %1092 = vector.extract_strided_slice %1079 {offsets = [0, 64], sizes = [8, 32], strides = [1, 1]} : vector<8x128xf32> to vector<8x32xf32>
    %1093 = math.tanh %1092 : vector<8x32xf32>
    %1094 = vector.extract_strided_slice %1079 {offsets = [0, 96], sizes = [8, 32], strides = [1, 1]} : vector<8x128xf32> to vector<8x32xf32>
    %1095 = arith.negf %1094 : vector<8x32xf32>
    %1096 = math.exp %1095 : vector<8x32xf32>
    %cst_217 = arith.constant 1.000000e+00 : f32
    %1097 = vector.broadcast %cst_217 : f32 to vector<8x32xf32>
    %1098 = arith.addf %1097, %1096 : vector<8x32xf32>
    %1099 = arith.divf %1097, %1098 : vector<8x32xf32>
    %1100 = arith.mulf %1091, %1074 : vector<8x32xf32>
    %1101 = arith.mulf %1085, %1093 : vector<8x32xf32>
    %1102 = arith.addf %1100, %1101 : vector<8x32xf32>
    %1103 = math.tanh %1102 : vector<8x32xf32>
    %1104 = arith.mulf %1099, %1103 : vector<8x32xf32>
    %c7_i32_218 = arith.constant 7 : i32
    %1105 = vector.broadcast %c7_i32_218 : i32 to vector<8x1xi32>
    %1106 = arith.cmpi sgt, %0, %1105 : vector<8x1xi32>
    %1107 = vector.shape_cast %1106 : vector<8x1xi1> to vector<8x1xi1>
    %1108 = vector.broadcast %1107 : vector<8x1xi1> to vector<8x32xi1>
    %1109 = arith.select %1108, %1104, %1073 : vector<8x32xi1>, vector<8x32xf32>
    %1110 = vector.shape_cast %1106 : vector<8x1xi1> to vector<8x1xi1>
    %1111 = vector.broadcast %1110 : vector<8x1xi1> to vector<8x32xi1>
    %1112 = arith.select %1111, %1102, %1074 : vector<8x32xi1>, vector<8x32xf32>
    %1113 = vector.extract_strided_slice %1071 {offsets = [6, 0, 0], sizes = [1, 8, 128], strides = [1, 1, 1]} : vector<8x8x128xf32> to vector<1x8x128xf32>
    %1114 = vector.shape_cast %1113 : vector<1x8x128xf32> to vector<8x128xf32>
    %1115 = arith.truncf %1109 : vector<8x32xf32> to vector<8x32xbf16>
    %cst_219 = arith.constant dense<0.000000e+00> : vector<8x128xf32>
    %1116 = tpu.matmul %1115, %1072, %cst_219 {dimension_numbers = #tpu.dot_dimension_numbers<[1], [0], [0], [1], [0, 0, 1, 1], [], []>} : vector<8x32xbf16>, vector<32x128xbf16>, vector<8x128xf32> -> vector<8x128xf32>
    %1117 = arith.addf %1114, %1116 : vector<8x128xf32>
    %1118 = vector.extract_strided_slice %1117 {offsets = [0, 0], sizes = [8, 32], strides = [1, 1]} : vector<8x128xf32> to vector<8x32xf32>
    %1119 = arith.negf %1118 : vector<8x32xf32>
    %1120 = math.exp %1119 : vector<8x32xf32>
    %cst_220 = arith.constant 1.000000e+00 : f32
    %1121 = vector.broadcast %cst_220 : f32 to vector<8x32xf32>
    %1122 = arith.addf %1121, %1120 : vector<8x32xf32>
    %1123 = arith.divf %1121, %1122 : vector<8x32xf32>
    %1124 = vector.extract_strided_slice %1117 {offsets = [0, 32], sizes = [8, 32], strides = [1, 1]} : vector<8x128xf32> to vector<8x32xf32>
    %1125 = arith.negf %1124 : vector<8x32xf32>
    %1126 = math.exp %1125 : vector<8x32xf32>
    %cst_221 = arith.constant 1.000000e+00 : f32
    %1127 = vector.broadcast %cst_221 : f32 to vector<8x32xf32>
    %1128 = arith.addf %1127, %1126 : vector<8x32xf32>
    %1129 = arith.divf %1127, %1128 : vector<8x32xf32>
    %1130 = vector.extract_strided_slice %1117 {offsets = [0, 64], sizes = [8, 32], strides = [1, 1]} : vector<8x128xf32> to vector<8x32xf32>
    %1131 = math.tanh %1130 : vector<8x32xf32>
    %1132 = vector.extract_strided_slice %1117 {offsets = [0, 96], sizes = [8, 32], strides = [1, 1]} : vector<8x128xf32> to vector<8x32xf32>
    %1133 = arith.negf %1132 : vector<8x32xf32>
    %1134 = math.exp %1133 : vector<8x32xf32>
    %cst_222 = arith.constant 1.000000e+00 : f32
    %1135 = vector.broadcast %cst_222 : f32 to vector<8x32xf32>
    %1136 = arith.addf %1135, %1134 : vector<8x32xf32>
    %1137 = arith.divf %1135, %1136 : vector<8x32xf32>
    %1138 = arith.mulf %1129, %1112 : vector<8x32xf32>
    %1139 = arith.mulf %1123, %1131 : vector<8x32xf32>
    %1140 = arith.addf %1138, %1139 : vector<8x32xf32>
    %1141 = math.tanh %1140 : vector<8x32xf32>
    %1142 = arith.mulf %1137, %1141 : vector<8x32xf32>
    %c6_i32_223 = arith.constant 6 : i32
    %1143 = vector.broadcast %c6_i32_223 : i32 to vector<8x1xi32>
    %1144 = arith.cmpi sgt, %0, %1143 : vector<8x1xi32>
    %1145 = vector.shape_cast %1144 : vector<8x1xi1> to vector<8x1xi1>
    %1146 = vector.broadcast %1145 : vector<8x1xi1> to vector<8x32xi1>
    %1147 = arith.select %1146, %1142, %1109 : vector<8x32xi1>, vector<8x32xf32>
    %1148 = vector.shape_cast %1144 : vector<8x1xi1> to vector<8x1xi1>
    %1149 = vector.broadcast %1148 : vector<8x1xi1> to vector<8x32xi1>
    %1150 = arith.select %1149, %1140, %1112 : vector<8x32xi1>, vector<8x32xf32>
    %1151 = vector.extract_strided_slice %1071 {offsets = [5, 0, 0], sizes = [1, 8, 128], strides = [1, 1, 1]} : vector<8x8x128xf32> to vector<1x8x128xf32>
    %1152 = vector.shape_cast %1151 : vector<1x8x128xf32> to vector<8x128xf32>
    %1153 = arith.truncf %1147 : vector<8x32xf32> to vector<8x32xbf16>
    %cst_224 = arith.constant dense<0.000000e+00> : vector<8x128xf32>
    %1154 = tpu.matmul %1153, %1072, %cst_224 {dimension_numbers = #tpu.dot_dimension_numbers<[1], [0], [0], [1], [0, 0, 1, 1], [], []>} : vector<8x32xbf16>, vector<32x128xbf16>, vector<8x128xf32> -> vector<8x128xf32>
    %1155 = arith.addf %1152, %1154 : vector<8x128xf32>
    %1156 = vector.extract_strided_slice %1155 {offsets = [0, 0], sizes = [8, 32], strides = [1, 1]} : vector<8x128xf32> to vector<8x32xf32>
    %1157 = arith.negf %1156 : vector<8x32xf32>
    %1158 = math.exp %1157 : vector<8x32xf32>
    %cst_225 = arith.constant 1.000000e+00 : f32
    %1159 = vector.broadcast %cst_225 : f32 to vector<8x32xf32>
    %1160 = arith.addf %1159, %1158 : vector<8x32xf32>
    %1161 = arith.divf %1159, %1160 : vector<8x32xf32>
    %1162 = vector.extract_strided_slice %1155 {offsets = [0, 32], sizes = [8, 32], strides = [1, 1]} : vector<8x128xf32> to vector<8x32xf32>
    %1163 = arith.negf %1162 : vector<8x32xf32>
    %1164 = math.exp %1163 : vector<8x32xf32>
    %cst_226 = arith.constant 1.000000e+00 : f32
    %1165 = vector.broadcast %cst_226 : f32 to vector<8x32xf32>
    %1166 = arith.addf %1165, %1164 : vector<8x32xf32>
    %1167 = arith.divf %1165, %1166 : vector<8x32xf32>
    %1168 = vector.extract_strided_slice %1155 {offsets = [0, 64], sizes = [8, 32], strides = [1, 1]} : vector<8x128xf32> to vector<8x32xf32>
    %1169 = math.tanh %1168 : vector<8x32xf32>
    %1170 = vector.extract_strided_slice %1155 {offsets = [0, 96], sizes = [8, 32], strides = [1, 1]} : vector<8x128xf32> to vector<8x32xf32>
    %1171 = arith.negf %1170 : vector<8x32xf32>
    %1172 = math.exp %1171 : vector<8x32xf32>
    %cst_227 = arith.constant 1.000000e+00 : f32
    %1173 = vector.broadcast %cst_227 : f32 to vector<8x32xf32>
    %1174 = arith.addf %1173, %1172 : vector<8x32xf32>
    %1175 = arith.divf %1173, %1174 : vector<8x32xf32>
    %1176 = arith.mulf %1167, %1150 : vector<8x32xf32>
    %1177 = arith.mulf %1161, %1169 : vector<8x32xf32>
    %1178 = arith.addf %1176, %1177 : vector<8x32xf32>
    %1179 = math.tanh %1178 : vector<8x32xf32>
    %1180 = arith.mulf %1175, %1179 : vector<8x32xf32>
    %c5_i32_228 = arith.constant 5 : i32
    %1181 = vector.broadcast %c5_i32_228 : i32 to vector<8x1xi32>
    %1182 = arith.cmpi sgt, %0, %1181 : vector<8x1xi32>
    %1183 = vector.shape_cast %1182 : vector<8x1xi1> to vector<8x1xi1>
    %1184 = vector.broadcast %1183 : vector<8x1xi1> to vector<8x32xi1>
    %1185 = arith.select %1184, %1180, %1147 : vector<8x32xi1>, vector<8x32xf32>
    %1186 = vector.shape_cast %1182 : vector<8x1xi1> to vector<8x1xi1>
    %1187 = vector.broadcast %1186 : vector<8x1xi1> to vector<8x32xi1>
    %1188 = arith.select %1187, %1178, %1150 : vector<8x32xi1>, vector<8x32xf32>
    %1189 = vector.extract_strided_slice %1071 {offsets = [4, 0, 0], sizes = [1, 8, 128], strides = [1, 1, 1]} : vector<8x8x128xf32> to vector<1x8x128xf32>
    %1190 = vector.shape_cast %1189 : vector<1x8x128xf32> to vector<8x128xf32>
    %1191 = arith.truncf %1185 : vector<8x32xf32> to vector<8x32xbf16>
    %cst_229 = arith.constant dense<0.000000e+00> : vector<8x128xf32>
    %1192 = tpu.matmul %1191, %1072, %cst_229 {dimension_numbers = #tpu.dot_dimension_numbers<[1], [0], [0], [1], [0, 0, 1, 1], [], []>} : vector<8x32xbf16>, vector<32x128xbf16>, vector<8x128xf32> -> vector<8x128xf32>
    %1193 = arith.addf %1190, %1192 : vector<8x128xf32>
    %1194 = vector.extract_strided_slice %1193 {offsets = [0, 0], sizes = [8, 32], strides = [1, 1]} : vector<8x128xf32> to vector<8x32xf32>
    %1195 = arith.negf %1194 : vector<8x32xf32>
    %1196 = math.exp %1195 : vector<8x32xf32>
    %cst_230 = arith.constant 1.000000e+00 : f32
    %1197 = vector.broadcast %cst_230 : f32 to vector<8x32xf32>
    %1198 = arith.addf %1197, %1196 : vector<8x32xf32>
    %1199 = arith.divf %1197, %1198 : vector<8x32xf32>
    %1200 = vector.extract_strided_slice %1193 {offsets = [0, 32], sizes = [8, 32], strides = [1, 1]} : vector<8x128xf32> to vector<8x32xf32>
    %1201 = arith.negf %1200 : vector<8x32xf32>
    %1202 = math.exp %1201 : vector<8x32xf32>
    %cst_231 = arith.constant 1.000000e+00 : f32
    %1203 = vector.broadcast %cst_231 : f32 to vector<8x32xf32>
    %1204 = arith.addf %1203, %1202 : vector<8x32xf32>
    %1205 = arith.divf %1203, %1204 : vector<8x32xf32>
    %1206 = vector.extract_strided_slice %1193 {offsets = [0, 64], sizes = [8, 32], strides = [1, 1]} : vector<8x128xf32> to vector<8x32xf32>
    %1207 = math.tanh %1206 : vector<8x32xf32>
    %1208 = vector.extract_strided_slice %1193 {offsets = [0, 96], sizes = [8, 32], strides = [1, 1]} : vector<8x128xf32> to vector<8x32xf32>
    %1209 = arith.negf %1208 : vector<8x32xf32>
    %1210 = math.exp %1209 : vector<8x32xf32>
    %cst_232 = arith.constant 1.000000e+00 : f32
    %1211 = vector.broadcast %cst_232 : f32 to vector<8x32xf32>
    %1212 = arith.addf %1211, %1210 : vector<8x32xf32>
    %1213 = arith.divf %1211, %1212 : vector<8x32xf32>
    %1214 = arith.mulf %1205, %1188 : vector<8x32xf32>
    %1215 = arith.mulf %1199, %1207 : vector<8x32xf32>
    %1216 = arith.addf %1214, %1215 : vector<8x32xf32>
    %1217 = math.tanh %1216 : vector<8x32xf32>
    %1218 = arith.mulf %1213, %1217 : vector<8x32xf32>
    %c4_i32_233 = arith.constant 4 : i32
    %1219 = vector.broadcast %c4_i32_233 : i32 to vector<8x1xi32>
    %1220 = arith.cmpi sgt, %0, %1219 : vector<8x1xi32>
    %1221 = vector.shape_cast %1220 : vector<8x1xi1> to vector<8x1xi1>
    %1222 = vector.broadcast %1221 : vector<8x1xi1> to vector<8x32xi1>
    %1223 = arith.select %1222, %1218, %1185 : vector<8x32xi1>, vector<8x32xf32>
    %1224 = vector.shape_cast %1220 : vector<8x1xi1> to vector<8x1xi1>
    %1225 = vector.broadcast %1224 : vector<8x1xi1> to vector<8x32xi1>
    %1226 = arith.select %1225, %1216, %1188 : vector<8x32xi1>, vector<8x32xf32>
    %1227 = vector.extract_strided_slice %1071 {offsets = [3, 0, 0], sizes = [1, 8, 128], strides = [1, 1, 1]} : vector<8x8x128xf32> to vector<1x8x128xf32>
    %1228 = vector.shape_cast %1227 : vector<1x8x128xf32> to vector<8x128xf32>
    %1229 = arith.truncf %1223 : vector<8x32xf32> to vector<8x32xbf16>
    %cst_234 = arith.constant dense<0.000000e+00> : vector<8x128xf32>
    %1230 = tpu.matmul %1229, %1072, %cst_234 {dimension_numbers = #tpu.dot_dimension_numbers<[1], [0], [0], [1], [0, 0, 1, 1], [], []>} : vector<8x32xbf16>, vector<32x128xbf16>, vector<8x128xf32> -> vector<8x128xf32>
    %1231 = arith.addf %1228, %1230 : vector<8x128xf32>
    %1232 = vector.extract_strided_slice %1231 {offsets = [0, 0], sizes = [8, 32], strides = [1, 1]} : vector<8x128xf32> to vector<8x32xf32>
    %1233 = arith.negf %1232 : vector<8x32xf32>
    %1234 = math.exp %1233 : vector<8x32xf32>
    %cst_235 = arith.constant 1.000000e+00 : f32
    %1235 = vector.broadcast %cst_235 : f32 to vector<8x32xf32>
    %1236 = arith.addf %1235, %1234 : vector<8x32xf32>
    %1237 = arith.divf %1235, %1236 : vector<8x32xf32>
    %1238 = vector.extract_strided_slice %1231 {offsets = [0, 32], sizes = [8, 32], strides = [1, 1]} : vector<8x128xf32> to vector<8x32xf32>
    %1239 = arith.negf %1238 : vector<8x32xf32>
    %1240 = math.exp %1239 : vector<8x32xf32>
    %cst_236 = arith.constant 1.000000e+00 : f32
    %1241 = vector.broadcast %cst_236 : f32 to vector<8x32xf32>
    %1242 = arith.addf %1241, %1240 : vector<8x32xf32>
    %1243 = arith.divf %1241, %1242 : vector<8x32xf32>
    %1244 = vector.extract_strided_slice %1231 {offsets = [0, 64], sizes = [8, 32], strides = [1, 1]} : vector<8x128xf32> to vector<8x32xf32>
    %1245 = math.tanh %1244 : vector<8x32xf32>
    %1246 = vector.extract_strided_slice %1231 {offsets = [0, 96], sizes = [8, 32], strides = [1, 1]} : vector<8x128xf32> to vector<8x32xf32>
    %1247 = arith.negf %1246 : vector<8x32xf32>
    %1248 = math.exp %1247 : vector<8x32xf32>
    %cst_237 = arith.constant 1.000000e+00 : f32
    %1249 = vector.broadcast %cst_237 : f32 to vector<8x32xf32>
    %1250 = arith.addf %1249, %1248 : vector<8x32xf32>
    %1251 = arith.divf %1249, %1250 : vector<8x32xf32>
    %1252 = arith.mulf %1243, %1226 : vector<8x32xf32>
    %1253 = arith.mulf %1237, %1245 : vector<8x32xf32>
    %1254 = arith.addf %1252, %1253 : vector<8x32xf32>
    %1255 = math.tanh %1254 : vector<8x32xf32>
    %1256 = arith.mulf %1251, %1255 : vector<8x32xf32>
    %c3_i32_238 = arith.constant 3 : i32
    %1257 = vector.broadcast %c3_i32_238 : i32 to vector<8x1xi32>
    %1258 = arith.cmpi sgt, %0, %1257 : vector<8x1xi32>
    %1259 = vector.shape_cast %1258 : vector<8x1xi1> to vector<8x1xi1>
    %1260 = vector.broadcast %1259 : vector<8x1xi1> to vector<8x32xi1>
    %1261 = arith.select %1260, %1256, %1223 : vector<8x32xi1>, vector<8x32xf32>
    %1262 = vector.shape_cast %1258 : vector<8x1xi1> to vector<8x1xi1>
    %1263 = vector.broadcast %1262 : vector<8x1xi1> to vector<8x32xi1>
    %1264 = arith.select %1263, %1254, %1226 : vector<8x32xi1>, vector<8x32xf32>
    %1265 = vector.extract_strided_slice %1071 {offsets = [2, 0, 0], sizes = [1, 8, 128], strides = [1, 1, 1]} : vector<8x8x128xf32> to vector<1x8x128xf32>
    %1266 = vector.shape_cast %1265 : vector<1x8x128xf32> to vector<8x128xf32>
    %1267 = arith.truncf %1261 : vector<8x32xf32> to vector<8x32xbf16>
    %cst_239 = arith.constant dense<0.000000e+00> : vector<8x128xf32>
    %1268 = tpu.matmul %1267, %1072, %cst_239 {dimension_numbers = #tpu.dot_dimension_numbers<[1], [0], [0], [1], [0, 0, 1, 1], [], []>} : vector<8x32xbf16>, vector<32x128xbf16>, vector<8x128xf32> -> vector<8x128xf32>
    %1269 = arith.addf %1266, %1268 : vector<8x128xf32>
    %1270 = vector.extract_strided_slice %1269 {offsets = [0, 0], sizes = [8, 32], strides = [1, 1]} : vector<8x128xf32> to vector<8x32xf32>
    %1271 = arith.negf %1270 : vector<8x32xf32>
    %1272 = math.exp %1271 : vector<8x32xf32>
    %cst_240 = arith.constant 1.000000e+00 : f32
    %1273 = vector.broadcast %cst_240 : f32 to vector<8x32xf32>
    %1274 = arith.addf %1273, %1272 : vector<8x32xf32>
    %1275 = arith.divf %1273, %1274 : vector<8x32xf32>
    %1276 = vector.extract_strided_slice %1269 {offsets = [0, 32], sizes = [8, 32], strides = [1, 1]} : vector<8x128xf32> to vector<8x32xf32>
    %1277 = arith.negf %1276 : vector<8x32xf32>
    %1278 = math.exp %1277 : vector<8x32xf32>
    %cst_241 = arith.constant 1.000000e+00 : f32
    %1279 = vector.broadcast %cst_241 : f32 to vector<8x32xf32>
    %1280 = arith.addf %1279, %1278 : vector<8x32xf32>
    %1281 = arith.divf %1279, %1280 : vector<8x32xf32>
    %1282 = vector.extract_strided_slice %1269 {offsets = [0, 64], sizes = [8, 32], strides = [1, 1]} : vector<8x128xf32> to vector<8x32xf32>
    %1283 = math.tanh %1282 : vector<8x32xf32>
    %1284 = vector.extract_strided_slice %1269 {offsets = [0, 96], sizes = [8, 32], strides = [1, 1]} : vector<8x128xf32> to vector<8x32xf32>
    %1285 = arith.negf %1284 : vector<8x32xf32>
    %1286 = math.exp %1285 : vector<8x32xf32>
    %cst_242 = arith.constant 1.000000e+00 : f32
    %1287 = vector.broadcast %cst_242 : f32 to vector<8x32xf32>
    %1288 = arith.addf %1287, %1286 : vector<8x32xf32>
    %1289 = arith.divf %1287, %1288 : vector<8x32xf32>
    %1290 = arith.mulf %1281, %1264 : vector<8x32xf32>
    %1291 = arith.mulf %1275, %1283 : vector<8x32xf32>
    %1292 = arith.addf %1290, %1291 : vector<8x32xf32>
    %1293 = math.tanh %1292 : vector<8x32xf32>
    %1294 = arith.mulf %1289, %1293 : vector<8x32xf32>
    %c2_i32_243 = arith.constant 2 : i32
    %1295 = vector.broadcast %c2_i32_243 : i32 to vector<8x1xi32>
    %1296 = arith.cmpi sgt, %0, %1295 : vector<8x1xi32>
    %1297 = vector.shape_cast %1296 : vector<8x1xi1> to vector<8x1xi1>
    %1298 = vector.broadcast %1297 : vector<8x1xi1> to vector<8x32xi1>
    %1299 = arith.select %1298, %1294, %1261 : vector<8x32xi1>, vector<8x32xf32>
    %1300 = vector.shape_cast %1296 : vector<8x1xi1> to vector<8x1xi1>
    %1301 = vector.broadcast %1300 : vector<8x1xi1> to vector<8x32xi1>
    %1302 = arith.select %1301, %1292, %1264 : vector<8x32xi1>, vector<8x32xf32>
    %1303 = vector.extract_strided_slice %1071 {offsets = [1, 0, 0], sizes = [1, 8, 128], strides = [1, 1, 1]} : vector<8x8x128xf32> to vector<1x8x128xf32>
    %1304 = vector.shape_cast %1303 : vector<1x8x128xf32> to vector<8x128xf32>
    %1305 = arith.truncf %1299 : vector<8x32xf32> to vector<8x32xbf16>
    %cst_244 = arith.constant dense<0.000000e+00> : vector<8x128xf32>
    %1306 = tpu.matmul %1305, %1072, %cst_244 {dimension_numbers = #tpu.dot_dimension_numbers<[1], [0], [0], [1], [0, 0, 1, 1], [], []>} : vector<8x32xbf16>, vector<32x128xbf16>, vector<8x128xf32> -> vector<8x128xf32>
    %1307 = arith.addf %1304, %1306 : vector<8x128xf32>
    %1308 = vector.extract_strided_slice %1307 {offsets = [0, 0], sizes = [8, 32], strides = [1, 1]} : vector<8x128xf32> to vector<8x32xf32>
    %1309 = arith.negf %1308 : vector<8x32xf32>
    %1310 = math.exp %1309 : vector<8x32xf32>
    %cst_245 = arith.constant 1.000000e+00 : f32
    %1311 = vector.broadcast %cst_245 : f32 to vector<8x32xf32>
    %1312 = arith.addf %1311, %1310 : vector<8x32xf32>
    %1313 = arith.divf %1311, %1312 : vector<8x32xf32>
    %1314 = vector.extract_strided_slice %1307 {offsets = [0, 32], sizes = [8, 32], strides = [1, 1]} : vector<8x128xf32> to vector<8x32xf32>
    %1315 = arith.negf %1314 : vector<8x32xf32>
    %1316 = math.exp %1315 : vector<8x32xf32>
    %cst_246 = arith.constant 1.000000e+00 : f32
    %1317 = vector.broadcast %cst_246 : f32 to vector<8x32xf32>
    %1318 = arith.addf %1317, %1316 : vector<8x32xf32>
    %1319 = arith.divf %1317, %1318 : vector<8x32xf32>
    %1320 = vector.extract_strided_slice %1307 {offsets = [0, 64], sizes = [8, 32], strides = [1, 1]} : vector<8x128xf32> to vector<8x32xf32>
    %1321 = math.tanh %1320 : vector<8x32xf32>
    %1322 = vector.extract_strided_slice %1307 {offsets = [0, 96], sizes = [8, 32], strides = [1, 1]} : vector<8x128xf32> to vector<8x32xf32>
    %1323 = arith.negf %1322 : vector<8x32xf32>
    %1324 = math.exp %1323 : vector<8x32xf32>
    %cst_247 = arith.constant 1.000000e+00 : f32
    %1325 = vector.broadcast %cst_247 : f32 to vector<8x32xf32>
    %1326 = arith.addf %1325, %1324 : vector<8x32xf32>
    %1327 = arith.divf %1325, %1326 : vector<8x32xf32>
    %1328 = arith.mulf %1319, %1302 : vector<8x32xf32>
    %1329 = arith.mulf %1313, %1321 : vector<8x32xf32>
    %1330 = arith.addf %1328, %1329 : vector<8x32xf32>
    %1331 = math.tanh %1330 : vector<8x32xf32>
    %1332 = arith.mulf %1327, %1331 : vector<8x32xf32>
    %c1_i32_248 = arith.constant 1 : i32
    %1333 = vector.broadcast %c1_i32_248 : i32 to vector<8x1xi32>
    %1334 = arith.cmpi sgt, %0, %1333 : vector<8x1xi32>
    %1335 = vector.shape_cast %1334 : vector<8x1xi1> to vector<8x1xi1>
    %1336 = vector.broadcast %1335 : vector<8x1xi1> to vector<8x32xi1>
    %1337 = arith.select %1336, %1332, %1299 : vector<8x32xi1>, vector<8x32xf32>
    %1338 = vector.shape_cast %1334 : vector<8x1xi1> to vector<8x1xi1>
    %1339 = vector.broadcast %1338 : vector<8x1xi1> to vector<8x32xi1>
    %1340 = arith.select %1339, %1330, %1302 : vector<8x32xi1>, vector<8x32xf32>
    %1341 = vector.extract_strided_slice %1071 {offsets = [0, 0, 0], sizes = [1, 8, 128], strides = [1, 1, 1]} : vector<8x8x128xf32> to vector<1x8x128xf32>
    %1342 = vector.shape_cast %1341 : vector<1x8x128xf32> to vector<8x128xf32>
    %1343 = arith.truncf %1337 : vector<8x32xf32> to vector<8x32xbf16>
    %cst_249 = arith.constant dense<0.000000e+00> : vector<8x128xf32>
    %1344 = tpu.matmul %1343, %1072, %cst_249 {dimension_numbers = #tpu.dot_dimension_numbers<[1], [0], [0], [1], [0, 0, 1, 1], [], []>} : vector<8x32xbf16>, vector<32x128xbf16>, vector<8x128xf32> -> vector<8x128xf32>
    %1345 = arith.addf %1342, %1344 : vector<8x128xf32>
    %1346 = vector.extract_strided_slice %1345 {offsets = [0, 0], sizes = [8, 32], strides = [1, 1]} : vector<8x128xf32> to vector<8x32xf32>
    %1347 = arith.negf %1346 : vector<8x32xf32>
    %1348 = math.exp %1347 : vector<8x32xf32>
    %cst_250 = arith.constant 1.000000e+00 : f32
    %1349 = vector.broadcast %cst_250 : f32 to vector<8x32xf32>
    %1350 = arith.addf %1349, %1348 : vector<8x32xf32>
    %1351 = arith.divf %1349, %1350 : vector<8x32xf32>
    %1352 = vector.extract_strided_slice %1345 {offsets = [0, 32], sizes = [8, 32], strides = [1, 1]} : vector<8x128xf32> to vector<8x32xf32>
    %1353 = arith.negf %1352 : vector<8x32xf32>
    %1354 = math.exp %1353 : vector<8x32xf32>
    %cst_251 = arith.constant 1.000000e+00 : f32
    %1355 = vector.broadcast %cst_251 : f32 to vector<8x32xf32>
    %1356 = arith.addf %1355, %1354 : vector<8x32xf32>
    %1357 = arith.divf %1355, %1356 : vector<8x32xf32>
    %1358 = vector.extract_strided_slice %1345 {offsets = [0, 64], sizes = [8, 32], strides = [1, 1]} : vector<8x128xf32> to vector<8x32xf32>
    %1359 = math.tanh %1358 : vector<8x32xf32>
    %1360 = vector.extract_strided_slice %1345 {offsets = [0, 96], sizes = [8, 32], strides = [1, 1]} : vector<8x128xf32> to vector<8x32xf32>
    %1361 = arith.negf %1360 : vector<8x32xf32>
    %1362 = math.exp %1361 : vector<8x32xf32>
    %cst_252 = arith.constant 1.000000e+00 : f32
    %1363 = vector.broadcast %cst_252 : f32 to vector<8x32xf32>
    %1364 = arith.addf %1363, %1362 : vector<8x32xf32>
    %1365 = arith.divf %1363, %1364 : vector<8x32xf32>
    %1366 = arith.mulf %1357, %1340 : vector<8x32xf32>
    %1367 = arith.mulf %1351, %1359 : vector<8x32xf32>
    %1368 = arith.addf %1366, %1367 : vector<8x32xf32>
    %1369 = math.tanh %1368 : vector<8x32xf32>
    %1370 = arith.mulf %1365, %1369 : vector<8x32xf32>
    %c0_i32_253 = arith.constant 0 : i32
    %1371 = vector.broadcast %c0_i32_253 : i32 to vector<8x1xi32>
    %1372 = arith.cmpi sgt, %0, %1371 : vector<8x1xi32>
    %1373 = vector.shape_cast %1372 : vector<8x1xi1> to vector<8x1xi1>
    %1374 = vector.broadcast %1373 : vector<8x1xi1> to vector<8x32xi1>
    %1375 = arith.select %1374, %1370, %1337 : vector<8x32xi1>, vector<8x32xf32>
    %c0_254 = arith.constant 0 : index
    %c0_255 = arith.constant 0 : index
    %1376 = vector.load %arg16[%c0_254, %c0_255] : memref<1x128xf32, #tpu.memory_space<vmem>>, vector<1x128xf32>
    %c0_256 = arith.constant 0 : index
    %c0_257 = arith.constant 0 : index
    %1377 = vector.load %arg15[%c0_256, %c0_257] : memref<64x128xf32, #tpu.memory_space<vmem>>, vector<32x128xf32>
    %cst_258 = arith.constant dense<0.000000e+00> : vector<8x128xf32>
    %1378 = tpu.matmul %1065, %1377, %cst_258 {dimension_numbers = #tpu.dot_dimension_numbers<[1], [0], [0], [1], [0, 0, 1, 1], [], []>} : vector<8x32xf32>, vector<32x128xf32>, vector<8x128xf32> -> vector<8x128xf32>
    %1379 = vector.broadcast %1376 : vector<1x128xf32> to vector<8x128xf32>
    %1380 = arith.addf %1379, %1378 : vector<8x128xf32>
    %c32_259 = arith.constant 32 : index
    %c0_260 = arith.constant 0 : index
    %1381 = vector.load %arg15[%c32_259, %c0_260] : memref<64x128xf32, #tpu.memory_space<vmem>>, vector<32x128xf32>
    %cst_261 = arith.constant dense<0.000000e+00> : vector<8x128xf32>
    %1382 = tpu.matmul %1375, %1381, %cst_261 {dimension_numbers = #tpu.dot_dimension_numbers<[1], [0], [0], [1], [0, 0, 1, 1], [], []>} : vector<8x32xf32>, vector<32x128xf32>, vector<8x128xf32> -> vector<8x128xf32>
    %1383 = arith.addf %1380, %1382 : vector<8x128xf32>
    %c0_262 = arith.constant 0 : index
    %c0_263 = arith.constant 0 : index
    %1384 = vector.load %arg17[%c0_262, %c0_263] : memref<8x128xf32, #tpu.memory_space<vmem>>, vector<8x128xf32>
    tpu.vector_store %arg17[%c0_262, %c0_263], %1383 {strides = array<i32>} : memref<8x128xf32, #tpu.memory_space<vmem>>, vector<8x128xf32>,
    return
  }
}

</mosaic_0001>

<bundles_post_ra>
// kernel: _lambda_.1
= control target key start
LH: loop header
LB: loop body
LE: loop exit
PB: predicated region body
PF: predicated region fallthrough
CT: control target
= control target key end

     0   :  { %s4392_s0 = inlined_call_operand.vmem [shape: s32[64,1], index: 0, kind: input, shape index: {}]   ;;  %s4393_s1 = inlined_call_operand.vmem [shape: s32[8,1], index: 1, kind: input, shape index: {}]   ;;  %s4394_s2 = inlined_call_operand.vmem [shape: bf16[128,32], index: 2, kind: input, shape index: {}]   ;;  %s4395_s3 = inlined_call_operand.vmem [shape: bf16[32,128], index: 3, kind: input, shape index: {}]   ;;  %s4396_s4 = inlined_call_operand.vmem [shape: bf16[32,128], index: 4, kind: input, shape index: {}]   ;;  %s4397_s5 = inlined_call_operand.vmem [shape: f32[1,128], index: 5, kind: input, shape index: {}]   ;;  %s4398_s6 = inlined_call_operand.hbm [shape: bf16[32,128], index: 6, kind: input, shape index: {}]   ;;  %s4399_s7 = inlined_call_operand.hbm [shape: bf16[32,128], index: 7, kind: input, shape index: {}]   ;;  %s4400_s8 = inlined_call_operand.vmem [shape: f32[1,128], index: 8, kind: input, shape index: {}]   ;;  %s4401_s9 = inlined_call_operand.vmem [shape: bf16[64,128], index: 9, kind: input, shape index: {}]   ;;  %s4402_s10 = inlined_call_operand.hbm [shape: bf16[32,128], index: 10, kind: input, shape index: {}]   ;;  %s4403_s11 = inlined_call_operand.vmem [shape: f32[1,128], index: 11, kind: input, shape index: {}]   ;;  %s4404_s12 = inlined_call_operand.vmem [shape: bf16[64,128], index: 12, kind: input, shape index: {}]   ;;  %s4405_s13 = inlined_call_operand.hbm [shape: bf16[32,128], index: 13, kind: input, shape index: {}]   ;;  %s4406_s14 = inlined_call_operand.vmem [shape: f32[1,128], index: 14, kind: input, shape index: {}]   ;;  %s4407_s15 = inlined_call_operand.vmem [shape: f32[64,128], index: 15, kind: input, shape index: {}]   ;;  %s4408_s16 = inlined_call_operand.vmem [shape: f32[1,128], index: 16, kind: input, shape index: {}]   ;;  %s4409_s17 = inlined_call_operand.vmem [shape: f32[8,128], index: 17, kind: output, shape index: {}]  }
   0x1   :  { %4412 = sst [smem:[#allocation13_spill]] %s4392_s0 }
   0x2   :  { %4413 = sst [smem:[#allocation14_spill]] %s4393_s1 }
   0x3   :  { %22 = vsyncpa [#allocation4], 0 }
   0x4   :  { %23 = vsyncpa [#allocation6], 0 }
   0x5   :  { %24 = vsyncpa [#allocation9], 0  ;;  %s54_s26 = sshll.u32 %s4399_s7, 4  ;;  %s3368_s27 = smov [#allocation5]   ;;  %s55_s26 = int_to_ptr.hbm [resolvable:$true] %s54_s26 }
   0x6   :  { %s56_s28 = sshll.u32 %s3368_s27, 4  ;;  %s41_s30 = sshll.u32 %s4398_s6, 4  ;;  %s57_s28 = int_to_ptr.vmem [resolvable:$true] %s56_s28  ;;  %s42_s30 = int_to_ptr.hbm [resolvable:$true] %s41_s30 }
   0x7   :  { %s3369_s18 = smov 64   ;;  %s3370_s19 = smov 4  }
   0x8   :  { %62 = dma.hbm_to_vmem [thread:$0]  %s55_s26, 256, %s57_s28, [#allocation6], %s3369_s18, %s3369_s18, %s3370_s19  }
   0x9   :  { %s3371_s1 = smov [#allocation3]   ;;  %s71_s7 = sshll.u32 %s4402_s10, 4  ;;  %s72_s7 = int_to_ptr.hbm [resolvable:$true] %s71_s7 }
   0xa   :  { %s43_s20 = sshll.u32 %s3371_s1, 4  ;;  %s88_s6 = sshll.u32 %s4405_s13, 4  ;;  %s44_s20 = int_to_ptr.vmem [resolvable:$true] %s43_s20  ;;  %s89_s6 = int_to_ptr.hbm [resolvable:$true] %s88_s6 }
   0xb   :  { %49 = dma.hbm_to_vmem [thread:$0]  %s42_s30, 256, %s44_s20, [#allocation4], %s3369_s18, %s3369_s18, %s3370_s19  }
   0xc   :  { %s3372_s25 = smov [#allocation7]   ;;  %s3373_s26 = smov [#allocation8]  }
   0xd   :  { %s73_s27 = sshll.u32 %s3372_s25, 4  ;;  %s90_s28 = sshll.u32 %s3373_s26, 4  ;;  %s74_s27 = int_to_ptr.vmem [resolvable:$true] %s73_s27  ;;  %s91_s28 = int_to_ptr.vmem [resolvable:$true] %s90_s28 }
   0xe   :  { %79 = dma.hbm_to_vmem [thread:$0]  %s72_s7, 256, %s74_s27, [#allocation6], %s3369_s18, %s3369_s18, %s3370_s19  }
   0xf   :  { %96 = dma.hbm_to_vmem [thread:$0]  %s89_s6, 256, %s91_s28, [#allocation9], %s3369_s18, %s3369_s18, %s3370_s19  }
  0x10   :  { %3362 = dma.done.wait [#allocation4], 256  }
  0x11   :  { %3363 = vsyncadd [#allocation4], 4294967040 }
  0x12   :  { %3364 = dma.done.wait [#allocation6], 512  }
  0x13   :  { %3365 = vsyncadd [#allocation6], 4294966784 }
  0x14   :  { %3366 = dma.done.wait [#allocation9], 256  }
  0x15   :  { %3367 = vsyncadd [#allocation9], 4294967040  ;;  %v3374_v0 = vmov 0   ;;  %s4414_s29 = sld [smem:[#allocation13_spill]]  ;;  %v2967_v2 = vld [vmem:[%s4394_s2 + $0x38] sm:$0xff]  ;;  %v2966_v3 = vld [vmem:[%s4394_s2 + $0x30] sm:$0xff]  ;;  %v121_v14 = vlaneseq }
  0x16   :  { %3001 = vset.pattern.permute.xlu0 %v3374_v0  ;;  %3003 = vset.pattern.permute.xlu1 %v3374_v0  ;;  %v2965_v5 = vld [vmem:[%s4394_s2 + $0x28] sm:$0xff]  ;;  %v2964_v6 = vld [vmem:[%s4394_s2 + $0x20] sm:$0xff]  ;;  %v2963_v7 = vld [vmem:[%s4394_s2 + $0x18] sm:$0xff]  ;;  %v3375_v17 = vmov 1.0|1.0   ;;  %vm292_vm3 = vcmask 261120  }
  0x17   :  { %3002 = vset.pattern.permute.xlu2 %v3374_v0  ;;  %239 = vmatpush.bf16.msra.mxu0 %v2967_v2  ;;  %v2962_v8 = vld [vmem:[%s4394_s2 + $0x10] sm:$0xff]  ;;  %v2961_v9 = vld [vmem:[%s4394_s2 + $0x8] sm:$0xff]  ;;  %v2960_v10 = vld [vmem:[%s4394_s2] sm:$0xff]  ;;  %v3541_v15 = vand.u32 127, %v121_v14  ;;  %s4415_s27 = sld [smem:[#allocation14_spill]] }
  0x18   :  { %v3523_v11 = vld [vmem:[%s4396_s4 + $0x8] sm:$0xff]  ;;  %v3529_v12 = vld [vmem:[%s4396_s4] sm:$0xff] }
  0x19   :  { %359 = vmatpush.bf16.msra.mxu2 %v3523_v11  ;;  %432 = vmatpush.bf16.msra.mxu3 %v3523_v11  ;;  %v2969_v18 = vld [vmem:[%s4395_s3 + $0x8] sm:$0xff]  ;;  %v2968_v19 = vld [vmem:[%s4395_s3] sm:$0xff]  ;;  %s3376_s3 = smov 32  }
  0x1a   :  { %311 = vmatpush.bf16.msra.mxu1 %v2969_v18  ;;  %v3559_v25 = vld [vmem:[%s4397_s5] ss:$0 sm:$0xff] }
  0x1b   :  { %v123_v1 = vld [vmem:[%s4414_s29] sm:$0xff]  ;;  %v124_v4 = vld [vmem:[%s4414_s29 + $0x8] sm:$0xff]  ;;  %240 = vmatpush.bf16.msra.mxu0 %v2966_v3  ;;  %v125_v45 = vld [vmem:[%s4414_s29 + $0x10] sm:$0xff] }
  0x1c   :  { %132 = vperm.xlu0 %3001, %v123_v1   ;;  %v126_v52 = vld [vmem:[%s4414_s29 + $0x18] sm:$0xff] }
  0x1d   :  { %360 = vmatpush.bf16.msra.mxu2 %v3529_v12  ;;  %433 = vmatpush.bf16.msra.mxu3 %v3529_v12  ;;  %v3573_v50 = vld [vmem:[%s4415_s27] sm:$0xff] }
  0x1e   :  { %312 = vmatpush.bf16.msra.mxu1 %v2968_v19  ;;  %vm404_vm8 = vcmp.gt.s32.totalorder %v3573_v50, 0  ;;  %vm477_vm13 = vcmp.gt.s32.totalorder %v3573_v50, 1 }
  0x1f   :  { %241 = vmatpush.bf16.msra.mxu0 %v2965_v5  ;;  %v405_v51 = vsel %vm404_vm8, 1, %v3374_v0 }
  0x20   :  { %361 = vmatmul.bf16.vlgmr.msra.gmra.mxu2 %v3374_v0 }
  0x21   :  { %506 = vmatpush.bf16.msrb.mxu2 %v3523_v11  ;;  %580 = vmatpush.bf16.msrb.mxu3 %v3523_v11 }
  0x23   :  { %242 = vmatpush.bf16.msra.mxu0 %v2964_v6 }
  0x24   :  { %135 = vperm.xlu0 %3001, %v124_v4  }
  0x25   :  { %507 = vmatpush.bf16.msrb.mxu2 %v3529_v12  ;;  %581 = vmatpush.bf16.msrb.mxu3 %v3529_v12 }
  0x27   :  { %243 = vmatpush.bf16.msra.mxu0 %v2963_v7 }
  0x29   :  { %654 = vmatpush.bf16.msra.mxu2 %v3523_v11 }
  0x2b   :  { %244 = vmatpush.bf16.msra.mxu0 %v2962_v8 }
  0x2d   :  { %655 = vmatpush.bf16.msra.mxu2 %v3529_v12 }
  0x2f   :  { %245 = vmatpush.bf16.msra.mxu0 %v2961_v9  ;;  %v478_v9 = vsel %vm477_vm13, 1, %v3374_v0 }
  0x33   :  { %246 = vmatpush.bf16.msra.mxu0 %v2960_v10 }
  0x8e   :  { %v133_v13 = vpop.permute.xlu0 %132 }
  0x8f   :  { %vm155_vm0 = vcmp.eq.s32.totalorder %v133_v13, %v3541_v15 }
  0x96   :  { %v136_v16 = vpop.permute.xlu0 %135 }
  0x97   :  { %vm156_vm1 = vcmp.eq.s32.totalorder %v136_v16, %v3541_v15 }
  0x98   :  { %vm2778_vm2 = vmpackc.low %vm156_vm1, %vm155_vm0 }
  0x99   :  { %2779 = vmatmul.msk.bf16.vlgmr.msra.gmra.mxu0 %vm2778_vm2, %v3375_v17 }
  0xa3   :  { %v362_v20 = vpop.f32.mrf.mxu2 }
  0xab   :  { %v364_v21 = vpop.f32.mrf.mxu2 }
 0x116   :  { %v248_v22 = vpop.f32.mrf.mxu0 }
 0x11e   :  { %v250_v23 = vpop.f32.mrf.mxu0 }
 0x11f   :  { %v3552_v24 = vpack.c.bf16 %v250_v23, %v248_v22 }
 0x121   :  { %2794 = vmatmul.msk.bf16.vlgmr.msra.gmra.mxu1 %vm292_vm3, %v3552_v24 }
 0x19e   :  { %v314_v26 = vpop.f32.mrf.mxu1 }
 0x19f   :  { %v315_v27 = vadd.f32 %v3559_v25, %v314_v26 }
 0x1a1   :  { %v366_v28 = vadd.f32 %v362_v20, %v315_v27 }
 0x1a3   :  { %3009 = vtanh.f32 %v366_v28  ;;  %v2806_v30 = vmul.f32 -1.442695, %v366_v28 }
 0x1a5   :  { %3011 = vpow2.f32 %v2806_v30 }
 0x1a6   :  { %v316_v3 = vpop.f32.mrf.mxu1 }
 0x1a7   :  { %v317_v4 = vadd.f32 %v3559_v25, %v316_v3 }
 0x1a9   :  { %v3010_v29 = vpop.eup %3009 }
 0x1aa   :  { %389 = vrot.lane.b32.xlu1 %v3010_v29, %s3369_s18 }
 0x1ab   :  { %v3012_v31 = vpop.eup %3011 }
 0x1ac   :  { %v370_v32 = vadd.f32 1.0, %v3012_v31 }
 0x1ae   :  { %3013 = vrcp.f32 %v370_v32  ;;  %v382_v38 = vand.u32 2147483648, %v370_v32  ;;  %vm376_vm5 = vweird.f32 %v370_v32  ;;  %v380_v39 = vand.u32 2147483647, %v370_v32 }
 0x1b0   :  { %v383_v41 = vor.u32 1.1754944e-38, %v382_v38  ;;  %vm381_vm7 = vcmp.eq.f32.partialorder %v380_v39, 8.507059e+37 }
 0x1b4   :  { %v3014_v33 = vpop.eup %3013 }
 0x1b5   :  { %v372_v34 = vmul.f32 %v3014_v33, %v370_v32  ;;  %vm377_vm4 = vweird.f32 %v3014_v33 }
 0x1b6   :  { %vm378_vm6 = vmor %vm376_vm5, %vm377_vm4  ;;  %vm551_vm4 = vcmp.gt.s32.totalorder %v3573_v50, 2 }
 0x1b7   :  { %v373_v35 = vsub.f32 1.0, %v372_v34 }
 0x1b9   :  { %v374_v36 = vmul.f32 %v3014_v33, %v373_v35 }
 0x1bb   :  { %v375_v37 = vadd.f32 %v3014_v33, %v374_v36 }
 0x1bd   :  { %v379_v40 = vsel %vm378_vm6, %v3014_v33, %v375_v37 }
 0x1be   :  { %v384_v43 = vsel %vm381_vm7, %v383_v41, %v379_v40 }
 0x1bf   :  { %v387_v46 = vmul.f32 0.0, %v384_v43 }
 0x21c   :  { %v390_v42 = vpop.permute.xlu1 %389 }
 0x21d   :  { %v392_v44 = vmul.f32 %v390_v42, %v384_v43 }
 0x21f   :  { %394 = vrot.lane.b32.xlu1 %v392_v44, %s3376_s3 }
 0x227   :  { %138 = vperm.xlu1 %3003, %v125_v45  }
 0x291   :  { %v395_v47 = vpop.permute.xlu1 %394 }
 0x292   :  { %v3567_v48 = vadd.f32 %v395_v47, %v387_v46 }
 0x294   :  { %3015 = vtanh.f32 %v3567_v48 }
 0x299   :  { %v139_v58 = vpop.permute.xlu1 %138 }
 0x29a   :  { %v3016_v49 = vpop.eup %3015  ;;  %vm157_vm10 = vcmp.eq.s32.totalorder %v139_v58, %v3541_v15 }
 0x29b   :  { %400 = vrot.lane.b32.xlu2 %v3016_v49, %s3369_s18  ;;  %v128_v49 = vld [vmem:[%s4414_s29 + $0x28] sm:$0xff] }
 0x2a3   :  { %407 = vperm.xlu2 %3002, %v405_v51  }
 0x2ab   :  { %141 = vperm.xlu2 %3002, %v126_v52  }
 0x2f5   :  { %v401_v53 = vpop.permute.xlu2 %400 }
 0x2f6   :  { %v403_v54 = vmul.f32 %v401_v53, %v384_v43 }
 0x2fd   :  { %v3581_v55 = vpop.permute.xlu2 %407 }
 0x2fe   :  { %vm4411_vm9 = vcmp.eq.s32.totalorder %v3581_v55, 1 }
 0x2ff   :  { %v3586_v56 = vsel %vm4411_vm9, %v403_v54, 0.0  ;;  %v411_v31 = vsel %vm4411_vm9, %v3567_v48, 0.0  ;;  %v552_v48 = vsel %vm551_vm4, 1, %v3374_v0 }
 0x300   :  { %v3590_v57 = vpack.c.bf16 %v3586_v56, %v3586_v56 }
 0x302   :  { %v419_v59 = vunpack.c.l.b16 %v3590_v57 }
 0x304   :  { %v420_v60 = vpack.c.b16 %v419_v59, %v419_v59 }
 0x305   :  { %v142_v61 = vpop.permute.xlu2 %141 }
 0x306   :  { %vm158_vm11 = vcmp.eq.s32.totalorder %v142_v61, %v3541_v15  ;;  %421 = vrot.lane.b32.xlu0 %v420_v60, %s3376_s3 }
 0x307   :  { %vm2780_vm12 = vmpackc.low %vm158_vm11, %vm157_vm10 }
 0x308   :  { %2781 = vmatmul.msk.bf16.gmra.mxu0 %vm2780_vm12, %v3375_v17 }
 0x378   :  { %v422_v62 = vpop.permute.xlu0 %421 }
 0x379   :  { %2807 = vmatmul.msk.bf16.vlgmr.msra.gmra.mxu3 %vm292_vm3, %v422_v62 }
 0x37a   :  { %728 = vmatpush.bf16.msra.mxu3 %v3523_v11 }
 0x37e   :  { %729 = vmatpush.bf16.msra.mxu3 %v3529_v12 }
 0x385   :  { %v253_v63 = vpop.f32.mrf.mxu0 }
 0x38d   :  { %v255_v1 = vpop.f32.mrf.mxu0 }
 0x38e   :  { %v3600_v2 = vpack.c.bf16 %v255_v1, %v253_v63 }
 0x390   :  { %2795 = vmatmul.msk.bf16.gmra.mxu1 %vm292_vm3, %v3600_v2 }
 0x3fc   :  { %v435_v5 = vpop.f32.mrf.mxu3 }
 0x3fd   :  { %v439_v6 = vadd.f32 %v435_v5, %v317_v4 }
 0x3ff   :  { %3017 = vtanh.f32 %v439_v6  ;;  %v2808_v10 = vmul.f32 -1.442695, %v439_v6 }
 0x401   :  { %3019 = vpow2.f32 %v2808_v10 }
 0x404   :  { %v437_v7 = vpop.f32.mrf.mxu3 }
 0x405   :  { %v3018_v8 = vpop.eup %3017 }
 0x406   :  { %462 = vrot.lane.b32.xlu0 %v3018_v8, %s3369_s18 }
 0x407   :  { %v3020_v13 = vpop.eup %3019 }
 0x408   :  { %v443_v14 = vadd.f32 1.0, %v3020_v13  ;;  %v127_v13 = vld [vmem:[%s4414_s29 + $0x20] sm:$0xff] }
 0x40a   :  { %3021 = vrcp.f32 %v443_v14  ;;  %v455_v22 = vand.u32 2147483648, %v443_v14  ;;  %vm449_vm15 = vweird.f32 %v443_v14  ;;  %v453_v23 = vand.u32 2147483647, %v443_v14 }
 0x40c   :  { %v456_v27 = vor.u32 1.1754944e-38, %v455_v22  ;;  %vm454_vm1 = vcmp.eq.f32.partialorder %v453_v23, 8.507059e+37 }
 0x40d   :  { %v319_v42 = vpop.f32.mrf.mxu1 }
 0x40e   :  { %480 = vperm.xlu0 %3001, %v478_v9   ;;  %v320_v43 = vadd.f32 %v3559_v25, %v319_v42 }
 0x410   :  { %v3022_v16 = vpop.eup %3021 }
 0x411   :  { %v445_v18 = vmul.f32 %v3022_v16, %v443_v14  ;;  %vm450_vm14 = vweird.f32 %v3022_v16 }
 0x412   :  { %vm451_vm0 = vmor %vm449_vm15, %vm450_vm14  ;;  %vm625_vm14 = vcmp.gt.s32.totalorder %v3573_v50, 3 }
 0x413   :  { %v446_v19 = vsub.f32 1.0, %v445_v18 }
 0x415   :  { %v447_v20 = vmul.f32 %v3022_v16, %v446_v19 }
 0x417   :  { %v448_v21 = vadd.f32 %v3022_v16, %v447_v20 }
 0x419   :  { %v452_v26 = vsel %vm451_vm0, %v3022_v16, %v448_v21 }
 0x41a   :  { %v457_v29 = vsel %vm454_vm1, %v456_v27, %v452_v26 }
 0x41b   :  { %v460_v32 = vmul.f32 %v457_v29, %v411_v31 }
 0x478   :  { %v463_v28 = vpop.permute.xlu0 %462 }
 0x479   :  { %v465_v30 = vmul.f32 %v463_v28, %v457_v29 }
 0x47b   :  { %467 = vrot.lane.b32.xlu1 %v465_v30, %s3376_s3 }
 0x480   :  { %v3613_v36 = vpop.permute.xlu0 %480 }
 0x481   :  { %vm482_vm2 = vcmp.eq.s32.totalorder %v3613_v36, 1  ;;  %v2711_v36 = vld [vmem:[%s4407_s15 + $0x38] sm:$0xff] }
 0x4ed   :  { %v468_v33 = vpop.permute.xlu1 %467 }
 0x4ee   :  { %v470_v34 = vadd.f32 %v468_v33, %v460_v32 }
 0x4f0   :  { %3023 = vtanh.f32 %v470_v34  ;;  %v3636_v6 = vsel %vm482_vm2, %v470_v34, %v411_v31 }
 0x4f6   :  { %v3024_v35 = vpop.eup %3023 }
 0x4f7   :  { %473 = vrot.lane.b32.xlu2 %v3024_v35, %s3369_s18 }
 0x551   :  { %v474_v37 = vpop.permute.xlu2 %473 }
 0x552   :  { %v3615_v38 = vmul.f32 %v474_v37, %v457_v29  ;;  %v321_v29 = vpop.f32.mrf.mxu1 }
 0x553   :  { %v322_v30 = vadd.f32 %v3559_v25, %v321_v29 }
 0x554   :  { %v483_v39 = vsel %vm482_vm2, %v3615_v38, %v3586_v56 }
 0x555   :  { %v493_v40 = vpack.c.bf16 %v483_v39, %v483_v39 }
 0x557   :  { %495 = vrot.lane.b32.xlu1 %v493_v40, %s3376_s3 }
 0x5c9   :  { %v496_v41 = vpop.permute.xlu1 %495 }
 0x5ca   :  { %2809 = vmatmul.msk.bf16.vlgmr.msrb.gmra.mxu2 %vm292_vm3, %v496_v41 }
 0x5cb   :  { %802 = vmatpush.bf16.msrb.mxu2 %v3523_v11 }
 0x5cf   :  { %803 = vmatpush.bf16.msrb.mxu2 %v3529_v12 }
 0x64d   :  { %v509_v44 = vpop.f32.mrf.mxu2 }
 0x64e   :  { %v513_v45 = vadd.f32 %v509_v44, %v320_v43 }
 0x650   :  { %3025 = vtanh.f32 %v513_v45  ;;  %v2810_v51 = vmul.f32 -1.442695, %v513_v45 }
 0x652   :  { %3027 = vpow2.f32 %v2810_v51 }
 0x655   :  { %v511_v46 = vpop.f32.mrf.mxu2 }
 0x656   :  { %v3026_v47 = vpop.eup %3025 }
 0x657   :  { %536 = vrot.lane.b32.xlu2 %v3026_v47, %s3369_s18 }
 0x658   :  { %v3028_v52 = vpop.eup %3027 }
 0x659   :  { %v517_v53 = vadd.f32 1.0, %v3028_v52 }
 0x65b   :  { %3029 = vrcp.f32 %v517_v53  ;;  %v529_v61 = vand.u32 2147483648, %v517_v53  ;;  %vm523_vm6 = vweird.f32 %v517_v53  ;;  %v527_v62 = vand.u32 2147483647, %v517_v53 }
 0x65d   :  { %v530_v1 = vor.u32 1.1754944e-38, %v529_v61  ;;  %vm528_vm8 = vcmp.eq.f32.partialorder %v527_v62, 8.507059e+37 }
 0x65f   :  { %554 = vperm.xlu2 %3002, %v552_v48  }
 0x661   :  { %v3030_v54 = vpop.eup %3029 }
 0x662   :  { %v519_v56 = vmul.f32 %v3030_v54, %v517_v53  ;;  %vm524_vm5 = vweird.f32 %v3030_v54 }
 0x663   :  { %vm525_vm7 = vmor %vm523_vm6, %vm524_vm5  ;;  %vm699_vm6 = vcmp.gt.s32.totalorder %v3573_v50, 4 }
 0x664   :  { %v520_v58 = vsub.f32 1.0, %v519_v56 }
 0x666   :  { %v521_v59 = vmul.f32 %v3030_v54, %v520_v58 }
 0x667   :  { %147 = vperm.xlu2 %3002, %v128_v49  }
 0x668   :  { %v522_v60 = vadd.f32 %v3030_v54, %v521_v59 }
 0x66a   :  { %v526_v63 = vsel %vm525_vm7, %v3030_v54, %v522_v60 }
 0x66b   :  { %v531_v4 = vsel %vm528_vm8, %v530_v1, %v526_v63 }
 0x66c   :  { %v534_v7 = vmul.f32 %v531_v4, %v3636_v6 }
 0x6b1   :  { %v537_v3 = vpop.permute.xlu2 %536 }
 0x6b2   :  { %v539_v5 = vmul.f32 %v537_v3, %v531_v4 }
 0x6b4   :  { %541 = vrot.lane.b32.xlu0 %v539_v5, %s3376_s3 }
 0x6b9   :  { %v3643_v14 = vpop.permute.xlu2 %554 }
 0x6ba   :  { %vm556_vm10 = vcmp.eq.s32.totalorder %v3643_v14, 1 }
 0x6c1   :  { %v148_v21 = vpop.permute.xlu2 %147 }
 0x6c2   :  { %vm160_vm11 = vcmp.eq.s32.totalorder %v148_v21, %v3541_v15 }
 0x726   :  { %v542_v8 = vpop.permute.xlu0 %541 }
 0x727   :  { %v544_v9 = vadd.f32 %v542_v8, %v534_v7 }
 0x729   :  { %3031 = vtanh.f32 %v544_v9  ;;  %v558_v52 = vsel %vm556_vm10, %v544_v9, %v3636_v6  ;;  %v700_v9 = vsel %vm699_vm6, 1, %v3374_v0 }
 0x72f   :  { %v3032_v10 = vpop.eup %3031 }
 0x730   :  { %547 = vrot.lane.b32.xlu1 %v3032_v10, %s3369_s18  ;;  %v130_v10 = vld [vmem:[%s4414_s29 + $0x38] sm:$0xff] }
 0x738   :  { %144 = vperm.xlu1 %3003, %v127_v13  }
 0x7a2   :  { %v548_v16 = vpop.permute.xlu1 %547 }
 0x7a3   :  { %v3645_v18 = vmul.f32 %v548_v16, %v531_v4 }
 0x7a5   :  { %v557_v19 = vsel %vm556_vm10, %v3645_v18, %v483_v39 }
 0x7a6   :  { %v567_v20 = vpack.c.bf16 %v557_v19, %v557_v19 }
 0x7a8   :  { %569 = vrot.lane.b32.xlu0 %v567_v20, %s3376_s3 }
 0x7aa   :  { %v145_v22 = vpop.permute.xlu1 %144 }
 0x7ab   :  { %vm159_vm12 = vcmp.eq.s32.totalorder %v145_v22, %v3541_v15 }
 0x7ac   :  { %vm2782_vm13 = vmpackc.low %vm160_vm11, %vm159_vm12 }
 0x7ad   :  { %2783 = vmatmul.msk.bf16.gmra.mxu0 %vm2782_vm13, %v3375_v17 }
 0x81a   :  { %v570_v23 = vpop.permute.xlu0 %569 }
 0x81b   :  { %2811 = vmatmul.msk.bf16.vlgmr.msrb.gmra.mxu3 %vm292_vm3, %v570_v23 }
 0x81c   :  { %876 = vmatpush.bf16.msrb.mxu3 %v3523_v11  ;;  %v626_v11 = vsel %vm625_vm14, 1, %v3374_v0 }
 0x820   :  { %877 = vmatpush.bf16.msrb.mxu3 %v3529_v12 }
 0x82a   :  { %v258_v26 = vpop.f32.mrf.mxu0 }
 0x832   :  { %v260_v27 = vpop.f32.mrf.mxu0 }
 0x833   :  { %v3658_v28 = vpack.c.bf16 %v260_v27, %v258_v26 }
 0x835   :  { %2796 = vmatmul.msk.bf16.gmra.mxu1 %vm292_vm3, %v3658_v28 }
 0x89e   :  { %v583_v31 = vpop.f32.mrf.mxu3 }
 0x89f   :  { %v587_v32 = vadd.f32 %v583_v31, %v322_v30 }
 0x8a1   :  { %3033 = vtanh.f32 %v587_v32  ;;  %v2812_v12 = vmul.f32 -1.442695, %v587_v32 }
 0x8a3   :  { %3035 = vpow2.f32 %v2812_v12 }
 0x8a6   :  { %v585_v33 = vpop.f32.mrf.mxu3 }
 0x8a7   :  { %v3034_v34 = vpop.eup %3033 }
 0x8a8   :  { %610 = vrot.lane.b32.xlu0 %v3034_v34, %s3369_s18 }
 0x8a9   :  { %v3036_v35 = vpop.eup %3035 }
 0x8aa   :  { %v591_v37 = vadd.f32 1.0, %v3036_v35 }
 0x8ac   :  { %3037 = vrcp.f32 %v591_v37  ;;  %v603_v44 = vand.u32 2147483648, %v591_v37  ;;  %vm597_vm0 = vweird.f32 %v591_v37  ;;  %v601_v45 = vand.u32 2147483647, %v591_v37 }
 0x8ae   :  { %v604_v47 = vor.u32 1.1754944e-38, %v603_v44  ;;  %vm602_vm4 = vcmp.eq.f32.partialorder %v601_v45, 8.507059e+37 }
 0x8b0   :  { %628 = vperm.xlu0 %3001, %v626_v11  }
 0x8b2   :  { %v3038_v39 = vpop.eup %3037  ;;  %v324_v3 = vpop.f32.mrf.mxu1 }
 0x8b3   :  { %v593_v40 = vmul.f32 %v3038_v39, %v591_v37  ;;  %vm598_vm15 = vweird.f32 %v3038_v39  ;;  %v325_v4 = vadd.f32 %v3559_v25, %v324_v3 }
 0x8b4   :  { %vm599_vm1 = vmor %vm597_vm0, %vm598_vm15 }
 0x8b5   :  { %v594_v41 = vsub.f32 1.0, %v593_v40  ;;  %v129_v40 = vld [vmem:[%s4414_s29 + $0x30] sm:$0xff] }
 0x8b7   :  { %v595_v42 = vmul.f32 %v3038_v39, %v594_v41 }
 0x8b9   :  { %v596_v43 = vadd.f32 %v3038_v39, %v595_v42 }
 0x8bb   :  { %v600_v46 = vsel %vm599_vm1, %v3038_v39, %v596_v43  ;;  %vm773_vm1 = vcmp.gt.s32.totalorder %v3573_v50, 5 }
 0x8bc   :  { %v605_v49 = vsel %vm602_vm4, %v604_v47, %v600_v46 }
 0x8bd   :  { %v608_v53 = vmul.f32 %v605_v49, %v558_v52 }
 0x91a   :  { %v611_v48 = vpop.permute.xlu0 %610 }
 0x91b   :  { %v613_v51 = vmul.f32 %v611_v48, %v605_v49  ;;  %v2973_v48 = vld [vmem:[#allocation3 + $0x8] sm:$0xff] }
 0x91c   :  { %961 = vmatpush.bf16.msrb.mxu1 %v2973_v48 }
 0x91d   :  { %615 = vrot.lane.b32.xlu1 %v613_v51, %s3376_s3 }
 0x922   :  { %v3671_v59 = vpop.permute.xlu0 %628 }
 0x923   :  { %vm630_vm5 = vcmp.eq.s32.totalorder %v3671_v59, 1 }
 0x98f   :  { %v616_v54 = vpop.permute.xlu1 %615 }
 0x990   :  { %v618_v56 = vadd.f32 %v616_v54, %v608_v53 }
 0x992   :  { %3039 = vtanh.f32 %v618_v56  ;;  %v3691_v11 = vsel %vm630_vm5, %v618_v56, %v558_v52 }
 0x998   :  { %v3040_v58 = vpop.eup %3039 }
 0x999   :  { %621 = vrot.lane.b32.xlu2 %v3040_v58, %s3369_s18 }
 0x9f3   :  { %v622_v60 = vpop.permute.xlu2 %621 }
 0x9f4   :  { %v3673_v61 = vmul.f32 %v622_v60, %v605_v49  ;;  %v2972_v49 = vld [vmem:[#allocation3] sm:$0xff] }
 0x9f5   :  { %962 = vmatpush.bf16.msrb.mxu1 %v2972_v49 }
 0x9f6   :  { %v631_v62 = vsel %vm630_vm5, %v3673_v61, %v557_v19 }
 0x9f7   :  { %v641_v63 = vpack.c.bf16 %v631_v62, %v631_v62 }
 0x9f9   :  { %643 = vrot.lane.b32.xlu1 %v641_v63, %s3376_s3  ;;  %v3737_v63 = vld [vmem:[%s4400_s8] ss:$0 sm:$0xff] }
 0xa6b   :  { %v644_v1 = vpop.permute.xlu1 %643 }
 0xa6c   :  { %2813 = vmatmul.msk.bf16.vlgmr.msra.gmra.mxu2 %vm292_vm3, %v644_v1 }
 0xaef   :  { %v657_v5 = vpop.f32.mrf.mxu2 }
 0xaf0   :  { %v661_v6 = vadd.f32 %v657_v5, %v325_v4 }
 0xaf2   :  { %3041 = vtanh.f32 %v661_v6  ;;  %v2814_v13 = vmul.f32 -1.442695, %v661_v6 }
 0xaf4   :  { %3043 = vpow2.f32 %v2814_v13 }
 0xaf7   :  { %v659_v7 = vpop.f32.mrf.mxu2 }
 0xaf8   :  { %v3042_v8 = vpop.eup %3041 }
 0xaf9   :  { %684 = vrot.lane.b32.xlu2 %v3042_v8, %s3369_s18 }
 0xafa   :  { %v3044_v16 = vpop.eup %3043 }
 0xafb   :  { %v665_v19 = vadd.f32 1.0, %v3044_v16 }
 0xafd   :  { %3045 = vrcp.f32 %v665_v19  ;;  %v677_v27 = vand.u32 2147483648, %v665_v19  ;;  %vm671_vm8 = vweird.f32 %v665_v19  ;;  %v675_v29 = vand.u32 2147483647, %v665_v19 }
 0xaff   :  { %v678_v31 = vor.u32 1.1754944e-38, %v677_v27  ;;  %vm676_vm12 = vcmp.eq.f32.partialorder %v675_v29, 8.507059e+37 }
 0xb01   :  { %702 = vperm.xlu2 %3002, %v700_v9  }
 0xb03   :  { %v3046_v20 = vpop.eup %3045 }
 0xb04   :  { %v667_v21 = vmul.f32 %v3046_v20, %v665_v19  ;;  %vm672_vm7 = vweird.f32 %v3046_v20 }
 0xb05   :  { %vm673_vm11 = vmor %vm671_vm8, %vm672_vm7 }
 0xb06   :  { %v668_v22 = vsub.f32 1.0, %v667_v21 }
 0xb08   :  { %v669_v23 = vmul.f32 %v3046_v20, %v668_v22 }
 0xb09   :  { %153 = vperm.xlu2 %3002, %v130_v10  }
 0xb0a   :  { %v670_v26 = vadd.f32 %v3046_v20, %v669_v23 }
 0xb0c   :  { %v674_v30 = vsel %vm673_vm11, %v3046_v20, %v670_v26 }
 0xb0d   :  { %v679_v33 = vsel %vm676_vm12, %v678_v31, %v674_v30 }
 0xb0e   :  { %v682_v12 = vmul.f32 %v679_v33, %v3691_v11 }
 0xb53   :  { %v685_v32 = vpop.permute.xlu2 %684 }
 0xb54   :  { %v687_v34 = vmul.f32 %v685_v32, %v679_v33 }
 0xb56   :  { %689 = vrot.lane.b32.xlu0 %v687_v34, %s3376_s3 }
 0xb5b   :  { %v3701_v41 = vpop.permute.xlu2 %702 }
 0xb5c   :  { %vm704_vm13 = vcmp.eq.s32.totalorder %v3701_v41, 1 }
 0xb63   :  { %v154_v46 = vpop.permute.xlu2 %153 }
 0xb64   :  { %vm162_vm14 = vcmp.eq.s32.totalorder %v154_v46, %v3541_v15 }
 0xbc8   :  { %v690_v35 = vpop.permute.xlu0 %689 }
 0xbc9   :  { %v3694_v37 = vadd.f32 %v690_v35, %v682_v12 }
 0xbcb   :  { %3047 = vtanh.f32 %v3694_v37 }
 0xbd1   :  { %v3048_v39 = vpop.eup %3047 }
 0xbd2   :  { %695 = vrot.lane.b32.xlu1 %v3048_v39, %s3369_s18 }
 0xbda   :  { %150 = vperm.xlu1 %3003, %v129_v40  }
 0xc44   :  { %v696_v42 = vpop.permute.xlu1 %695 }
 0xc45   :  { %v3703_v43 = vmul.f32 %v696_v42, %v679_v33 }
 0xc47   :  { %v3709_v44 = vsel %vm704_vm13, %v3703_v43, %v631_v62 }
 0xc48   :  { %v715_v45 = vpack.c.bf16 %v3709_v44, %v3709_v44 }
 0xc4a   :  { %717 = vrot.lane.b32.xlu0 %v715_v45, %s3376_s3  ;;  %v3765_v45 = vsel %vm704_vm13, %v3694_v37, %v3691_v11 }
 0xc4c   :  { %v151_v47 = vpop.permute.xlu1 %150 }
 0xc4d   :  { %vm161_vm15 = vcmp.eq.s32.totalorder %v151_v47, %v3541_v15  ;;  %v326_v15 = vpop.f32.mrf.mxu1 }
 0xc4e   :  { %vm2784_vm0 = vmpackc.low %vm162_vm14, %vm161_vm15 }
 0xc4f   :  { %2785 = vmatmul.msk.bf16.gmra.mxu0 %vm2784_vm0, %v3375_v17  ;;  %v327_v17 = vadd.f32 %v3559_v25, %v326_v15  ;;  %v3789_v15 = vld [vmem:[#allocation5] sm:$0xff] }
 0xcbc   :  { %v718_v51 = vpop.permute.xlu0 %717 }
 0xcbd   :  { %2815 = vmatmul.msk.bf16.vlgmr.msra.gmra.mxu3 %vm292_vm3, %v718_v51 }
 0xccc   :  { %v263_v52 = vpop.f32.mrf.mxu0 }
 0xcd4   :  { %v265_v53 = vpop.f32.mrf.mxu0 }
 0xcd5   :  { %v271_v54 = vpack.c.bf16 %v265_v53, %v263_v52 }
 0xcd7   :  { %2797 = vmatmul.msk.bf16.gmra.mxu1 %vm292_vm3, %v271_v54 }
 0xce7   :  { %2829 = vmatmul.msk.bf16.vlgmr.msrb.gmra.mxu1 %vm292_vm3, %v3552_v24  ;;  %v774_v24 = vsel %vm773_vm1, 1, %v3374_v0  ;;  %vm847_vm1 = vcmp.gt.s32.totalorder %v3573_v50, 6 }
 0xcf7   :  { %2830 = vmatmul.msk.bf16.gmra.mxu1 %vm292_vm3, %v3600_v2 }
 0xd07   :  { %2831 = vmatmul.msk.bf16.gmra.mxu1 %vm292_vm3, %v3658_v28 }
 0xd17   :  { %2832 = vmatmul.msk.bf16.gmra.mxu1 %vm292_vm3, %v271_v54  ;;  %v3786_v54 = vld [vmem:[#allocation5 + $0x8] sm:$0xff] }
 0xd18   :  { %1006 = vmatpush.bf16.msra.mxu2 %v3786_v54  ;;  %1073 = vmatpush.bf16.msra.mxu3 %v3786_v54 }
 0xd19   :  { %1274 = vmatpush.bf16.msrb.mxu0 %v3786_v54 }
 0xd1c   :  { %1007 = vmatpush.bf16.msra.mxu2 %v3789_v15  ;;  %1074 = vmatpush.bf16.msra.mxu3 %v3789_v15 }
 0xd1d   :  { %1275 = vmatpush.bf16.msrb.mxu0 %v3789_v15 }
 0xd21   :  { %1475 = vmatpush.bf16.msra.mxu0 %v3786_v54 }
 0xd25   :  { %1476 = vmatpush.bf16.msra.mxu0 %v3789_v15 }
 0xd40   :  { %v731_v56 = vpop.f32.mrf.mxu3 }
 0xd41   :  { %v735_v58 = vadd.f32 %v731_v56, %v327_v17 }
 0xd43   :  { %3049 = vtanh.f32 %v735_v58  ;;  %v2816_v20 = vmul.f32 -1.442695, %v735_v58 }
 0xd45   :  { %3051 = vpow2.f32 %v2816_v20 }
 0xd48   :  { %v733_v60 = vpop.f32.mrf.mxu3 }
 0xd49   :  { %v3050_v62 = vpop.eup %3049 }
 0xd4a   :  { %758 = vrot.lane.b32.xlu0 %v3050_v62, %s3369_s18 }
 0xd4b   :  { %v3052_v23 = vpop.eup %3051 }
 0xd4c   :  { %v739_v26 = vadd.f32 1.0, %v3052_v23 }
 0xd4e   :  { %3053 = vrcp.f32 %v739_v26  ;;  %v751_v33 = vand.u32 2147483648, %v739_v26  ;;  %vm745_vm6 = vweird.f32 %v739_v26  ;;  %v749_v34 = vand.u32 2147483647, %v739_v26 }
 0xd50   :  { %v752_v35 = vor.u32 1.1754944e-38, %v751_v33  ;;  %vm750_vm8 = vcmp.eq.f32.partialorder %v749_v34, 8.507059e+37 }
 0xd52   :  { %776 = vperm.xlu0 %3001, %v774_v24  }
 0xd54   :  { %v3730_v2 = vpop.f32.mrf.mxu1  ;;  %v3054_v27 = vpop.eup %3053 }
 0xd55   :  { %v741_v29 = vmul.f32 %v3054_v27, %v739_v26  ;;  %vm746_vm4 = vweird.f32 %v3054_v27  ;;  %v330_v17 = vadd.f32 %v3559_v25, %v3730_v2 }
 0xd56   :  { %vm747_vm7 = vmor %vm745_vm6, %vm746_vm4 }
 0xd57   :  { %v742_v30 = vsub.f32 1.0, %v741_v29 }
 0xd59   :  { %v743_v31 = vmul.f32 %v3054_v27, %v742_v30 }
 0xd5b   :  { %v744_v32 = vadd.f32 %v3054_v27, %v743_v31 }
 0xd5c   :  { %v3732_v28 = vpop.f32.mrf.mxu1 }
 0xd5d   :  { %v748_v12 = vsel %vm747_vm7, %v3054_v27, %v744_v32 }
 0xd5e   :  { %v753_v40 = vsel %vm750_vm8, %v752_v35, %v748_v12 }
 0xd5f   :  { %v756_v46 = vmul.f32 %v753_v40, %v3765_v45 }
 0xd64   :  { %v964_v1 = vpop.f32.mrf.mxu1 }
 0xd65   :  { %v3740_v3 = vadd.f32 %v3737_v63, %v964_v1 }
 0xd6c   :  { %v966_v4 = vpop.f32.mrf.mxu1 }
 0xd6d   :  { %v3743_v5 = vadd.f32 %v3737_v63, %v966_v4 }
 0xd74   :  { %v969_v6 = vpop.f32.mrf.mxu1 }
 0xd75   :  { %v3746_v7 = vadd.f32 %v3737_v63, %v969_v6 }
 0xd7c   :  { %v971_v8 = vpop.f32.mrf.mxu1 }
 0xd7d   :  { %v3749_v9 = vadd.f32 %v3737_v63, %v971_v8 }
 0xd84   :  { %v974_v10 = vpop.f32.mrf.mxu1 }
 0xd85   :  { %v3752_v13 = vadd.f32 %v3737_v63, %v974_v10 }
 0xd8c   :  { %v976_v16 = vpop.f32.mrf.mxu1 }
 0xd8d   :  { %v3755_v19 = vadd.f32 %v3737_v63, %v976_v16 }
 0xd94   :  { %v979_v21 = vpop.f32.mrf.mxu1 }
 0xd95   :  { %v3758_v22 = vadd.f32 %v3737_v63, %v979_v21 }
 0xd9c   :  { %v981_v24 = vpop.f32.mrf.mxu1 }
 0xd9d   :  { %v982_v1 = vadd.f32 %v3737_v63, %v981_v24 }
 0xdbc   :  { %v759_v39 = vpop.permute.xlu0 %758 }
 0xdbd   :  { %v761_v42 = vmul.f32 %v759_v39, %v753_v40 }
 0xdbf   :  { %763 = vrot.lane.b32.xlu1 %v761_v42, %s3376_s3  ;;  %v848_v42 = vsel %vm847_vm1, 1, %v3374_v0 }
 0xdc4   :  { %v3772_v51 = vpop.permute.xlu0 %776 }
 0xdc5   :  { %vm778_vm11 = vcmp.eq.s32.totalorder %v3772_v51, 1 }
 0xe31   :  { %v764_v47 = vpop.permute.xlu1 %763 }
 0xe32   :  { %v3768_v48 = vadd.f32 %v764_v47, %v756_v46 }
 0xe34   :  { %3055 = vtanh.f32 %v3768_v48 }
 0xe3a   :  { %v3056_v49 = vpop.eup %3055 }
 0xe3b   :  { %769 = vrot.lane.b32.xlu2 %v3056_v49, %s3369_s18 }
 0xe95   :  { %v770_v52 = vpop.permute.xlu2 %769 }
 0xe96   :  { %v3774_v53 = vmul.f32 %v770_v52, %v753_v40 }
 0xe98   :  { %v3781_v11 = vsel %vm778_vm11, %v3774_v53, %v3709_v44 }
 0xe99   :  { %v789_v37 = vpack.c.bf16 %v3781_v11, %v3781_v11 }
 0xe9b   :  { %791 = vrot.lane.b32.xlu1 %v789_v37, %s3376_s3 }
 0xf0d   :  { %v792_v44 = vpop.permute.xlu1 %791 }
 0xf0e   :  { %2817 = vmatmul.msk.bf16.vlgmr.msrb.gmra.mxu2 %vm292_vm3, %v792_v44 }
 0xf0f   :  { %1140 = vmatpush.bf16.msrb.mxu2 %v3786_v54 }
 0xf13   :  { %1141 = vmatpush.bf16.msrb.mxu2 %v3789_v15 }
 0xf1e   :  { %1008 = vmatmul.bf16.vlgmr.msra.gmra.mxu2 %v3374_v0 }
 0xf1f   :  { %1341 = vmatpush.bf16.msra.mxu2 %v3786_v54 }
 0xf23   :  { %1342 = vmatpush.bf16.msra.mxu2 %v3789_v15 }
 0xf91   :  { %v805_v56 = vpop.f32.mrf.mxu2 }
 0xf92   :  { %v809_v58 = vadd.f32 %v805_v56, %v330_v17 }
 0xf94   :  { %3057 = vtanh.f32 %v809_v58  ;;  %v2818_v16 = vmul.f32 -1.442695, %v809_v58 }
 0xf99   :  { %v807_v60 = vpop.f32.mrf.mxu2 }
 0xf9a   :  { %v3058_v62 = vpop.eup %3057 }
 0xf9b   :  { %832 = vrot.lane.b32.xlu2 %v3058_v62, %s3369_s18 }
 0xfa1   :  { %v1009_v4 = vpop.f32.mrf.mxu2 }
 0xfa2   :  { %v1013_v6 = vadd.f32 %v1009_v4, %v982_v1  ;;  %v3817_v1 = vsel %vm778_vm11, %v3768_v48, %v3765_v45 }
 0xfa4   :  { %3059 = vtanh.f32 %v1013_v6  ;;  %v2841_v63 = vmul.f32 -1.442695, %v1013_v6 }
 0xfa5   :  { %3061 = vpow2.f32 %v2818_v16 }
 0xfa9   :  { %v1011_v8 = vpop.f32.mrf.mxu2 }
 0xfaa   :  { %v3060_v10 = vpop.eup %3059 }
 0xfab   :  { %1036 = vrot.lane.b32.xlu0 %v3060_v10, %s3369_s18  ;;  %v3062_v2 = vpop.eup %3061 }
 0xfac   :  { %v813_v20 = vadd.f32 1.0, %v3062_v2 }
 0xfae   :  { %3063 = vrcp.f32 %v813_v20  ;;  %v825_v30 = vand.u32 2147483648, %v813_v20  ;;  %vm819_vm14 = vweird.f32 %v813_v20  ;;  %v823_v31 = vand.u32 2147483647, %v813_v20 }
 0xfaf   :  { %3065 = vpow2.f32 %v2841_v63 }
 0xfb0   :  { %v826_v33 = vor.u32 1.1754944e-38, %v825_v30  ;;  %vm824_vm0 = vcmp.eq.f32.partialorder %v823_v31, 8.507059e+37 }
 0xfb4   :  { %v3064_v21 = vpop.eup %3063 }
 0xfb5   :  { %v815_v23 = vmul.f32 %v3064_v21, %v813_v20  ;;  %vm820_vm12 = vweird.f32 %v3064_v21  ;;  %v3066_v39 = vpop.eup %3065 }
 0xfb6   :  { %vm821_vm15 = vmor %vm819_vm14, %vm820_vm12  ;;  %v1017_v40 = vadd.f32 1.0, %v3066_v39  ;;  %vm921_vm12 = vcmp.gt.s32.totalorder %v3573_v50, 7 }
 0xfb7   :  { %v816_v26 = vsub.f32 1.0, %v815_v23  ;;  %v922_v2 = vsel %vm921_vm12, 1, %v3374_v0 }
 0xfb8   :  { %3067 = vrcp.f32 %v1017_v40  ;;  %v1029_v44 = vand.u32 2147483648, %v1017_v40  ;;  %vm1023_vm6 = vweird.f32 %v1017_v40  ;;  %v1027_v17 = vand.u32 2147483647, %v1017_v40 }
 0xfb9   :  { %v817_v27 = vmul.f32 %v3064_v21, %v816_v26 }
 0xfba   :  { %v1030_v58 = vor.u32 1.1754944e-38, %v1029_v44  ;;  %vm1028_vm8 = vcmp.eq.f32.partialorder %v1027_v17, 8.507059e+37 }
 0xfbb   :  { %v818_v29 = vadd.f32 %v3064_v21, %v817_v27 }
 0xfbd   :  { %v822_v32 = vsel %vm821_vm15, %v3064_v21, %v818_v29 }
 0xfbe   :  { %v827_v12 = vsel %vm824_vm0, %v826_v33, %v822_v32  ;;  %v3068_v46 = vpop.eup %3067 }
 0xfbf   :  { %v1019_v47 = vmul.f32 %v3068_v46, %v1017_v40  ;;  %vm1024_vm4 = vweird.f32 %v3068_v46  ;;  %v830_v4 = vmul.f32 %v827_v12, %v3817_v1 }
 0xfc0   :  { %vm1025_vm7 = vmor %vm1023_vm6, %vm1024_vm4 }
 0xfc1   :  { %v1020_v49 = vsub.f32 1.0, %v1019_v47 }
 0xfc3   :  { %v1021_v52 = vmul.f32 %v3068_v46, %v1020_v49 }
 0xfc5   :  { %v1022_v37 = vadd.f32 %v3068_v46, %v1021_v52 }
 0xfc7   :  { %v1026_v56 = vsel %vm1025_vm7, %v3068_v46, %v1022_v37 }
 0xfc8   :  { %v1031_v62 = vsel %vm1028_vm8, %v1030_v58, %v1026_v56 }
 0xfc9   :  { %v1034_v16 = vmul.f32 0.0, %v1031_v62 }
 0xff5   :  { %v833_v34 = vpop.permute.xlu2 %832 }
 0xff6   :  { %v835_v35 = vmul.f32 %v833_v34, %v827_v12 }
 0xff8   :  { %837 = vrot.lane.b32.xlu1 %v835_v35, %s3376_s3  ;;  %v332_v35 = vadd.f32 %v3559_v25, %v3732_v28 }
0x1000   :  { %850 = vperm.xlu1 %3003, %v848_v42  }
0x101d   :  { %v1037_v60 = vpop.permute.xlu0 %1036 }
0x101e   :  { %v1039_v24 = vmul.f32 %v1037_v60, %v1031_v62 }
0x1020   :  { %1041 = vrot.lane.b32.xlu2 %v1039_v24, %s3376_s3 }
0x106a   :  { %v838_v6 = vpop.permute.xlu1 %837 }
0x106b   :  { %v3820_v8 = vadd.f32 %v838_v6, %v830_v4 }
0x106d   :  { %3069 = vtanh.f32 %v3820_v8 }
0x1072   :  { %v3827_v48 = vpop.permute.xlu1 %850 }
0x1073   :  { %v3070_v10 = vpop.eup %3069  ;;  %vm852_vm14 = vcmp.eq.s32.totalorder %v3827_v48, 1 }
0x1074   :  { %843 = vrot.lane.b32.xlu0 %v3070_v10, %s3369_s18 }
0x107a   :  { %v1042_v20 = vpop.permute.xlu2 %1041 }
0x107b   :  { %v1044_v21 = vadd.f32 %v1042_v20, %v1034_v16 }
0x107c   :  { %924 = vperm.xlu0 %3001, %v922_v2  }
0x107d   :  { %3071 = vtanh.f32 %v1044_v21 }
0x1083   :  { %v3072_v45 = vpop.eup %3071 }
0x1084   :  { %1047 = vrot.lane.b32.xlu2 %v3072_v45, %s3369_s18 }
0x10de   :  { %v1048_v29 = vpop.permute.xlu2 %1047 }
0x10df   :  { %v1050_v30 = vmul.f32 %v1048_v29, %v1031_v62 }
0x10e6   :  { %v844_v23 = vpop.permute.xlu0 %843 }
0x10e7   :  { %v3829_v26 = vmul.f32 %v844_v23, %v827_v12 }
0x10e9   :  { %v853_v50 = vsel %vm852_vm14, %v3829_v26, %v3781_v11 }
0x10ea   :  { %v863_v27 = vpack.c.bf16 %v853_v50, %v853_v50 }
0x10ec   :  { %865 = vrot.lane.b32.xlu1 %v863_v27, %s3376_s3 }
0x10ee   :  { %v3837_v63 = vpop.permute.xlu0 %924 }
0x10ef   :  { %vm926_vm15 = vcmp.eq.s32.totalorder %v3837_v63, 1  ;;  %v2675_v63 = vld [vmem:[%s4407_s15] sm:$0xff] }
0x10f0   :  { %v1051_v31 = vsel %vm926_vm15, %v1050_v30, 0.0  ;;  %v1052_v10 = vsel %vm926_vm15, %v1044_v21, 0.0 }
0x10f1   :  { %v3842_v32 = vpack.c.bf16 %v1051_v31, %v1051_v31 }
0x10f3   :  { %v1060_v33 = vunpack.c.l.b16 %v3842_v32 }
0x10f5   :  { %v1061_v34 = vpack.c.b16 %v1060_v33, %v1060_v33 }
0x10f7   :  { %1062 = vrot.lane.b32.xlu2 %v1061_v34, %s3376_s3 }
0x1151   :  { %v1063_v12 = vpop.permute.xlu2 %1062 }
0x115e   :  { %v866_v11 = vpop.permute.xlu1 %865 }
0x115f   :  { %2819 = vmatmul.msk.bf16.vlgmr.msrb.gmra.mxu3 %vm292_vm3, %v866_v11 }
0x1160   :  { %1207 = vmatpush.bf16.msrb.mxu3 %v3786_v54 }
0x1164   :  { %1208 = vmatpush.bf16.msrb.mxu3 %v3789_v15 }
0x116f   :  { %2842 = vmatmul.msk.bf16.vlgmr.msra.gmra.mxu3 %vm292_vm3, %v1063_v12 }
0x1170   :  { %1408 = vmatpush.bf16.msra.mxu3 %v3786_v54 }
0x1174   :  { %1409 = vmatpush.bf16.msra.mxu3 %v3789_v15 }
0x11e2   :  { %v879_v39 = vpop.f32.mrf.mxu3 }
0x11e3   :  { %v3854_v40 = vadd.f32 %v879_v39, %v332_v35 }
0x11ea   :  { %v881_v42 = vpop.f32.mrf.mxu3 }
0x11f2   :  { %v1076_v46 = vpop.f32.mrf.mxu3 }
0x11f3   :  { %v1080_v47 = vadd.f32 %v1076_v46, %v3758_v22 }
0x11f5   :  { %3073 = vtanh.f32 %v1080_v47  ;;  %v2843_v37 = vmul.f32 -1.442695, %v1080_v47 }
0x11f7   :  { %3075 = vpow2.f32 %v2843_v37 }
0x11fa   :  { %v1078_v49 = vpop.f32.mrf.mxu3 }
0x11fb   :  { %v3074_v52 = vpop.eup %3073 }
0x11fc   :  { %1103 = vrot.lane.b32.xlu0 %v3074_v52, %s3369_s18 }
0x11fd   :  { %v3076_v54 = vpop.eup %3075 }
0x11fe   :  { %v1084_v44 = vadd.f32 1.0, %v3076_v54 }
0x1200   :  { %3077 = vrcp.f32 %v1084_v44  ;;  %v1096_v58 = vand.u32 2147483648, %v1084_v44  ;;  %vm1090_vm1 = vweird.f32 %v1084_v44  ;;  %v1094_v60 = vand.u32 2147483647, %v1084_v44 }
0x1202   :  { %v1097_v62 = vor.u32 1.1754944e-38, %v1096_v58  ;;  %vm1095_vm6 = vcmp.eq.f32.partialorder %v1094_v60, 8.507059e+37 }
0x1206   :  { %v3078_v15 = vpop.eup %3077 }
0x1207   :  { %v1086_v17 = vmul.f32 %v3078_v15, %v1084_v44  ;;  %vm1091_vm0 = vweird.f32 %v3078_v15 }
0x1208   :  { %vm1092_vm4 = vmor %vm1090_vm1, %vm1091_vm0 }
0x1209   :  { %v1087_v25 = vsub.f32 1.0, %v1086_v17 }
0x120b   :  { %v1088_v28 = vmul.f32 %v3078_v15, %v1087_v25 }
0x120d   :  { %v1089_v56 = vadd.f32 %v3078_v15, %v1088_v28 }
0x120f   :  { %v1093_v22 = vsel %vm1092_vm4, %v3078_v15, %v1089_v56 }
0x1210   :  { %v1098_v4 = vsel %vm1095_vm6, %v1097_v62, %v1093_v22 }
0x1211   :  { %v1101_v16 = vmul.f32 %v1098_v4, %v1052_v10 }
0x126e   :  { %v1104_v24 = vpop.permute.xlu0 %1103 }
0x126f   :  { %v1106_v6 = vmul.f32 %v1104_v24, %v1098_v4 }
0x1271   :  { %1108 = vrot.lane.b32.xlu1 %v1106_v6, %s3376_s3 }
0x12e3   :  { %v1109_v2 = vpop.permute.xlu1 %1108 }
0x12e4   :  { %v1111_v20 = vadd.f32 %v1109_v2, %v1101_v16 }
0x12e6   :  { %3079 = vtanh.f32 %v1111_v20  ;;  %v1119_v25 = vsel %vm852_vm14, %v1111_v20, %v1052_v10 }
0x12ec   :  { %v3080_v45 = vpop.eup %3079 }
0x12ed   :  { %1114 = vrot.lane.b32.xlu2 %v3080_v45, %s3369_s18 }
0x1347   :  { %v1115_v23 = vpop.permute.xlu2 %1114 }
0x1348   :  { %v3862_v50 = vmul.f32 %v1115_v23, %v1098_v4 }
0x134a   :  { %v1118_v27 = vsel %vm852_vm14, %v3862_v50, %v1051_v31 }
0x134b   :  { %v1127_v29 = vpack.c.bf16 %v1118_v27, %v1118_v27 }
0x134d   :  { %1129 = vrot.lane.b32.xlu0 %v1127_v29, %s3376_s3 }
0x13bf   :  { %v1130_v30 = vpop.permute.xlu0 %1129 }
0x13c0   :  { %2844 = vmatmul.msk.bf16.vlgmr.msrb.gmra.mxu2 %vm292_vm3, %v1130_v30 }
0x1443   :  { %v1143_v21 = vpop.f32.mrf.mxu2 }
0x1444   :  { %v1147_v33 = vadd.f32 %v1143_v21, %v3755_v19 }
0x1446   :  { %3081 = vtanh.f32 %v1147_v33  ;;  %v2845_v12 = vmul.f32 -1.442695, %v1147_v33 }
0x1448   :  { %3083 = vpow2.f32 %v2845_v12 }
0x144b   :  { %v1145_v34 = vpop.f32.mrf.mxu2 }
0x144c   :  { %v3082_v11 = vpop.eup %3081 }
0x144d   :  { %1170 = vrot.lane.b32.xlu1 %v3082_v11, %s3369_s18 }
0x144e   :  { %v3084_v35 = vpop.eup %3083 }
0x144f   :  { %v1151_v39 = vadd.f32 1.0, %v3084_v35 }
0x1451   :  { %3085 = vrcp.f32 %v1151_v39  ;;  %v1163_v52 = vand.u32 2147483648, %v1151_v39  ;;  %vm1157_vm8 = vweird.f32 %v1151_v39  ;;  %v1161_v37 = vand.u32 2147483647, %v1151_v39 }
0x1453   :  { %v1164_v54 = vor.u32 1.1754944e-38, %v1163_v52  ;;  %vm1162_vm0 = vcmp.eq.f32.partialorder %v1161_v37, 8.507059e+37 }
0x1457   :  { %v3086_v31 = vpop.eup %3085 }
0x1458   :  { %v1153_v42 = vmul.f32 %v3086_v31, %v1151_v39  ;;  %vm1158_vm7 = vweird.f32 %v3086_v31 }
0x1459   :  { %vm1159_vm12 = vmor %vm1157_vm8, %vm1158_vm7 }
0x145a   :  { %v1154_v46 = vsub.f32 1.0, %v1153_v42 }
0x145c   :  { %v1155_v47 = vmul.f32 %v3086_v31, %v1154_v46 }
0x145e   :  { %v1156_v49 = vadd.f32 %v3086_v31, %v1155_v47 }
0x1460   :  { %v1160_v19 = vsel %vm1159_vm12, %v3086_v31, %v1156_v49 }
0x1461   :  { %v1165_v15 = vsel %vm1162_vm0, %v1164_v54, %v1160_v19 }
0x1462   :  { %v1168_v28 = vmul.f32 %v1165_v15, %v1119_v25 }
0x14bf   :  { %v1171_v44 = vpop.permute.xlu1 %1170 }
0x14c0   :  { %v1173_v17 = vmul.f32 %v1171_v44, %v1165_v15 }
0x14c2   :  { %1175 = vrot.lane.b32.xlu2 %v1173_v17, %s3376_s3 }
0x151c   :  { %v1176_v56 = vpop.permute.xlu2 %1175 }
0x151d   :  { %v1178_v58 = vadd.f32 %v1176_v56, %v1168_v28 }
0x151f   :  { %3087 = vtanh.f32 %v1178_v58  ;;  %v1186_v46 = vsel %vm778_vm11, %v1178_v58, %v1119_v25 }
0x1525   :  { %v3088_v60 = vpop.eup %3087 }
0x1526   :  { %1181 = vrot.lane.b32.xlu0 %v3088_v60, %s3369_s18 }
0x1598   :  { %v1182_v22 = vpop.permute.xlu0 %1181 }
0x1599   :  { %v3875_v62 = vmul.f32 %v1182_v22, %v1165_v15 }
0x159b   :  { %v1185_v24 = vsel %vm778_vm11, %v3875_v62, %v1118_v27 }
0x159c   :  { %v1194_v4 = vpack.c.bf16 %v1185_v24, %v1185_v24 }
0x159e   :  { %1196 = vrot.lane.b32.xlu1 %v1194_v4, %s3376_s3 }
0x1610   :  { %v1197_v6 = vpop.permute.xlu1 %1196 }
0x1611   :  { %2846 = vmatmul.msk.bf16.vlgmr.msrb.gmra.mxu3 %vm292_vm3, %v1197_v6 }
0x1694   :  { %v1210_v10 = vpop.f32.mrf.mxu3 }
0x1695   :  { %v1214_v16 = vadd.f32 %v1210_v10, %v3752_v13 }
0x1697   :  { %3089 = vtanh.f32 %v1214_v16  ;;  %v2847_v45 = vmul.f32 -1.442695, %v1214_v16 }
0x1699   :  { %3091 = vpow2.f32 %v2847_v45 }
0x169c   :  { %v1212_v2 = vpop.f32.mrf.mxu3 }
0x169d   :  { %v3090_v20 = vpop.eup %3089 }
0x169e   :  { %1237 = vrot.lane.b32.xlu2 %v3090_v20, %s3369_s18 }
0x169f   :  { %v3092_v23 = vpop.eup %3091 }
0x16a0   :  { %v1218_v29 = vadd.f32 1.0, %v3092_v23 }
0x16a2   :  { %3093 = vrcp.f32 %v1218_v29  ;;  %v1230_v11 = vand.u32 2147483648, %v1218_v29  ;;  %vm1224_vm4 = vweird.f32 %v1218_v29  ;;  %v1228_v12 = vand.u32 2147483647, %v1218_v29 }
0x16a4   :  { %v1231_v35 = vor.u32 1.1754944e-38, %v1230_v11  ;;  %vm1229_vm7 = vcmp.eq.f32.partialorder %v1228_v12, 8.507059e+37 }
0x16a8   :  { %v3094_v27 = vpop.eup %3093 }
0x16a9   :  { %v1220_v30 = vmul.f32 %v3094_v27, %v1218_v29  ;;  %vm1225_vm1 = vweird.f32 %v3094_v27 }
0x16aa   :  { %vm1226_vm6 = vmor %vm1224_vm4, %vm1225_vm1 }
0x16ab   :  { %v1221_v21 = vsub.f32 1.0, %v1220_v30 }
0x16ad   :  { %v1222_v33 = vmul.f32 %v3094_v27, %v1221_v21 }
0x16af   :  { %v1223_v34 = vadd.f32 %v3094_v27, %v1222_v33 }
0x16b1   :  { %v1227_v13 = vsel %vm1226_vm6, %v3094_v27, %v1223_v34 }
0x16b2   :  { %v1232_v31 = vsel %vm1229_vm7, %v1231_v35, %v1227_v13 }
0x16b3   :  { %v1235_v47 = vmul.f32 %v1232_v31, %v1186_v46 }
0x16f8   :  { %v1238_v39 = vpop.permute.xlu2 %1237 }
0x16f9   :  { %v1240_v42 = vmul.f32 %v1238_v39, %v1232_v31 }
0x16fb   :  { %1242 = vrot.lane.b32.xlu0 %v1240_v42, %s3376_s3 }
0x176d   :  { %v1243_v49 = vpop.permute.xlu0 %1242 }
0x176e   :  { %v1245_v52 = vadd.f32 %v1243_v49, %v1235_v47 }
0x1770   :  { %3095 = vtanh.f32 %v1245_v52  ;;  %v1253_v21 = vsel %vm704_vm13, %v1245_v52, %v1186_v46 }
0x1776   :  { %v3096_v37 = vpop.eup %3095 }
0x1777   :  { %1248 = vrot.lane.b32.xlu1 %v3096_v37, %s3369_s18 }
0x17e9   :  { %v1249_v19 = vpop.permute.xlu1 %1248 }
0x17ea   :  { %v3888_v54 = vmul.f32 %v1249_v19, %v1232_v31 }
0x17ec   :  { %v1252_v44 = vsel %vm704_vm13, %v3888_v54, %v1185_v24 }
0x17ed   :  { %v1261_v15 = vpack.c.bf16 %v1252_v44, %v1252_v44 }
0x17ef   :  { %1263 = vrot.lane.b32.xlu2 %v1261_v15, %s3376_s3 }
0x1849   :  { %v1264_v17 = vpop.permute.xlu2 %1263 }
0x184a   :  { %2848 = vmatmul.msk.bf16.vlgmr.msrb.gmra.mxu0 %vm292_vm3, %v1264_v17 }
0x18c7   :  { %v1277_v25 = vpop.f32.mrf.mxu0 }
0x18c8   :  { %v1281_v28 = vadd.f32 %v1277_v25, %v3749_v9 }
0x18ca   :  { %3097 = vtanh.f32 %v1281_v28  ;;  %v2849_v60 = vmul.f32 -1.442695, %v1281_v28 }
0x18cc   :  { %3099 = vpow2.f32 %v2849_v60 }
0x18cf   :  { %v1279_v56 = vpop.f32.mrf.mxu0 }
0x18d0   :  { %v3098_v58 = vpop.eup %3097 }
0x18d1   :  { %1304 = vrot.lane.b32.xlu0 %v3098_v58, %s3369_s18 }
0x18d2   :  { %v3100_v22 = vpop.eup %3099 }
0x18d3   :  { %v1285_v4 = vadd.f32 1.0, %v3100_v22 }
0x18d5   :  { %3101 = vrcp.f32 %v1285_v4  ;;  %v1297_v20 = vand.u32 2147483648, %v1285_v4  ;;  %vm1291_vm12 = vweird.f32 %v1285_v4  ;;  %v1295_v45 = vand.u32 2147483647, %v1285_v4 }
0x18d7   :  { %v1298_v23 = vor.u32 1.1754944e-38, %v1297_v20  ;;  %vm1296_vm1 = vcmp.eq.f32.partialorder %v1295_v45, 8.507059e+37 }
0x18db   :  { %v3102_v24 = vpop.eup %3101 }
0x18dc   :  { %v1287_v6 = vmul.f32 %v3102_v24, %v1285_v4  ;;  %vm1292_vm8 = vweird.f32 %v3102_v24 }
0x18dd   :  { %vm1293_vm0 = vmor %vm1291_vm12, %vm1292_vm8 }
0x18de   :  { %v1288_v10 = vsub.f32 1.0, %v1287_v6 }
0x18e0   :  { %v1289_v16 = vmul.f32 %v3102_v24, %v1288_v10 }
0x18e2   :  { %v1290_v2 = vadd.f32 %v3102_v24, %v1289_v16 }
0x18e4   :  { %v1294_v9 = vsel %vm1293_vm0, %v3102_v24, %v1290_v2 }
0x18e5   :  { %v1299_v27 = vsel %vm1296_vm1, %v1298_v23, %v1294_v9 }
0x18e6   :  { %v1302_v33 = vmul.f32 %v1299_v27, %v1253_v21 }
0x1943   :  { %v1305_v29 = vpop.permute.xlu0 %1304 }
0x1944   :  { %v1307_v30 = vmul.f32 %v1305_v29, %v1299_v27 }
0x1946   :  { %1309 = vrot.lane.b32.xlu1 %v1307_v30, %s3376_s3 }
0x19b8   :  { %v1310_v34 = vpop.permute.xlu1 %1309 }
0x19b9   :  { %v1312_v11 = vadd.f32 %v1310_v34, %v1302_v33 }
0x19bb   :  { %3103 = vtanh.f32 %v1312_v11  ;;  %v1320_v10 = vsel %vm630_vm5, %v1312_v11, %v1253_v21 }
0x19c1   :  { %v3104_v12 = vpop.eup %3103 }
0x19c2   :  { %1315 = vrot.lane.b32.xlu2 %v3104_v12, %s3369_s18 }
0x1a1c   :  { %v1316_v13 = vpop.permute.xlu2 %1315 }
0x1a1d   :  { %v3901_v35 = vmul.f32 %v1316_v13, %v1299_v27 }
0x1a1f   :  { %v1319_v39 = vsel %vm630_vm5, %v3901_v35, %v1252_v44 }
0x1a20   :  { %v1328_v31 = vpack.c.bf16 %v1319_v39, %v1319_v39 }
0x1a22   :  { %1330 = vrot.lane.b32.xlu0 %v1328_v31, %s3376_s3 }
0x1a94   :  { %v1331_v42 = vpop.permute.xlu0 %1330 }
0x1a95   :  { %2850 = vmatmul.msk.bf16.vlgmr.msra.gmra.mxu2 %vm292_vm3, %v1331_v42 }
0x1b18   :  { %v1344_v46 = vpop.f32.mrf.mxu2 }
0x1b19   :  { %v1348_v47 = vadd.f32 %v1344_v46, %v3746_v7 }
0x1b1b   :  { %3105 = vtanh.f32 %v1348_v47  ;;  %v2851_v37 = vmul.f32 -1.442695, %v1348_v47 }
0x1b1d   :  { %3107 = vpow2.f32 %v2851_v37 }
0x1b20   :  { %v1346_v49 = vpop.f32.mrf.mxu2 }
0x1b21   :  { %v3106_v52 = vpop.eup %3105 }
0x1b22   :  { %1371 = vrot.lane.b32.xlu1 %v3106_v52, %s3369_s18 }
0x1b23   :  { %v3108_v19 = vpop.eup %3107 }
0x1b24   :  { %v1352_v15 = vadd.f32 1.0, %v3108_v19 }
0x1b26   :  { %3109 = vrcp.f32 %v1352_v15  ;;  %v1364_v58 = vand.u32 2147483648, %v1352_v15  ;;  %vm1358_vm6 = vweird.f32 %v1352_v15  ;;  %v1362_v60 = vand.u32 2147483647, %v1352_v15 }
0x1b28   :  { %v1365_v22 = vor.u32 1.1754944e-38, %v1364_v58  ;;  %vm1363_vm8 = vcmp.eq.f32.partialorder %v1362_v60, 8.507059e+37 }
0x1b2c   :  { %v3110_v44 = vpop.eup %3109 }
0x1b2d   :  { %v1354_v17 = vmul.f32 %v3110_v44, %v1352_v15  ;;  %vm1359_vm4 = vweird.f32 %v3110_v44 }
0x1b2e   :  { %vm1360_vm7 = vmor %vm1358_vm6, %vm1359_vm4 }
0x1b2f   :  { %v1355_v25 = vsub.f32 1.0, %v1354_v17 }
0x1b31   :  { %v1356_v28 = vmul.f32 %v3110_v44, %v1355_v25 }
0x1b33   :  { %v1357_v56 = vadd.f32 %v3110_v44, %v1356_v28 }
0x1b35   :  { %v1361_v7 = vsel %vm1360_vm7, %v3110_v44, %v1357_v56 }
0x1b36   :  { %v1366_v24 = vsel %vm1363_vm8, %v1365_v22, %v1361_v7 }
0x1b37   :  { %v1369_v16 = vmul.f32 %v1366_v24, %v1320_v10 }
0x1b94   :  { %v1372_v4 = vpop.permute.xlu1 %1371 }
0x1b95   :  { %v1374_v6 = vmul.f32 %v1372_v4, %v1366_v24 }
0x1b97   :  { %1376 = vrot.lane.b32.xlu2 %v1374_v6, %s3376_s3 }
0x1bf1   :  { %v1377_v2 = vpop.permute.xlu2 %1376 }
0x1bf2   :  { %v1379_v20 = vadd.f32 %v1377_v2, %v1369_v16 }
0x1bf4   :  { %3111 = vtanh.f32 %v1379_v20  ;;  %v1387_v25 = vsel %vm556_vm10, %v1379_v20, %v1320_v10 }
0x1bfa   :  { %v3112_v45 = vpop.eup %3111 }
0x1bfb   :  { %1382 = vrot.lane.b32.xlu0 %v3112_v45, %s3369_s18 }
0x1c6d   :  { %v1383_v9 = vpop.permute.xlu0 %1382 }
0x1c6e   :  { %v3914_v23 = vmul.f32 %v1383_v9, %v1366_v24 }
0x1c70   :  { %v1386_v29 = vsel %vm556_vm10, %v3914_v23, %v1319_v39 }
0x1c71   :  { %v1395_v27 = vpack.c.bf16 %v1386_v29, %v1386_v29 }
0x1c73   :  { %1397 = vrot.lane.b32.xlu1 %v1395_v27, %s3376_s3 }
0x1ce5   :  { %v1398_v30 = vpop.permute.xlu1 %1397 }
0x1ce6   :  { %2852 = vmatmul.msk.bf16.vlgmr.msra.gmra.mxu3 %vm292_vm3, %v1398_v30 }
0x1d69   :  { %v1411_v21 = vpop.f32.mrf.mxu3 }
0x1d6a   :  { %v1415_v33 = vadd.f32 %v1411_v21, %v3743_v5 }
0x1d6c   :  { %3113 = vtanh.f32 %v1415_v33  ;;  %v2853_v12 = vmul.f32 -1.442695, %v1415_v33 }
0x1d6e   :  { %3115 = vpow2.f32 %v2853_v12 }
0x1d71   :  { %v1413_v34 = vpop.f32.mrf.mxu3 }
0x1d72   :  { %v3114_v11 = vpop.eup %3113 }
0x1d73   :  { %1438 = vrot.lane.b32.xlu2 %v3114_v11, %s3369_s18 }
0x1d74   :  { %v3116_v13 = vpop.eup %3115 }
0x1d75   :  { %v1419_v31 = vadd.f32 1.0, %v3116_v13 }
0x1d77   :  { %3117 = vrcp.f32 %v1419_v31  ;;  %v1431_v52 = vand.u32 2147483648, %v1419_v31  ;;  %vm1425_vm0 = vweird.f32 %v1419_v31  ;;  %v1429_v37 = vand.u32 2147483647, %v1419_v31 }
0x1d79   :  { %v1432_v19 = vor.u32 1.1754944e-38, %v1431_v52  ;;  %vm1430_vm4 = vcmp.eq.f32.partialorder %v1429_v37, 8.507059e+37 }
0x1d7d   :  { %v3118_v39 = vpop.eup %3117 }
0x1d7e   :  { %v1421_v42 = vmul.f32 %v3118_v39, %v1419_v31  ;;  %vm1426_vm12 = vweird.f32 %v3118_v39 }
0x1d7f   :  { %vm1427_vm1 = vmor %vm1425_vm0, %vm1426_vm12  ;;  %vm417_vm0 = vcmask 257024  }
0x1d80   :  { %v1422_v46 = vsub.f32 1.0, %v1421_v42  ;;  %v485_v42 = vsel %vm482_vm2, %v3615_v38, 0.0 }
0x1d82   :  { %v1423_v47 = vmul.f32 %v3118_v39, %v1422_v46 }
0x1d84   :  { %v1424_v49 = vadd.f32 %v3118_v39, %v1423_v47  ;;  %v486_v47 = vpack.c.bf16 %v485_v42, %v485_v42 }
0x1d86   :  { %v1428_v5 = vsel %vm1427_vm1, %v3118_v39, %v1424_v49  ;;  %vm1058_vm1 = vcmask 519424  }
0x1d87   :  { %v1433_v44 = vsel %vm1430_vm4, %v1432_v19, %v1428_v5  ;;  %vm1591_vm4 = vcmask 523264  }
0x1d88   :  { %v1436_v28 = vmul.f32 %v1433_v44, %v1387_v25 }
0x1dcd   :  { %v1439_v15 = vpop.permute.xlu2 %1438 }
0x1dce   :  { %v1441_v17 = vmul.f32 %v1439_v15, %v1433_v44 }
0x1dd0   :  { %1443 = vrot.lane.b32.xlu0 %v1441_v17, %s3376_s3  ;;  %v2983_v17 = vld [vmem:[%s4401_s9 + $0x18] sm:$0xff] }
0x1dd1   :  { %1608 = vmatpush.bf16.msrb.mxu2 %v2983_v17 }
0x1e42   :  { %v1444_v56 = vpop.permute.xlu0 %1443 }
0x1e43   :  { %v1446_v58 = vadd.f32 %v1444_v56, %v1436_v28  ;;  %v2982_v28 = vld [vmem:[%s4401_s9 + $0x10] sm:$0xff] }
0x1e44   :  { %1609 = vmatpush.bf16.msrb.mxu2 %v2982_v28 }
0x1e45   :  { %3119 = vtanh.f32 %v1446_v58  ;;  %v1454_v49 = vsel %vm482_vm2, %v1446_v58, %v1387_v25  ;;  %v3951_v25 = vld [vmem:[#allocation7 + $0x8] sm:$0xff] }
0x1e46   :  { %1655 = vmatpush.bf16.msrb.mxu3 %v3951_v25  ;;  %1715 = vmatpush.bf16.msrb.mxu0 %v3951_v25 }
0x1e47   :  { %1775 = vmatpush.bf16.msra.mxu1 %v3951_v25 }
0x1e4b   :  { %v3120_v60 = vpop.eup %3119 }
0x1e4c   :  { %1449 = vrot.lane.b32.xlu1 %v3120_v60, %s3369_s18 }
0x1ebe   :  { %v1450_v7 = vpop.permute.xlu1 %1449 }
0x1ebf   :  { %v1452_v22 = vmul.f32 %v1450_v7, %v1433_v44 }
0x1ec1   :  { %v1453_v4 = vsel %vm482_vm2, %v1452_v22, %v1386_v29  ;;  %v1455_v38 = vsel %vm482_vm2, %v1452_v22, 0.0 }
0x1ec2   :  { %v1462_v24 = vpack.c.bf16 %v1453_v4, %v1453_v4  ;;  %v1456_v44 = vpack.c.bf16 %v1455_v38, %v1455_v38  ;;  %v3963_v4 = vld [vmem:[#allocation7] sm:$0xff] }
0x1ec3   :  { %1656 = vmatpush.bf16.msrb.mxu3 %v3963_v4  ;;  %1716 = vmatpush.bf16.msrb.mxu0 %v3963_v4 }
0x1ec4   :  { %1464 = vrot.lane.b32.xlu2 %v1462_v24, %s3376_s3  ;;  %v2981_v24 = vld [vmem:[%s4401_s9 + $0x8] sm:$0xff]  ;;  %1776 = vmatpush.bf16.msra.mxu1 %v3963_v4 }
0x1ec5   :  { %1610 = vmatpush.bf16.msrb.mxu2 %v2981_v24 }
0x1ec6   :  { %1657 = vmatmul.bf16.vlgmr.msrb.gmra.mxu3 %v3374_v0 }
0x1ec7   :  { %1835 = vmatpush.bf16.msra.mxu3 %v3951_v25 }
0x1ec8   :  { %1955 = vmatpush.bf16.msrb.mxu1 %v3951_v25 }
0x1ecb   :  { %1836 = vmatpush.bf16.msra.mxu3 %v3963_v4 }
0x1ecc   :  { %1956 = vmatpush.bf16.msrb.mxu1 %v3963_v4 }
0x1ecf   :  { %2015 = vmatpush.bf16.msrb.mxu3 %v3951_v25 }
0x1ed3   :  { %2016 = vmatpush.bf16.msrb.mxu3 %v3963_v4 }
0x1f1e   :  { %v1465_v6 = vpop.permute.xlu2 %1464 }
0x1f1f   :  { %2854 = vmatmul.msk.bf16.vlgmr.msra.gmra.mxu0 %vm292_vm3, %v1465_v6  ;;  %v2980_v6 = vld [vmem:[%s4401_s9] sm:$0xff] }
0x1f20   :  { %1895 = vmatpush.bf16.msra.mxu0 %v3951_v25  ;;  %1611 = vmatpush.bf16.msrb.mxu2 %v2980_v6 }
0x1f24   :  { %1896 = vmatpush.bf16.msra.mxu0 %v3963_v4 }
0x1f9c   :  { %v1478_v16 = vpop.f32.mrf.mxu0 }
0x1f9d   :  { %v1482_v10 = vadd.f32 %v1478_v16, %v3740_v3 }
0x1f9f   :  { %3121 = vtanh.f32 %v1482_v10  ;;  %v2855_v45 = vmul.f32 -1.442695, %v1482_v10 }
0x1fa1   :  { %3123 = vpow2.f32 %v2855_v45  ;;  %v3991_v45 = vld [vmem:[%s4403_s11] ss:$0 sm:$0xff] }
0x1fa4   :  { %v1480_v2 = vpop.f32.mrf.mxu0 }
0x1fa5   :  { %v3122_v20 = vpop.eup %3121  ;;  %v1658_v2 = vpop.f32.mrf.mxu3 }
0x1fa6   :  { %1505 = vrot.lane.b32.xlu0 %v3122_v20, %s3369_s18 }
0x1fa7   :  { %v3124_v9 = vpop.eup %3123 }
0x1fa8   :  { %v1486_v29 = vadd.f32 1.0, %v3124_v9 }
0x1faa   :  { %3125 = vrcp.f32 %v1486_v29  ;;  %v1498_v3 = vand.u32 2147483648, %v1486_v29  ;;  %vm1492_vm7 = vweird.f32 %v1486_v29  ;;  %v1496_v11 = vand.u32 2147483647, %v1486_v29 }
0x1fac   :  { %v1499_v13 = vor.u32 1.1754944e-38, %v1498_v3  ;;  %vm1497_vm12 = vcmp.eq.f32.partialorder %v1496_v11, 8.507059e+37 }
0x1fad   :  { %v1660_v20 = vpop.f32.mrf.mxu3 }
0x1fae   :  { %414 = vrot.lane.b32.xlu0 %v3590_v57, %s3376_s3 }
0x1fb0   :  { %v3126_v27 = vpop.eup %3125 }
0x1fb1   :  { %v1488_v30 = vmul.f32 %v3126_v27, %v1486_v29  ;;  %vm1493_vm6 = vweird.f32 %v3126_v27 }
0x1fb2   :  { %vm1494_vm8 = vmor %vm1492_vm7, %vm1493_vm6 }
0x1fb3   :  { %v1489_v21 = vsub.f32 1.0, %v1488_v30 }
0x1fb5   :  { %v1490_v33 = vmul.f32 %v3126_v27, %v1489_v21 }
0x1fb7   :  { %v1491_v34 = vadd.f32 %v3126_v27, %v1490_v33 }
0x1fb9   :  { %v1495_v12 = vsel %vm1494_vm8, %v3126_v27, %v1491_v34 }
0x1fba   :  { %v1500_v57 = vsel %vm1497_vm12, %v1499_v13, %v1495_v12 }
0x1fbb   :  { %v1503_v52 = vmul.f32 %v1500_v57, %v1454_v49 }
0x2018   :  { %v1506_v31 = vpop.permute.xlu0 %1505 }
0x2019   :  { %v1508_v39 = vmul.f32 %v1506_v31, %v1500_v57 }
0x201b   :  { %1510 = vrot.lane.b32.xlu1 %v1508_v39, %s3376_s3 }
0x2020   :  { %v415_v46 = vpop.permute.xlu0 %414 }
0x2021   :  { %418 = vst.msk [vmem:[#allocation2] sm:$0xf] %vm417_vm0, %v415_v46 }
0x2023   :  { %488 = vrot.lane.b32.xlu1 %v486_v47, %s3376_s3 }
0x208d   :  { %v1511_v37 = vpop.permute.xlu1 %1510 }
0x208e   :  { %v1513_v5 = vadd.f32 %v1511_v37, %v1503_v52 }
0x2090   :  { %3127 = vtanh.f32 %v1513_v5 }
0x2095   :  { %v489_v19 = vpop.permute.xlu1 %488 }
0x2096   :  { %v3128_v15 = vpop.eup %3127  ;;  %492 = vst.msk [vmem:[#allocation2 + $0x4] sm:$0xf] %vm417_vm0, %v489_v19 }
0x2097   :  { %1516 = vrot.lane.b32.xlu2 %v3128_v15, %s3369_s18 }
0x209f   :  { %1458 = vrot.lane.b32.xlu2 %v1456_v44, %s3369_s18 }
0x20f1   :  { %v1517_v56 = vpop.permute.xlu2 %1516 }
0x20f2   :  { %v1519_v58 = vmul.f32 %v1517_v56, %v1500_v57 }
0x20f4   :  { %v1520_v60 = vsel %vm4411_vm9, %v1519_v58, 0.0 }
0x20f5   :  { %v1521_v7 = vpack.c.bf16 %v1520_v60, %v1520_v60 }
0x20f7   :  { %1523 = vrot.lane.b32.xlu0 %v1521_v7, %s3369_s18 }
0x20f9   :  { %v1459_v22 = vpop.permute.xlu2 %1458 }
0x20fa   :  { %1461 = vst.msk [vmem:[#allocation2 + $0x4] sm:$0xf] %vm1058_vm1, %v1459_v22 }
0x2169   :  { %v1524_v16 = vpop.permute.xlu0 %1523 }
0x216a   :  { %1526 = vst.msk [vmem:[#allocation2] sm:$0xf] %vm1058_vm1, %v1524_v16  ;;  %v559_v16 = vsel %vm556_vm10, %v3645_v18, 0.0 }
0x2171   :  { %v3984_v10 = vld [vmem:[#allocation2] sm:$0xff] }
0x2172   :  { %2888 = vmatmul.msk.bf16.vlgmr.msrb.gmra.mxu2 %vm1591_vm4, %v3984_v10 }
0x21f5   :  { %v1613_v9 = vpop.f32.mrf.mxu2 }
0x21f6   :  { %v1614_v29 = vadd.f32 %v3991_v45, %v1613_v9 }
0x21f8   :  { %v1662_v27 = vadd.f32 %v1658_v2, %v1614_v29  ;;  %v560_v2 = vpack.c.bf16 %v559_v16, %v559_v16 }
0x21fa   :  { %3129 = vtanh.f32 %v1662_v27  ;;  %v2900_v21 = vmul.f32 -1.442695, %v1662_v27 }
0x21fc   :  { %3131 = vpow2.f32 %v2900_v21 }
0x21fd   :  { %v1615_v58 = vpop.f32.mrf.mxu2 }
0x21fe   :  { %v1616_v60 = vadd.f32 %v3991_v45, %v1615_v58 }
0x2200   :  { %v3130_v30 = vpop.eup %3129 }
0x2201   :  { %1685 = vrot.lane.b32.xlu1 %v3130_v30, %s3369_s18 }
0x2202   :  { %v3132_v33 = vpop.eup %3131 }
0x2203   :  { %v1666_v34 = vadd.f32 1.0, %v3132_v33 }
0x2205   :  { %3133 = vrcp.f32 %v1666_v34  ;;  %v1678_v57 = vand.u32 2147483648, %v1666_v34  ;;  %vm1672_vm7 = vweird.f32 %v1666_v34  ;;  %v1676_v39 = vand.u32 2147483647, %v1666_v34 }
0x2207   :  { %v1679_v46 = vor.u32 1.1754944e-38, %v1678_v57  ;;  %vm1677_vm12 = vcmp.eq.f32.partialorder %v1676_v39, 8.507059e+37  ;;  %v633_v57 = vsel %vm630_vm5, %v3673_v61, 0.0  ;;  %v1321_v61 = vsel %vm630_vm5, %v3901_v35, 0.0 }
0x220b   :  { %v3134_v3 = vpop.eup %3133 }
0x220c   :  { %v1668_v11 = vmul.f32 %v3134_v3, %v1666_v34  ;;  %vm1673_vm6 = vweird.f32 %v3134_v3 }
0x220d   :  { %vm1674_vm8 = vmor %vm1672_vm7, %vm1673_vm6 }
0x220e   :  { %v1669_v12 = vsub.f32 1.0, %v1668_v11 }
0x2210   :  { %v1670_v13 = vmul.f32 %v3134_v3, %v1669_v12 }
0x2212   :  { %v1671_v31 = vadd.f32 %v3134_v3, %v1670_v13 }
0x2214   :  { %v1675_v42 = vsel %vm1674_vm8, %v3134_v3, %v1671_v31 }
0x2215   :  { %v1680_v49 = vsel %vm1677_vm12, %v1679_v46, %v1675_v42  ;;  %v634_v42 = vpack.c.bf16 %v633_v57, %v633_v57 }
0x2216   :  { %v1683_v37 = vmul.f32 0.0, %v1680_v49 }
0x2273   :  { %v1686_v47 = vpop.permute.xlu1 %1685 }
0x2274   :  { %v1688_v52 = vmul.f32 %v1686_v47, %v1680_v49 }
0x2276   :  { %1690 = vrot.lane.b32.xlu2 %v1688_v52, %s3376_s3 }
0x22d0   :  { %v1691_v5 = vpop.permute.xlu2 %1690 }
0x22d1   :  { %v1693_v19 = vadd.f32 %v1691_v5, %v1683_v37 }
0x22d3   :  { %3135 = vtanh.f32 %v1693_v19  ;;  %v1701_v47 = vsel %vm4411_vm9, %v1693_v19, 0.0 }
0x22d9   :  { %v3136_v15 = vpop.eup %3135 }
0x22da   :  { %1696 = vrot.lane.b32.xlu0 %v3136_v15, %s3369_s18 }
0x234c   :  { %v1697_v38 = vpop.permute.xlu0 %1696 }
0x234d   :  { %v1699_v44 = vmul.f32 %v1697_v38, %v1680_v49  ;;  %v1322_v38 = vpack.c.bf16 %v1321_v61, %v1321_v61 }
0x234f   :  { %v3999_v17 = vsel %vm4411_vm9, %v1699_v44, 0.0 }
0x2350   :  { %v1702_v28 = vpack.c.bf16 %v3999_v17, %v3999_v17 }
0x2352   :  { %1704 = vrot.lane.b32.xlu1 %v1702_v28, %s3376_s3 }
0x23c4   :  { %v1705_v56 = vpop.permute.xlu1 %1704 }
0x23c5   :  { %2901 = vmatmul.msk.bf16.vlgmr.msrb.gmra.mxu0 %vm292_vm3, %v1705_v56 }
0x23c6   :  { %2075 = vmatpush.bf16.msrb.mxu0 %v3951_v25  ;;  %v1388_v25 = vsel %vm556_vm10, %v3914_v23, 0.0 }
0x23ca   :  { %2076 = vmatpush.bf16.msrb.mxu0 %v3963_v4  ;;  %v1389_v4 = vpack.c.bf16 %v1388_v25, %v1388_v25 }
0x2442   :  { %v1718_v7 = vpop.f32.mrf.mxu0 }
0x2443   :  { %v1722_v22 = vadd.f32 %v1718_v7, %v1616_v60 }
0x2445   :  { %3137 = vtanh.f32 %v1722_v22  ;;  %v2902_v20 = vmul.f32 -1.442695, %v1722_v22 }
0x2447   :  { %3139 = vpow2.f32 %v2902_v20 }
0x244a   :  { %v1720_v24 = vpop.f32.mrf.mxu0 }
0x244b   :  { %v3138_v6 = vpop.eup %3137 }
0x244c   :  { %1745 = vrot.lane.b32.xlu2 %v3138_v6, %s3369_s18 }
0x244d   :  { %v3140_v9 = vpop.eup %3139 }
0x244e   :  { %v1726_v29 = vadd.f32 1.0, %v3140_v9 }
0x2450   :  { %3141 = vrcp.f32 %v1726_v29  ;;  %v1738_v34 = vand.u32 2147483648, %v1726_v29  ;;  %vm1732_vm7 = vweird.f32 %v1726_v29  ;;  %v1736_v3 = vand.u32 2147483647, %v1726_v29 }
0x2452   :  { %v1739_v23 = vor.u32 1.1754944e-38, %v1738_v34  ;;  %vm1737_vm12 = vcmp.eq.f32.partialorder %v1736_v3, 8.507059e+37 }
0x2454   :  { %562 = vrot.lane.b32.xlu2 %v560_v2, %s3376_s3 }
0x2456   :  { %v3142_v27 = vpop.eup %3141 }
0x2457   :  { %v1728_v30 = vmul.f32 %v3142_v27, %v1726_v29  ;;  %vm1733_vm6 = vweird.f32 %v3142_v27 }
0x2458   :  { %vm1734_vm8 = vmor %vm1732_vm7, %vm1733_vm6 }
0x2459   :  { %v1729_v21 = vsub.f32 1.0, %v1728_v30 }
0x245b   :  { %v1730_v33 = vmul.f32 %v3142_v27, %v1729_v21 }
0x245c   :  { %1391 = vrot.lane.b32.xlu2 %v1389_v4, %s3369_s18 }
0x245d   :  { %v1731_v18 = vadd.f32 %v3142_v27, %v1730_v33 }
0x245f   :  { %v1735_v11 = vsel %vm1734_vm8, %v3142_v27, %v1731_v18 }
0x2460   :  { %v1740_v13 = vsel %vm1737_vm12, %v1739_v23, %v1735_v11 }
0x2461   :  { %v1743_v49 = vmul.f32 %v1740_v13, %v1701_v47 }
0x24a6   :  { %v1746_v12 = vpop.permute.xlu2 %1745 }
0x24a7   :  { %v1748_v31 = vmul.f32 %v1746_v12, %v1740_v13 }
0x24a9   :  { %1750 = vrot.lane.b32.xlu0 %v1748_v31, %s3376_s3 }
0x24ae   :  { %v563_v39 = vpop.permute.xlu2 %562 }
0x24af   :  { %566 = vst.msk [vmem:[#allocation2 + $0x8] sm:$0xf] %vm417_vm0, %v563_v39 }
0x24b1   :  { %636 = vrot.lane.b32.xlu0 %v634_v42, %s3376_s3 }
0x24b6   :  { %v1392_v46 = vpop.permute.xlu2 %1391 }
0x24b7   :  { %1394 = vst.msk [vmem:[#allocation2 + $0x8] sm:$0xf] %vm1058_vm1, %v1392_v46 }
0x251b   :  { %v1751_v52 = vpop.permute.xlu0 %1750 }
0x251c   :  { %v1753_v37 = vadd.f32 %v1751_v52, %v1743_v49 }
0x251e   :  { %3143 = vtanh.f32 %v1753_v37  ;;  %v1761_v12 = vsel %vm482_vm2, %v1753_v37, %v1701_v47 }
0x2523   :  { %v637_v5 = vpop.permute.xlu0 %636 }
0x2524   :  { %v3144_v15 = vpop.eup %3143  ;;  %640 = vst.msk [vmem:[#allocation2 + $0xc] sm:$0xf] %vm417_vm0, %v637_v5 }
0x2525   :  { %1756 = vrot.lane.b32.xlu1 %v3144_v15, %s3369_s18 }
0x252d   :  { %1324 = vrot.lane.b32.xlu1 %v1322_v38, %s3369_s18 }
0x2597   :  { %v1757_v44 = vpop.permute.xlu1 %1756 }
0x2598   :  { %v1759_v28 = vmul.f32 %v1757_v44, %v1740_v13 }
0x259a   :  { %v1760_v19 = vsel %vm482_vm2, %v1759_v28, %v3999_v17  ;;  %v707_v28 = vsel %vm704_vm13, %v3703_v43, 0.0 }
0x259b   :  { %v1762_v56 = vpack.c.bf16 %v1760_v19, %v1760_v19 }
0x259d   :  { %1764 = vrot.lane.b32.xlu0 %v1762_v56, %s3376_s3  ;;  %v1254_v56 = vsel %vm704_vm13, %v3888_v54, 0.0 }
0x259f   :  { %v1325_v58 = vpop.permute.xlu1 %1324 }
0x25a0   :  { %1327 = vst.msk [vmem:[#allocation2 + $0xc] sm:$0xf] %vm1058_vm1, %v1325_v58  ;;  %v1255_v58 = vpack.c.bf16 %v1254_v56, %v1254_v56 }
0x25a7   :  { %v4037_v60 = vld [vmem:[#allocation2 + $0x8] sm:$0xff] }
0x25a8   :  { %2889 = vmatmul.msk.bf16.gmra.mxu2 %vm1591_vm4, %v4037_v60 }
0x260f   :  { %v1765_v35 = vpop.permute.xlu0 %1764 }
0x2610   :  { %2903 = vmatmul.msk.bf16.vlgmr.msra.gmra.mxu1 %vm292_vm3, %v1765_v35 }
0x262b   :  { %v1618_v7 = vpop.f32.mrf.mxu2 }
0x262c   :  { %v1619_v22 = vadd.f32 %v3991_v45, %v1618_v7 }
0x2633   :  { %v1620_v47 = vpop.f32.mrf.mxu2 }
0x2634   :  { %v1621_v37 = vadd.f32 %v3991_v45, %v1620_v47 }
0x268d   :  { %v1778_v24 = vpop.f32.mrf.mxu1 }
0x268e   :  { %v1782_v6 = vadd.f32 %v1778_v24, %v1619_v22 }
0x2690   :  { %3145 = vtanh.f32 %v1782_v6  ;;  %v2904_v2 = vmul.f32 -1.442695, %v1782_v6 }
0x2692   :  { %3147 = vpow2.f32 %v2904_v2 }
0x2695   :  { %v1780_v17 = vpop.f32.mrf.mxu1 }
0x2696   :  { %v3146_v16 = vpop.eup %3145 }
0x2697   :  { %1805 = vrot.lane.b32.xlu1 %v3146_v16, %s3369_s18 }
0x2698   :  { %v3148_v25 = vpop.eup %3147 }
0x2699   :  { %v1786_v4 = vadd.f32 1.0, %v3148_v25 }
0x269b   :  { %3149 = vrcp.f32 %v1786_v4  ;;  %v1798_v21 = vand.u32 2147483648, %v1786_v4  ;;  %vm1792_vm7 = vweird.f32 %v1786_v4  ;;  %v1796_v33 = vand.u32 2147483647, %v1786_v4 }
0x269d   :  { %v1799_v34 = vor.u32 1.1754944e-38, %v1798_v21  ;;  %vm1797_vm12 = vcmp.eq.f32.partialorder %v1796_v33, 8.507059e+37 }
0x26a1   :  { %v3150_v20 = vpop.eup %3149 }
0x26a2   :  { %v1788_v9 = vmul.f32 %v3150_v20, %v1786_v4  ;;  %vm1793_vm6 = vweird.f32 %v3150_v20 }
0x26a3   :  { %vm1794_vm8 = vmor %vm1792_vm7, %vm1793_vm6 }
0x26a4   :  { %v1789_v29 = vsub.f32 1.0, %v1788_v9 }
0x26a6   :  { %v1790_v27 = vmul.f32 %v3150_v20, %v1789_v29 }
0x26a8   :  { %v1791_v30 = vadd.f32 %v3150_v20, %v1790_v27  ;;  %v781_v27 = vsel %vm778_vm11, %v3774_v53, 0.0  ;;  %v1187_v53 = vsel %vm778_vm11, %v3875_v62, 0.0 }
0x26a9   :  { %v782_v21 = vpack.c.bf16 %v781_v27, %v781_v27  ;;  %v2820_v27 = vmul.f32 -1.442695, %v3854_v40 }
0x26aa   :  { %v1795_v18 = vsel %vm1794_vm8, %v3150_v20, %v1791_v30 }
0x26ab   :  { %v1800_v11 = vsel %vm1797_vm12, %v1799_v34, %v1795_v18 }
0x26ac   :  { %v1803_v13 = vmul.f32 %v1800_v11, %v1761_v12 }
0x2709   :  { %v1806_v3 = vpop.permute.xlu1 %1805 }
0x270a   :  { %v1808_v23 = vmul.f32 %v1806_v3, %v1800_v11 }
0x270c   :  { %1810 = vrot.lane.b32.xlu2 %v1808_v23, %s3376_s3 }
0x2766   :  { %v1811_v31 = vpop.permute.xlu2 %1810 }
0x2767   :  { %v1813_v57 = vadd.f32 %v1811_v31, %v1803_v13  ;;  %v1188_v31 = vpack.c.bf16 %v1187_v53, %v1187_v53 }
0x2769   :  { %3151 = vtanh.f32 %v1813_v57  ;;  %v1821_v18 = vsel %vm556_vm10, %v1813_v57, %v1761_v12 }
0x276f   :  { %v3152_v39 = vpop.eup %3151 }
0x2770   :  { %1816 = vrot.lane.b32.xlu0 %v3152_v39, %s3369_s18 }
0x27e2   :  { %v1817_v42 = vpop.permute.xlu0 %1816 }
0x27e3   :  { %v1819_v46 = vmul.f32 %v1817_v42, %v1800_v11 }
0x27e5   :  { %v4050_v49 = vsel %vm556_vm10, %v1819_v46, %v1760_v19  ;;  %v708_v19 = vpack.c.bf16 %v707_v28, %v707_v28 }
0x27e6   :  { %v1822_v52 = vpack.c.bf16 %v4050_v49, %v4050_v49 }
0x27e8   :  { %1824 = vrot.lane.b32.xlu1 %v1822_v52, %s3376_s3 }
0x285a   :  { %v1825_v5 = vpop.permute.xlu1 %1824 }
0x285b   :  { %2905 = vmatmul.msk.bf16.vlgmr.msra.gmra.mxu3 %vm292_vm3, %v1825_v5 }
0x28de   :  { %v1838_v15 = vpop.f32.mrf.mxu3 }
0x28df   :  { %v1842_v61 = vadd.f32 %v1838_v15, %v1621_v37 }
0x28e1   :  { %3153 = vtanh.f32 %v1842_v61  ;;  %v2906_v35 = vmul.f32 -1.442695, %v1842_v61 }
0x28e3   :  { %3155 = vpow2.f32 %v2906_v35 }
0x28e6   :  { %v1840_v38 = vpop.f32.mrf.mxu3 }
0x28e7   :  { %v3154_v44 = vpop.eup %3153 }
0x28e8   :  { %1865 = vrot.lane.b32.xlu2 %v3154_v44, %s3369_s18 }
0x28e9   :  { %v3156_v7 = vpop.eup %3155 }
0x28ea   :  { %v1846_v22 = vadd.f32 1.0, %v3156_v7 }
0x28ec   :  { %3157 = vrcp.f32 %v1846_v22  ;;  %v1858_v2 = vand.u32 2147483648, %v1846_v22  ;;  %vm1852_vm7 = vweird.f32 %v1846_v22  ;;  %v1856_v25 = vand.u32 2147483647, %v1846_v22 }
0x28ee   :  { %v1859_v54 = vor.u32 1.1754944e-38, %v1858_v2  ;;  %vm1857_vm12 = vcmp.eq.f32.partialorder %v1856_v25, 8.507059e+37 }
0x28f0   :  { %710 = vrot.lane.b32.xlu2 %v708_v19, %s3376_s3 }
0x28f2   :  { %v3158_v24 = vpop.eup %3157 }
0x28f3   :  { %v1848_v6 = vmul.f32 %v3158_v24, %v1846_v22  ;;  %vm1853_vm6 = vweird.f32 %v3158_v24 }
0x28f4   :  { %vm1854_vm8 = vmor %vm1852_vm7, %vm1853_vm6 }
0x28f5   :  { %v1849_v17 = vsub.f32 1.0, %v1848_v6 }
0x28f7   :  { %v1850_v16 = vmul.f32 %v3158_v24, %v1849_v17 }
0x28f8   :  { %1257 = vrot.lane.b32.xlu2 %v1255_v58, %s3369_s18 }
0x28f9   :  { %v1851_v43 = vadd.f32 %v3158_v24, %v1850_v16 }
0x28fb   :  { %v1855_v4 = vsel %vm1854_vm8, %v3158_v24, %v1851_v43 }
0x28fc   :  { %v1860_v9 = vsel %vm1857_vm12, %v1859_v54, %v1855_v4 }
0x28fd   :  { %v1863_v34 = vmul.f32 %v1860_v9, %v1821_v18 }
0x2942   :  { %v1866_v20 = vpop.permute.xlu2 %1865 }
0x2943   :  { %v1868_v29 = vmul.f32 %v1866_v20, %v1860_v9 }
0x2945   :  { %1870 = vrot.lane.b32.xlu0 %v1868_v29, %s3376_s3 }
0x294a   :  { %v711_v30 = vpop.permute.xlu2 %710 }
0x294b   :  { %714 = vst.msk [vmem:[#allocation2 + $0x10] sm:$0xf] %vm417_vm0, %v711_v30 }
0x294d   :  { %784 = vrot.lane.b32.xlu0 %v782_v21, %s3376_s3 }
0x2952   :  { %v1258_v33 = vpop.permute.xlu2 %1257 }
0x2953   :  { %1260 = vst.msk [vmem:[#allocation2 + $0x10] sm:$0xf] %vm1058_vm1, %v1258_v33 }
0x29b7   :  { %v1871_v3 = vpop.permute.xlu0 %1870 }
0x29b8   :  { %v1873_v11 = vadd.f32 %v1871_v3, %v1863_v34 }
0x29ba   :  { %3159 = vtanh.f32 %v1873_v11  ;;  %v4098_v4 = vsel %vm630_vm5, %v1873_v11, %v1821_v18 }
0x29bf   :  { %v785_v23 = vpop.permute.xlu0 %784 }
0x29c0   :  { %v3160_v13 = vpop.eup %3159  ;;  %788 = vst.msk [vmem:[#allocation2 + $0x14] sm:$0xf] %vm417_vm0, %v785_v23 }
0x29c1   :  { %1876 = vrot.lane.b32.xlu1 %v3160_v13, %s3369_s18 }
0x29c9   :  { %1190 = vrot.lane.b32.xlu1 %v1188_v31, %s3369_s18 }
0x2a33   :  { %v1877_v39 = vpop.permute.xlu1 %1876 }
0x2a34   :  { %v1879_v42 = vmul.f32 %v1877_v39, %v1860_v9 }
0x2a36   :  { %v1880_v12 = vsel %vm630_vm5, %v1879_v42, %v4050_v49 }
0x2a37   :  { %v1882_v57 = vpack.c.bf16 %v1880_v12, %v1880_v12 }
0x2a39   :  { %1884 = vrot.lane.b32.xlu0 %v1882_v57, %s3376_s3 }
0x2a3b   :  { %v1191_v46 = vpop.permute.xlu1 %1190 }
0x2a3c   :  { %1193 = vst.msk [vmem:[#allocation2 + $0x14] sm:$0xf] %vm1058_vm1, %v1191_v46 }
0x2a43   :  { %v4086_v52 = vld [vmem:[#allocation2 + $0x10] sm:$0xff] }
0x2a44   :  { %2890 = vmatmul.msk.bf16.gmra.mxu2 %vm1591_vm4, %v4086_v52 }
0x2aab   :  { %v1885_v62 = vpop.permute.xlu0 %1884 }
0x2aac   :  { %2907 = vmatmul.msk.bf16.vlgmr.msra.gmra.mxu0 %vm292_vm3, %v1885_v62 }
0x2ac7   :  { %v1623_v5 = vpop.f32.mrf.mxu2 }
0x2ac8   :  { %v1624_v47 = vadd.f32 %v3991_v45, %v1623_v5 }
0x2b29   :  { %v1898_v37 = vpop.f32.mrf.mxu0 }
0x2b2a   :  { %v1902_v15 = vadd.f32 %v1898_v37, %v1624_v47  ;;  %v2988_v47 = vld [vmem:[%s4404_s12 + $0x10] sm:$0xff]  ;;  %v2987_v37 = vld [vmem:[%s4404_s12 + $0x8] sm:$0xff] }
0x2b2c   :  { %3161 = vtanh.f32 %v1902_v15  ;;  %v2908_v38 = vmul.f32 -1.442695, %v1902_v15  ;;  %v2986_v15 = vld [vmem:[%s4404_s12] sm:$0xff] }
0x2b2e   :  { %3163 = vpow2.f32 %v2908_v38 }
0x2b31   :  { %v1900_v49 = vpop.f32.mrf.mxu0 }
0x2b32   :  { %v3162_v61 = vpop.eup %3161 }
0x2b33   :  { %1925 = vrot.lane.b32.xlu1 %v3162_v61, %s3369_s18  ;;  %v1625_v61 = vpop.f32.mrf.mxu2 }
0x2b34   :  { %v3164_v44 = vpop.eup %3163  ;;  %v1626_v38 = vadd.f32 %v3991_v45, %v1625_v61 }
0x2b35   :  { %v1906_v28 = vadd.f32 1.0, %v3164_v44 }
0x2b37   :  { %3165 = vrcp.f32 %v1906_v28  ;;  %v1918_v22 = vand.u32 2147483648, %v1906_v28  ;;  %vm1912_vm7 = vweird.f32 %v1906_v28  ;;  %v1916_v24 = vand.u32 2147483647, %v1906_v28 }
0x2b38   :  { %3167 = vtanh.f32 %v3854_v40 }
0x2b39   :  { %v1919_v17 = vor.u32 1.1754944e-38, %v1918_v22  ;;  %vm1917_vm12 = vcmp.eq.f32.partialorder %v1916_v24, 8.507059e+37 }
0x2b3d   :  { %v3166_v19 = vpop.eup %3165 }
0x2b3e   :  { %v1908_v56 = vmul.f32 %v3166_v19, %v1906_v28  ;;  %vm1913_vm6 = vweird.f32 %v3166_v19  ;;  %v3168_v25 = vpop.eup %3167 }
0x2b3f   :  { %vm1914_vm8 = vmor %vm1912_vm7, %vm1913_vm6 }
0x2b40   :  { %v1909_v58 = vsub.f32 1.0, %v1908_v56 }
0x2b42   :  { %v1910_v35 = vmul.f32 %v3166_v19, %v1909_v58 }
0x2b44   :  { %v1911_v7 = vadd.f32 %v3166_v19, %v1910_v35 }
0x2b46   :  { %v1915_v6 = vsel %vm1914_vm8, %v3166_v19, %v1911_v7  ;;  %v854_v19 = vsel %vm852_vm14, %v3820_v8, %v3817_v1 }
0x2b47   :  { %v1920_v43 = vsel %vm1917_vm12, %v1919_v17, %v1915_v6 }
0x2b48   :  { %v1923_v54 = vmul.f32 %v1920_v43, %v4098_v4 }
0x2ba5   :  { %v1926_v16 = vpop.permute.xlu1 %1925 }
0x2ba6   :  { %v1928_v2 = vmul.f32 %v1926_v16, %v1920_v43 }
0x2ba8   :  { %1930 = vrot.lane.b32.xlu2 %v1928_v2, %s3376_s3 }
0x2bb0   :  { %906 = vrot.lane.b32.xlu2 %v3168_v25, %s3369_s18 }
0x2c02   :  { %v1931_v20 = vpop.permute.xlu2 %1930 }
0x2c03   :  { %v4101_v9 = vadd.f32 %v1931_v20, %v1923_v54 }
0x2c05   :  { %3169 = vtanh.f32 %v4101_v9 }
0x2c06   :  { %3171 = vpow2.f32 %v2820_v27 }
0x2c0a   :  { %v907_v46 = vpop.permute.xlu2 %906 }
0x2c0b   :  { %v3170_v29 = vpop.eup %3169 }
0x2c0c   :  { %1936 = vrot.lane.b32.xlu0 %v3170_v29, %s3369_s18  ;;  %v3172_v30 = vpop.eup %3171 }
0x2c0d   :  { %v887_v21 = vadd.f32 1.0, %v3172_v30  ;;  %v855_v30 = vsel %vm852_vm14, %v3829_v26, 0.0  ;;  %v4156_v26 = vsel %vm704_vm13, %v4101_v9, %v4098_v4 }
0x2c0f   :  { %3173 = vrcp.f32 %v887_v21  ;;  %v899_v40 = vand.u32 2147483648, %v887_v21  ;;  %vm893_vm7 = vweird.f32 %v887_v21  ;;  %v897_v39 = vand.u32 2147483647, %v887_v21 }
0x2c11   :  { %v900_v57 = vor.u32 1.1754944e-38, %v899_v40  ;;  %vm898_vm12 = vcmp.eq.f32.partialorder %v897_v39, 8.507059e+37 }
0x2c15   :  { %v3174_v33 = vpop.eup %3173 }
0x2c16   :  { %v889_v34 = vmul.f32 %v3174_v33, %v887_v21  ;;  %vm894_vm6 = vweird.f32 %v3174_v33 }
0x2c17   :  { %vm895_vm8 = vmor %vm893_vm7, %vm894_vm6 }
0x2c18   :  { %v890_v18 = vsub.f32 1.0, %v889_v34 }
0x2c1a   :  { %v891_v3 = vmul.f32 %v3174_v33, %v890_v18 }
0x2c1c   :  { %v892_v53 = vadd.f32 %v3174_v33, %v891_v3 }
0x2c1e   :  { %v896_v42 = vsel %vm895_vm8, %v3174_v33, %v892_v53  ;;  %v856_v33 = vpack.c.bf16 %v855_v30, %v855_v30 }
0x2c1f   :  { %v901_v62 = vsel %vm898_vm12, %v900_v57, %v896_v42 }
0x2c20   :  { %v909_v5 = vmul.f32 %v907_v46, %v901_v62  ;;  %v904_v58 = vmul.f32 %v901_v62, %v854_v19 }
0x2c7e   :  { %v1937_v11 = vpop.permute.xlu0 %1936 }
0x2c7f   :  { %v1939_v23 = vmul.f32 %v1937_v11, %v1920_v43  ;;  %v1120_v11 = vsel %vm852_vm14, %v3862_v50, 0.0 }
0x2c81   :  { %v4108_v13 = vsel %vm704_vm13, %v1939_v23, %v1880_v12  ;;  %v2989_v12 = vld [vmem:[%s4404_s12 + $0x18] sm:$0xff]  ;;  %v1121_v23 = vpack.c.bf16 %v1120_v11, %v1120_v11 }
0x2c82   :  { %v1942_v31 = vpack.c.bf16 %v4108_v13, %v4108_v13  ;;  %2161 = vmatpush.bf16.msra.mxu1 %v2989_v12 }
0x2c84   :  { %1944 = vrot.lane.b32.xlu1 %v1942_v31, %s3376_s3 }
0x2c86   :  { %2162 = vmatpush.bf16.msra.mxu1 %v2988_v47  ;;  %v4182_v47 = vld [vmem:[#allocation8] sm:$0xff] }
0x2c8a   :  { %2163 = vmatpush.bf16.msra.mxu1 %v2987_v37 }
0x2c8c   :  { %911 = vrot.lane.b32.xlu1 %v909_v5, %s3376_s3 }
0x2c8e   :  { %2164 = vmatpush.bf16.msra.mxu1 %v2986_v15 }
0x2cf6   :  { %v1945_v49 = vpop.permute.xlu1 %1944 }
0x2cf7   :  { %2909 = vmatmul.msk.bf16.vlgmr.msrb.gmra.mxu1 %vm292_vm3, %v1945_v49 }
0x2cfe   :  { %v912_v56 = vpop.permute.xlu1 %911 }
0x2d07   :  { %2931 = vmatmul.msk.bf16.vlgmr.msra.gmra.mxu1 %vm1591_vm4, %v3984_v10  ;;  %v914_v10 = vadd.f32 %v912_v56, %v904_v58 }
0x2d17   :  { %2932 = vmatmul.msk.bf16.gmra.mxu1 %vm1591_vm4, %v4037_v60 }
0x2d27   :  { %2933 = vmatmul.msk.bf16.gmra.mxu1 %vm1591_vm4, %v4086_v52 }
0x2d74   :  { %v1958_v44 = vpop.f32.mrf.mxu1 }
0x2d75   :  { %v1962_v28 = vadd.f32 %v1958_v44, %v1626_v38 }
0x2d77   :  { %3175 = vtanh.f32 %v1962_v28  ;;  %v2910_v52 = vmul.f32 -1.442695, %v1962_v28 }
0x2d78   :  { %3177 = vtanh.f32 %v914_v10 }
0x2d79   :  { %3179 = vpow2.f32 %v2910_v52 }
0x2d7c   :  { %v1960_v35 = vpop.f32.mrf.mxu1 }
0x2d7d   :  { %v3176_v7 = vpop.eup %3175 }
0x2d7e   :  { %1985 = vrot.lane.b32.xlu0 %v3176_v7, %s3369_s18  ;;  %v3178_v60 = vpop.eup %3177 }
0x2d7f   :  { %v3180_v22 = vpop.eup %3179 }
0x2d80   :  { %v1966_v24 = vadd.f32 1.0, %v3180_v22 }
0x2d82   :  { %3181 = vrcp.f32 %v1966_v24  ;;  %v1978_v43 = vand.u32 2147483648, %v1966_v24  ;;  %vm1972_vm7 = vweird.f32 %v1966_v24  ;;  %v1976_v2 = vand.u32 2147483647, %v1966_v24 }
0x2d84   :  { %v1979_v54 = vor.u32 1.1754944e-38, %v1978_v43  ;;  %vm1977_vm12 = vcmp.eq.f32.partialorder %v1976_v2, 8.507059e+37  ;;  %v4197_v37 = vpop.f32.mrf.mxu1 }
0x2d86   :  { %917 = vrot.lane.b32.xlu0 %v3178_v60, %s3369_s18  ;;  %v4216_v60 = vld [vmem:[%s4406_s14] ss:$0 sm:$0xff] }
0x2d88   :  { %v3182_v6 = vpop.eup %3181 }
0x2d89   :  { %v1968_v17 = vmul.f32 %v3182_v6, %v1966_v24  ;;  %vm1973_vm6 = vweird.f32 %v3182_v6 }
0x2d8a   :  { %vm1974_vm8 = vmor %vm1972_vm7, %vm1973_vm6 }
0x2d8b   :  { %v1969_v16 = vsub.f32 1.0, %v1968_v17 }
0x2d8c   :  { %v4199_v15 = vpop.f32.mrf.mxu1 }
0x2d8d   :  { %v1970_v1 = vmul.f32 %v3182_v6, %v1969_v16  ;;  %v2169_v59 = vadd.f32 %v4216_v60, %v4199_v15 }
0x2d8f   :  { %v1971_v8 = vadd.f32 %v3182_v6, %v1970_v1 }
0x2d91   :  { %v1975_v25 = vsel %vm1974_vm8, %v3182_v6, %v1971_v8 }
0x2d92   :  { %v1980_v29 = vsel %vm1977_vm12, %v1979_v54, %v1975_v25 }
0x2d93   :  { %v1983_v53 = vmul.f32 %v1980_v29, %v4156_v26 }
0x2d94   :  { %v4201_v49 = vpop.f32.mrf.mxu1 }
0x2d95   :  { %v2172_v41 = vadd.f32 %v4216_v60, %v4201_v49 }
0x2d9c   :  { %v4203_v61 = vpop.f32.mrf.mxu1 }
0x2d9d   :  { %v2174_v51 = vadd.f32 %v4216_v60, %v4203_v61 }
0x2da4   :  { %v4205_v38 = vpop.f32.mrf.mxu1 }
0x2dac   :  { %v4207_v44 = vpop.f32.mrf.mxu1 }
0x2df0   :  { %v1986_v20 = vpop.permute.xlu0 %1985 }
0x2df1   :  { %v1988_v27 = vmul.f32 %v1986_v20, %v1980_v29 }
0x2df3   :  { %1990 = vrot.lane.b32.xlu2 %v1988_v27, %s3376_s3 }
0x2df8   :  { %v918_v21 = vpop.permute.xlu0 %917 }
0x2df9   :  { %v920_v34 = vmul.f32 %v918_v21, %v901_v62 }
0x2dfb   :  { %v927_v18 = vsel %vm926_vm15, %v920_v34, 0.0  ;;  %858 = vrot.lane.b32.xlu2 %v856_v33, %s3376_s3 }
0x2dfc   :  { %v928_v3 = vpack.c.bf16 %v927_v18, %v927_v18 }
0x2dfe   :  { %930 = vrot.lane.b32.xlu0 %v928_v3, %s3376_s3 }
0x2e03   :  { %1123 = vrot.lane.b32.xlu2 %v1121_v23, %s3369_s18 }
0x2e4d   :  { %v1991_v31 = vpop.permute.xlu2 %1990 }
0x2e4e   :  { %v4159_v40 = vadd.f32 %v1991_v31, %v1983_v53 }
0x2e50   :  { %3183 = vtanh.f32 %v4159_v40 }
0x2e55   :  { %v859_v39 = vpop.permute.xlu2 %858 }
0x2e56   :  { %v3184_v42 = vpop.eup %3183  ;;  %862 = vst.msk [vmem:[#allocation2 + $0x18] sm:$0xf] %vm417_vm0, %v859_v39 }
0x2e57   :  { %1996 = vrot.lane.b32.xlu1 %v3184_v42, %s3369_s18 }
0x2e5d   :  { %v1124_v50 = vpop.permute.xlu2 %1123 }
0x2e5e   :  { %1126 = vst.msk [vmem:[#allocation2 + $0x18] sm:$0xf] %vm1058_vm1, %v1124_v50 }
0x2e5f   :  { %1055 = vrot.lane.b32.xlu1 %v3842_v32, %s3369_s18  ;;  %v4179_v32 = vld [vmem:[#allocation8 + $0x8] sm:$0xff] }
0x2e60   :  { %2208 = vmatpush.bf16.msra.mxu3 %v4179_v32  ;;  %2268 = vmatpush.bf16.msra.mxu0 %v4179_v32 }
0x2e61   :  { %2328 = vmatpush.bf16.msra.mxu2 %v4179_v32 }
0x2e64   :  { %2209 = vmatpush.bf16.msra.mxu3 %v4182_v47  ;;  %2269 = vmatpush.bf16.msra.mxu0 %v4182_v47 }
0x2e65   :  { %2329 = vmatpush.bf16.msra.mxu2 %v4182_v47 }
0x2e69   :  { %2508 = vmatpush.bf16.msrb.mxu2 %v4179_v32 }
0x2e6d   :  { %2509 = vmatpush.bf16.msrb.mxu2 %v4182_v47 }
0x2e70   :  { %v931_v4 = vpop.permute.xlu0 %930 }
0x2e71   :  { %934 = vst.msk [vmem:[#allocation2 + $0x1c] sm:$0xf] %vm417_vm0, %v931_v4 }
0x2ec9   :  { %v1997_v9 = vpop.permute.xlu1 %1996 }
0x2eca   :  { %v1999_v57 = vmul.f32 %v1997_v9, %v1980_v29 }
0x2ecc   :  { %v4171_v46 = vsel %vm778_vm11, %v1999_v57, %v4108_v13 }
0x2ecd   :  { %v2002_v62 = vpack.c.bf16 %v4171_v46, %v4171_v46 }
0x2ecf   :  { %2004 = vrot.lane.b32.xlu0 %v2002_v62, %s3376_s3 }
0x2ed1   :  { %v1056_v5 = vpop.permute.xlu1 %1055 }
0x2ed2   :  { %1059 = vst.msk [vmem:[#allocation2 + $0x1c] sm:$0xf] %vm1058_vm1, %v1056_v5 }
0x2ed9   :  { %v2979_v12 = vld [vmem:[#allocation2 + $0x18] sm:$0xff] }
0x2eda   :  { %2891 = vmatmul.msk.bf16.gmra.mxu2 %vm1591_vm4, %v2979_v12  ;;  %2934 = vmatmul.msk.bf16.gmra.mxu1 %vm1591_vm4, %v2979_v12 }
0x2f41   :  { %v2005_v13 = vpop.permute.xlu0 %2004 }
0x2f42   :  { %2911 = vmatmul.msk.bf16.vlgmr.msrb.gmra.mxu3 %vm292_vm3, %v2005_v13 }
0x2f43   :  { %2388 = vmatpush.bf16.msrb.mxu3 %v4179_v32 }
0x2f47   :  { %2389 = vmatpush.bf16.msrb.mxu3 %v4182_v47 }
0x2f52   :  { %2210 = vmatmul.bf16.vlgmr.msra.gmra.mxu3 %v3374_v0 }
0x2f53   :  { %2568 = vmatpush.bf16.msra.mxu3 %v4179_v32 }
0x2f57   :  { %2569 = vmatpush.bf16.msra.mxu3 %v4182_v47  ;;  %v4210_v58 = vpop.f32.mrf.mxu1 }
0x2f5d   :  { %v1628_v28 = vpop.f32.mrf.mxu2 }
0x2f5e   :  { %v1629_v19 = vadd.f32 %v3991_v45, %v1628_v28 }
0x2f5f   :  { %v2183_v7 = vpop.f32.mrf.mxu1 }
0x2f60   :  { %v2184_v52 = vadd.f32 %v4216_v60, %v2183_v7 }
0x2fc5   :  { %v2018_v0 = vpop.f32.mrf.mxu3 }
0x2fc6   :  { %v2022_v56 = vadd.f32 %v2018_v0, %v1629_v19  ;;  %v4226_v0 = vsel %vm778_vm11, %v4159_v40, %v4156_v26 }
0x2fc8   :  { %3185 = vtanh.f32 %v2022_v56  ;;  %v2912_v16 = vmul.f32 -1.442695, %v2022_v56 }
0x2fcd   :  { %v2020_v10 = vpop.f32.mrf.mxu3 }
0x2fce   :  { %v3186_v35 = vpop.eup %3185 }
0x2fcf   :  { %2045 = vrot.lane.b32.xlu1 %v3186_v35, %s3369_s18 }
0x2fd5   :  { %v2211_v22 = vpop.f32.mrf.mxu3 }
0x2fd6   :  { %v2215_v24 = vadd.f32 %v2211_v22, %v2184_v52 }
0x2fd8   :  { %3187 = vtanh.f32 %v2215_v24  ;;  %v2943_v17 = vmul.f32 -1.442695, %v2215_v24 }
0x2fda   :  { %3189 = vpow2.f32 %v2943_v17 }
0x2fdb   :  { %3191 = vpow2.f32 %v2912_v16 }
0x2fdd   :  { %v2213_v45 = vpop.f32.mrf.mxu3 }
0x2fde   :  { %v3188_v6 = vpop.eup %3187 }
0x2fdf   :  { %2238 = vrot.lane.b32.xlu2 %v3188_v6, %s3369_s18 }
0x2fe0   :  { %v3190_v1 = vpop.eup %3189 }
0x2fe1   :  { %v2219_v8 = vadd.f32 1.0, %v3190_v1  ;;  %v3192_v43 = vpop.eup %3191 }
0x2fe2   :  { %v2026_v2 = vadd.f32 1.0, %v3192_v43 }
0x2fe3   :  { %3193 = vrcp.f32 %v2219_v8  ;;  %v2231_v34 = vand.u32 2147483648, %v2219_v8  ;;  %vm2225_vm1 = vweird.f32 %v2219_v8  ;;  %v2229_v18 = vand.u32 2147483647, %v2219_v8 }
0x2fe4   :  { %3195 = vrcp.f32 %v2026_v2  ;;  %v2038_v50 = vand.u32 2147483648, %v2026_v2  ;;  %vm2032_vm8 = vweird.f32 %v2026_v2  ;;  %v2036_v4 = vand.u32 2147483647, %v2026_v2 }
0x2fe5   :  { %v2232_v23 = vor.u32 1.1754944e-38, %v2231_v34  ;;  %vm2230_vm6 = vcmp.eq.f32.partialorder %v2229_v18, 8.507059e+37 }
0x2fe6   :  { %v2039_v57 = vor.u32 1.1754944e-38, %v2038_v50  ;;  %vm2037_vm9 = vcmp.eq.f32.partialorder %v2036_v4, 8.507059e+37 }
0x2fe9   :  { %v3194_v25 = vpop.eup %3193 }
0x2fea   :  { %v2221_v54 = vmul.f32 %v3194_v25, %v2219_v8  ;;  %v3196_v29 = vpop.eup %3195  ;;  %vm2226_vm0 = vweird.f32 %v3194_v25 }
0x2feb   :  { %v2028_v30 = vmul.f32 %v3196_v29, %v2026_v2  ;;  %vm2227_vm4 = vmor %vm2225_vm1, %vm2226_vm0  ;;  %vm2033_vm7 = vweird.f32 %v3196_v29  ;;  %v2182_v2 = vadd.f32 %v4216_v60, %v4210_v58 }
0x2fec   :  { %v2222_v20 = vsub.f32 1.0, %v2221_v54  ;;  %vm2034_vm12 = vmor %vm2032_vm8, %vm2033_vm7 }
0x2fed   :  { %v2029_v33 = vsub.f32 1.0, %v2028_v30 }
0x2fee   :  { %v2223_v27 = vmul.f32 %v3194_v25, %v2222_v20 }
0x2fef   :  { %v2030_v11 = vmul.f32 %v3196_v29, %v2029_v33 }
0x2ff0   :  { %v2224_v21 = vadd.f32 %v3194_v25, %v2223_v27 }
0x2ff1   :  { %v2031_v42 = vadd.f32 %v3196_v29, %v2030_v11 }
0x2ff2   :  { %v2228_v3 = vsel %vm2227_vm4, %v3194_v25, %v2224_v21 }
0x2ff3   :  { %v2233_v31 = vsel %vm2230_vm6, %v2232_v23, %v2228_v3  ;;  %v2035_v9 = vsel %vm2034_vm12, %v3196_v29, %v2031_v42 }
0x2ff4   :  { %v2040_v5 = vsel %vm2037_vm9, %v2039_v57, %v2035_v9  ;;  %v2236_v13 = vmul.f32 0.0, %v2233_v31 }
0x2ff5   :  { %v2043_v56 = vmul.f32 %v2040_v5, %v4226_v0 }
0x3039   :  { %v2239_v53 = vpop.permute.xlu2 %2238 }
0x303a   :  { %v2241_v39 = vmul.f32 %v2239_v53, %v2233_v31 }
0x303c   :  { %2243 = vrot.lane.b32.xlu1 %v2241_v39, %s3376_s3 }
0x3041   :  { %v2046_v62 = vpop.permute.xlu1 %2045 }
0x3042   :  { %v2048_v12 = vmul.f32 %v2046_v62, %v2040_v5 }
0x3044   :  { %2050 = vrot.lane.b32.xlu0 %v2048_v12, %s3376_s3 }
0x30ae   :  { %v2244_v28 = vpop.permute.xlu1 %2243 }
0x30af   :  { %v2246_v19 = vadd.f32 %v2244_v28, %v2236_v13 }
0x30b1   :  { %3197 = vtanh.f32 %v2246_v19  ;;  %v2254_v42 = vsel %vm926_vm15, %v2246_v19, 0.0  ;;  %v2179_v19 = vadd.f32 %v4216_v60, %v4207_v44 }
0x30b6   :  { %v2051_v10 = vpop.permute.xlu0 %2050 }
0x30b7   :  { %v3198_v35 = vpop.eup %3197  ;;  %v4229_v7 = vadd.f32 %v2051_v10, %v2043_v56  ;;  %v4264_v56 = vpop.f32.mrf.mxu2 }
0x30b8   :  { %2249 = vrot.lane.b32.xlu0 %v3198_v35, %s3369_s18 }
0x30b9   :  { %3199 = vtanh.f32 %v4229_v7 }
0x30bf   :  { %v3200_v52 = vpop.eup %3199 }
0x30c0   :  { %2056 = vrot.lane.b32.xlu2 %v3200_v52, %s3369_s18 }
0x311a   :  { %v2057_v22 = vpop.permute.xlu2 %2056 }
0x311b   :  { %v2059_v24 = vmul.f32 %v2057_v22, %v2040_v5 }
0x311d   :  { %v4237_v26 = vsel %vm852_vm14, %v2059_v24, %v4171_v46 }
0x311e   :  { %v2062_v40 = vpack.c.bf16 %v4237_v26, %v4237_v26 }
0x3120   :  { %2064 = vrot.lane.b32.xlu1 %v2062_v40, %s3376_s3 }
0x312a   :  { %v2250_v45 = vpop.permute.xlu0 %2249 }
0x312b   :  { %v2252_v6 = vmul.f32 %v2250_v45, %v2233_v31 }
0x312d   :  { %v2253_v17 = vsel %vm926_vm15, %v2252_v6, 0.0 }
0x312e   :  { %v2255_v16 = vpack.c.bf16 %v2253_v17, %v2253_v17 }
0x3130   :  { %2257 = vrot.lane.b32.xlu2 %v2255_v16, %s3376_s3 }
0x318a   :  { %v2258_v46 = vpop.permute.xlu2 %2257 }
0x3192   :  { %v2065_v1 = vpop.permute.xlu1 %2064 }
0x3193   :  { %2913 = vmatmul.msk.bf16.vlgmr.msrb.gmra.mxu0 %vm292_vm3, %v2065_v1 }
0x3194   :  { %2448 = vmatpush.bf16.msrb.mxu0 %v4179_v32 }
0x3198   :  { %2449 = vmatpush.bf16.msrb.mxu0 %v4182_v47 }
0x31a3   :  { %2944 = vmatmul.msk.bf16.vlgmr.msra.gmra.mxu0 %vm292_vm3, %v2258_v46 }
0x31a4   :  { %2628 = vmatpush.bf16.msra.mxu0 %v4179_v32 }
0x31a8   :  { %2629 = vmatpush.bf16.msra.mxu0 %v4182_v47 }
0x3210   :  { %v4251_v8 = vpop.f32.mrf.mxu0 }
0x3218   :  { %v2080_v43 = vpop.f32.mrf.mxu0 }
0x3220   :  { %v2271_v25 = vpop.f32.mrf.mxu0 }
0x3221   :  { %v2275_v54 = vadd.f32 %v2271_v25, %v2182_v2 }
0x3223   :  { %3201 = vtanh.f32 %v2275_v54  ;;  %v2945_v27 = vmul.f32 -1.442695, %v2275_v54 }
0x3225   :  { %3203 = vpow2.f32 %v2945_v27 }
0x3228   :  { %v2273_v20 = vpop.f32.mrf.mxu0 }
0x3229   :  { %v3202_v29 = vpop.eup %3201 }
0x322a   :  { %2298 = vrot.lane.b32.xlu0 %v3202_v29, %s3369_s18 }
0x322b   :  { %v3204_v30 = vpop.eup %3203 }
0x322c   :  { %v2279_v21 = vadd.f32 1.0, %v3204_v30 }
0x322e   :  { %3205 = vrcp.f32 %v2279_v21  ;;  %v2291_v3 = vand.u32 2147483648, %v2279_v21  ;;  %vm2285_vm0 = vweird.f32 %v2279_v21  ;;  %v2289_v58 = vand.u32 2147483647, %v2279_v21 }
0x3230   :  { %v2292_v23 = vor.u32 1.1754944e-38, %v2291_v3  ;;  %vm2290_vm4 = vcmp.eq.f32.partialorder %v2289_v58, 8.507059e+37 }
0x3234   :  { %v3206_v32 = vpop.eup %3205 }
0x3235   :  { %v2281_v47 = vmul.f32 %v3206_v32, %v2279_v21  ;;  %vm2286_vm9 = vweird.f32 %v3206_v32 }
0x3236   :  { %vm2287_vm1 = vmor %vm2285_vm0, %vm2286_vm9 }
0x3237   :  { %v2282_v33 = vsub.f32 1.0, %v2281_v47 }
0x3239   :  { %v2283_v34 = vmul.f32 %v3206_v32, %v2282_v33 }
0x323b   :  { %v2284_v18 = vadd.f32 %v3206_v32, %v2283_v34 }
0x323d   :  { %v2288_v11 = vsel %vm2287_vm1, %v3206_v32, %v2284_v18 }
0x323e   :  { %v2293_v31 = vsel %vm2290_vm4, %v2292_v23, %v2288_v11  ;;  %v2177_v11 = vadd.f32 %v4216_v60, %v4205_v38 }
0x323f   :  { %v2296_v50 = vmul.f32 %v2293_v31, %v2254_v42 }
0x329c   :  { %v2299_v53 = vpop.permute.xlu0 %2298 }
0x329d   :  { %v2301_v39 = vmul.f32 %v2299_v53, %v2293_v31 }
0x329f   :  { %2303 = vrot.lane.b32.xlu1 %v2301_v39, %s3376_s3 }
0x3311   :  { %v2304_v4 = vpop.permute.xlu1 %2303 }
0x3312   :  { %v2306_v9 = vadd.f32 %v2304_v4, %v2296_v50 }
0x3314   :  { %3207 = vtanh.f32 %v2306_v9  ;;  %v2314_v27 = vsel %vm852_vm14, %v2306_v9, %v2254_v42 }
0x331a   :  { %v3208_v57 = vpop.eup %3207 }
0x331b   :  { %2309 = vrot.lane.b32.xlu2 %v3208_v57, %s3369_s18 }
0x3375   :  { %v2310_v62 = vpop.permute.xlu2 %2309 }
0x3376   :  { %v2312_v5 = vmul.f32 %v2310_v62, %v2293_v31 }
0x3378   :  { %v2313_v12 = vsel %vm852_vm14, %v2312_v5, %v2253_v17 }
0x3379   :  { %v2315_v13 = vpack.c.bf16 %v2313_v12, %v2313_v12 }
0x337b   :  { %2317 = vrot.lane.b32.xlu0 %v2315_v13, %s3376_s3 }
0x33ed   :  { %v2318_v28 = vpop.permute.xlu0 %2317 }
0x33ee   :  { %2946 = vmatmul.msk.bf16.vlgmr.msra.gmra.mxu2 %vm292_vm3, %v2318_v28 }
0x3471   :  { %v2331_v10 = vpop.f32.mrf.mxu2 }
0x3472   :  { %v2335_v35 = vadd.f32 %v2331_v10, %v2179_v19 }
0x3474   :  { %3209 = vtanh.f32 %v2335_v35  ;;  %v2947_v24 = vmul.f32 -1.442695, %v2335_v35 }
0x3476   :  { %3211 = vpow2.f32 %v2947_v24 }
0x3479   :  { %v2333_v52 = vpop.f32.mrf.mxu2 }
0x347a   :  { %v3210_v22 = vpop.eup %3209 }
0x347b   :  { %2358 = vrot.lane.b32.xlu1 %v3210_v22, %s3369_s18 }
0x347c   :  { %v3212_v40 = vpop.eup %3211 }
0x347d   :  { %v2339_v45 = vadd.f32 1.0, %v3212_v40 }
0x347f   :  { %3213 = vrcp.f32 %v2339_v45  ;;  %v2351_v43 = vand.u32 2147483648, %v2339_v45  ;;  %vm2345_vm7 = vweird.f32 %v2339_v45  ;;  %v2349_v44 = vand.u32 2147483647, %v2339_v45 }
0x3481   :  { %v2352_v25 = vor.u32 1.1754944e-38, %v2351_v43  ;;  %vm2350_vm12 = vcmp.eq.f32.partialorder %v2349_v44, 8.507059e+37 }
0x3485   :  { %v3214_v6 = vpop.eup %3213 }
0x3486   :  { %v2341_v17 = vmul.f32 %v3214_v6, %v2339_v45  ;;  %vm2346_vm6 = vweird.f32 %v3214_v6 }
0x3487   :  { %vm2347_vm8 = vmor %vm2345_vm7, %vm2346_vm6 }
0x3488   :  { %v2342_v16 = vsub.f32 1.0, %v2341_v17 }
0x348a   :  { %v2343_v1 = vmul.f32 %v3214_v6, %v2342_v16 }
0x348c   :  { %v2344_v46 = vadd.f32 %v3214_v6, %v2343_v1 }
0x348e   :  { %v2348_v2 = vsel %vm2347_vm8, %v3214_v6, %v2344_v46 }
0x348f   :  { %v2353_v20 = vsel %vm2350_vm12, %v2352_v25, %v2348_v2 }
0x3490   :  { %v2356_v30 = vmul.f32 %v2353_v20, %v2314_v27 }
0x34ed   :  { %v2359_v54 = vpop.permute.xlu1 %2358 }
0x34ee   :  { %v2361_v29 = vmul.f32 %v2359_v54, %v2353_v20 }
0x34f0   :  { %2363 = vrot.lane.b32.xlu2 %v2361_v29, %s3376_s3 }
0x354a   :  { %v2364_v21 = vpop.permute.xlu2 %2363 }
0x354b   :  { %v2366_v32 = vadd.f32 %v2364_v21, %v2356_v30 }
0x354d   :  { %3215 = vtanh.f32 %v2366_v32  ;;  %v2374_v22 = vsel %vm778_vm11, %v2366_v32, %v2314_v27 }
0x3553   :  { %v3216_v47 = vpop.eup %3215 }
0x3554   :  { %2369 = vrot.lane.b32.xlu0 %v3216_v47, %s3369_s18 }
0x35c6   :  { %v2370_v33 = vpop.permute.xlu0 %2369 }
0x35c7   :  { %v2372_v34 = vmul.f32 %v2370_v33, %v2353_v20 }
0x35c9   :  { %v2373_v18 = vsel %vm778_vm11, %v2372_v34, %v2313_v12 }
0x35ca   :  { %v2375_v3 = vpack.c.bf16 %v2373_v18, %v2373_v18 }
0x35cc   :  { %2377 = vrot.lane.b32.xlu1 %v2375_v3, %s3376_s3 }
0x363e   :  { %v2378_v58 = vpop.permute.xlu1 %2377 }
0x363f   :  { %2948 = vmatmul.msk.bf16.vlgmr.msrb.gmra.mxu3 %vm292_vm3, %v2378_v58 }
0x3640   :  { %2729 = vmatpush.msrb.mxu3 %v2711_v36 }
0x36c2   :  { %v2391_v23 = vpop.f32.mrf.mxu3 }
0x36c3   :  { %v2395_v53 = vadd.f32 %v2391_v23, %v2177_v11 }
0x36c5   :  { %3217 = vtanh.f32 %v2395_v53  ;;  %v2949_v42 = vmul.f32 -1.442695, %v2395_v53 }
0x36c7   :  { %3219 = vpow2.f32 %v2949_v42 }
0x36ca   :  { %v2393_v31 = vpop.f32.mrf.mxu3 }
0x36cb   :  { %v3218_v39 = vpop.eup %3217 }
0x36cc   :  { %2418 = vrot.lane.b32.xlu2 %v3218_v39, %s3369_s18 }
0x36cd   :  { %v3220_v50 = vpop.eup %3219 }
0x36ce   :  { %v2399_v4 = vadd.f32 1.0, %v3220_v50 }
0x36d0   :  { %3221 = vrcp.f32 %v2399_v4  ;;  %v2411_v13 = vand.u32 2147483648, %v2399_v4  ;;  %vm2405_vm0 = vweird.f32 %v2399_v4  ;;  %v2409_v38 = vand.u32 2147483647, %v2399_v4 }
0x36d2   :  { %v2412_v19 = vor.u32 1.1754944e-38, %v2411_v13  ;;  %vm2410_vm4 = vcmp.eq.f32.partialorder %v2409_v38, 8.507059e+37 }
0x36d6   :  { %v3222_v9 = vpop.eup %3221 }
0x36d7   :  { %v2401_v57 = vmul.f32 %v3222_v9, %v2399_v4  ;;  %vm2406_vm9 = vweird.f32 %v3222_v9 }
0x36d8   :  { %vm2407_vm1 = vmor %vm2405_vm0, %vm2406_vm9 }
0x36d9   :  { %v2402_v62 = vsub.f32 1.0, %v2401_v57 }
0x36db   :  { %v2403_v5 = vmul.f32 %v3222_v9, %v2402_v62 }
0x36dd   :  { %v2404_v12 = vadd.f32 %v3222_v9, %v2403_v5 }
0x36df   :  { %v2408_v28 = vsel %vm2407_vm1, %v3222_v9, %v2404_v12 }
0x36e0   :  { %v2413_v35 = vsel %vm2410_vm4, %v2412_v19, %v2408_v28 }
0x36e1   :  { %v2416_v24 = vmul.f32 %v2413_v35, %v2374_v22 }
0x3726   :  { %v2419_v10 = vpop.permute.xlu2 %2418 }
0x3727   :  { %v2421_v52 = vmul.f32 %v2419_v10, %v2413_v35 }
0x3729   :  { %2423 = vrot.lane.b32.xlu0 %v2421_v52, %s3376_s3 }
0x379b   :  { %v2424_v40 = vpop.permute.xlu0 %2423 }
0x379c   :  { %v2426_v45 = vadd.f32 %v2424_v40, %v2416_v24 }
0x379e   :  { %3223 = vtanh.f32 %v2426_v45  ;;  %v2434_v53 = vsel %vm704_vm13, %v2426_v45, %v2374_v22 }
0x37a4   :  { %v3224_v6 = vpop.eup %3223 }
0x37a5   :  { %2429 = vrot.lane.b32.xlu1 %v3224_v6, %s3369_s18 }
0x3817   :  { %v2430_v17 = vpop.permute.xlu1 %2429 }
0x3818   :  { %v2432_v16 = vmul.f32 %v2430_v17, %v2413_v35 }
0x381a   :  { %v2433_v1 = vsel %vm704_vm13, %v2432_v16, %v2373_v18 }
0x381b   :  { %v2435_v46 = vpack.c.bf16 %v2433_v1, %v2433_v1 }
0x381d   :  { %2437 = vrot.lane.b32.xlu2 %v2435_v46, %s3376_s3 }
0x3877   :  { %v2438_v43 = vpop.permute.xlu2 %2437 }
0x3878   :  { %2950 = vmatmul.msk.bf16.vlgmr.msrb.gmra.mxu0 %vm292_vm3, %v2438_v43 }
0x38f5   :  { %v2451_v44 = vpop.f32.mrf.mxu0 }
0x38f6   :  { %v2455_v2 = vadd.f32 %v2451_v44, %v2174_v51 }
0x38f8   :  { %3225 = vtanh.f32 %v2455_v2  ;;  %v2951_v20 = vmul.f32 -1.442695, %v2455_v2 }
0x38fa   :  { %3227 = vpow2.f32 %v2951_v20 }
0x38fd   :  { %v2453_v25 = vpop.f32.mrf.mxu0 }
0x38fe   :  { %v3226_v54 = vpop.eup %3225 }
0x38ff   :  { %2478 = vrot.lane.b32.xlu0 %v3226_v54, %s3369_s18 }
0x3900   :  { %v3228_v29 = vpop.eup %3227 }
0x3901   :  { %v2459_v27 = vadd.f32 1.0, %v3228_v29 }
0x3903   :  { %3229 = vrcp.f32 %v2459_v27  ;;  %v2471_v34 = vand.u32 2147483648, %v2459_v27  ;;  %vm2465_vm6 = vweird.f32 %v2459_v27  ;;  %v2469_v61 = vand.u32 2147483647, %v2459_v27 }
0x3905   :  { %v2472_v3 = vor.u32 1.1754944e-38, %v2471_v34  ;;  %vm2470_vm8 = vcmp.eq.f32.partialorder %v2469_v61, 8.507059e+37 }
0x3909   :  { %v3230_v30 = vpop.eup %3229 }
0x390a   :  { %v2461_v21 = vmul.f32 %v3230_v30, %v2459_v27  ;;  %vm2466_vm11 = vweird.f32 %v3230_v30 }
0x390b   :  { %vm2467_vm7 = vmor %vm2465_vm6, %vm2466_vm11 }
0x390c   :  { %v2462_v32 = vsub.f32 1.0, %v2461_v21 }
0x390e   :  { %v2463_v47 = vmul.f32 %v3230_v30, %v2462_v32 }
0x3910   :  { %v2464_v33 = vadd.f32 %v3230_v30, %v2463_v47 }
0x3912   :  { %v2468_v18 = vsel %vm2467_vm7, %v3230_v30, %v2464_v33 }
0x3913   :  { %v2473_v11 = vsel %vm2470_vm8, %v2472_v3, %v2468_v18 }
0x3914   :  { %v2476_v31 = vmul.f32 %v2473_v11, %v2434_v53 }
0x3971   :  { %v2479_v58 = vpop.permute.xlu0 %2478 }
0x3972   :  { %v2481_v23 = vmul.f32 %v2479_v58, %v2473_v11 }
0x3974   :  { %2483 = vrot.lane.b32.xlu1 %v2481_v23, %s3376_s3 }
0x39e6   :  { %v2484_v39 = vpop.permute.xlu1 %2483 }
0x39e7   :  { %v2486_v42 = vadd.f32 %v2484_v39, %v2476_v31 }
0x39e9   :  { %3231 = vtanh.f32 %v2486_v42  ;;  %v2494_v51 = vsel %vm630_vm5, %v2486_v42, %v2434_v53 }
0x39ef   :  { %v3232_v50 = vpop.eup %3231 }
0x39f0   :  { %2489 = vrot.lane.b32.xlu2 %v3232_v50, %s3369_s18  ;;  %v3265_v50 = vld [vmem:[%s4403_s11] ss:$0 sm:$0xff] }
0x3a4a   :  { %v2490_v4 = vpop.permute.xlu2 %2489 }
0x3a4b   :  { %v2492_v9 = vmul.f32 %v2490_v4, %v2473_v11  ;;  %v1631_v4 = vadd.f32 %v3265_v50, %v4264_v56 }
0x3a4d   :  { %v2493_v57 = vsel %vm630_vm5, %v2492_v9, %v2433_v1 }
0x3a4e   :  { %v2495_v62 = vpack.c.bf16 %v2493_v57, %v2493_v57 }
0x3a50   :  { %2497 = vrot.lane.b32.xlu0 %v2495_v62, %s3376_s3 }
0x3ac2   :  { %v2498_v5 = vpop.permute.xlu0 %2497 }
0x3ac3   :  { %2952 = vmatmul.msk.bf16.vlgmr.msrb.gmra.mxu2 %vm292_vm3, %v2498_v5 }
0x3b46   :  { %v2511_v12 = vpop.f32.mrf.mxu2 }
0x3b47   :  { %v2515_v13 = vadd.f32 %v2511_v12, %v2172_v41 }
0x3b49   :  { %3233 = vtanh.f32 %v2515_v13  ;;  %v2953_v19 = vmul.f32 -1.442695, %v2515_v13 }
0x3b4b   :  { %3235 = vpow2.f32 %v2953_v19 }
0x3b4e   :  { %v2513_v38 = vpop.f32.mrf.mxu2 }
0x3b4f   :  { %v3234_v28 = vpop.eup %3233 }
0x3b50   :  { %2538 = vrot.lane.b32.xlu1 %v3234_v28, %s3369_s18 }
0x3b51   :  { %v3236_v10 = vpop.eup %3235 }
0x3b52   :  { %v2519_v35 = vadd.f32 1.0, %v3236_v10 }
0x3b54   :  { %3237 = vrcp.f32 %v2519_v35  ;;  %v2531_v6 = vand.u32 2147483648, %v2519_v35  ;;  %vm2525_vm12 = vweird.f32 %v2519_v35  ;;  %v2529_v49 = vand.u32 2147483647, %v2519_v35 }
0x3b56   :  { %v2532_v16 = vor.u32 1.1754944e-38, %v2531_v6  ;;  %vm2530_vm0 = vcmp.eq.f32.partialorder %v2529_v49, 8.507059e+37 }
0x3b5a   :  { %v3238_v52 = vpop.eup %3237 }
0x3b5b   :  { %v2521_v22 = vmul.f32 %v3238_v52, %v2519_v35  ;;  %vm2526_vm13 = vweird.f32 %v3238_v52 }
0x3b5c   :  { %vm2527_vm9 = vmor %vm2525_vm12, %vm2526_vm13 }
0x3b5d   :  { %v2522_v24 = vsub.f32 1.0, %v2521_v22 }
0x3b5f   :  { %v2523_v40 = vmul.f32 %v3238_v52, %v2522_v24 }
0x3b61   :  { %v2524_v45 = vadd.f32 %v3238_v52, %v2523_v40 }
0x3b63   :  { %v2528_v17 = vsel %vm2527_vm9, %v3238_v52, %v2524_v45 }
0x3b64   :  { %v2533_v46 = vsel %vm2530_vm0, %v2532_v16, %v2528_v17 }
0x3b65   :  { %v2536_v44 = vmul.f32 %v2533_v46, %v2494_v51 }
0x3bc2   :  { %v2539_v1 = vpop.permute.xlu1 %2538 }
0x3bc3   :  { %v2541_v43 = vmul.f32 %v2539_v1, %v2533_v46 }
0x3bc5   :  { %2543 = vrot.lane.b32.xlu2 %v2541_v43, %s3376_s3 }
0x3c1f   :  { %v2544_v2 = vpop.permute.xlu2 %2543 }
0x3c20   :  { %v2546_v25 = vadd.f32 %v2544_v2, %v2536_v44 }
0x3c22   :  { %3239 = vtanh.f32 %v2546_v25  ;;  %v4322_v13 = vsel %vm556_vm10, %v2546_v25, %v2494_v51 }
0x3c28   :  { %v3240_v54 = vpop.eup %3239 }
0x3c29   :  { %2549 = vrot.lane.b32.xlu0 %v3240_v54, %s3369_s18  ;;  %v2167_v54 = vadd.f32 %v4216_v60, %v4197_v37 }
0x3c9b   :  { %v2550_v20 = vpop.permute.xlu0 %2549 }
0x3c9c   :  { %v2552_v29 = vmul.f32 %v2550_v20, %v2533_v46 }
0x3c9e   :  { %v2553_v27 = vsel %vm556_vm10, %v2552_v29, %v2493_v57  ;;  %v2082_v57 = vadd.f32 %v4251_v8, %v1631_v4  ;;  %v2678_v4 = vld [vmem:[%s4407_s15 + $0x18] sm:$0xff] }
0x3c9f   :  { %v2555_v30 = vpack.c.bf16 %v2553_v27, %v2553_v27  ;;  %2696 = vmatpush.msra.mxu2 %v2678_v4 }
0x3ca0   :  { %v2914_v19 = vmul.f32 -1.442695, %v2082_v57 }
0x3ca1   :  { %2557 = vrot.lane.b32.xlu1 %v2555_v30, %s3376_s3 }
0x3d13   :  { %v2558_v21 = vpop.permute.xlu1 %2557 }
0x3d14   :  { %2954 = vmatmul.msk.bf16.vlgmr.msra.gmra.mxu3 %vm292_vm3, %v2558_v21 }
0x3d97   :  { %v2571_v32 = vpop.f32.mrf.mxu3 }
0x3d98   :  { %v2575_v47 = vadd.f32 %v2571_v32, %v2169_v59 }
0x3d9a   :  { %3241 = vtanh.f32 %v2575_v47  ;;  %v2955_v61 = vmul.f32 -1.442695, %v2575_v47 }
0x3d9c   :  { %3243 = vpow2.f32 %v2955_v61 }
0x3d9f   :  { %v2573_v33 = vpop.f32.mrf.mxu3 }
0x3da0   :  { %v3242_v34 = vpop.eup %3241 }
0x3da1   :  { %2598 = vrot.lane.b32.xlu2 %v3242_v34, %s3369_s18 }
0x3da2   :  { %v3244_v18 = vpop.eup %3243 }
0x3da3   :  { %v2579_v3 = vadd.f32 1.0, %v3244_v18 }
0x3da5   :  { %3245 = vrcp.f32 %v2579_v3  ;;  %v2591_v39 = vand.u32 2147483648, %v2579_v3  ;;  %vm2585_vm1 = vweird.f32 %v2579_v3  ;;  %v2589_v15 = vand.u32 2147483647, %v2579_v3 }
0x3da6   :  { %3247 = vtanh.f32 %v2082_v57  ;;  %v2676_v57 = vld [vmem:[%s4407_s15 + $0x8] sm:$0xff] }
0x3da7   :  { %v2592_v9 = vor.u32 1.1754944e-38, %v2591_v39  ;;  %vm2590_vm11 = vcmp.eq.f32.partialorder %v2589_v15, 8.507059e+37 }
0x3dab   :  { %v3246_v58 = vpop.eup %3245 }
0x3dac   :  { %v2581_v11 = vmul.f32 %v3246_v58, %v2579_v3  ;;  %vm2586_vm5 = vweird.f32 %v3246_v58  ;;  %v3248_v12 = vpop.eup %3247 }
0x3dad   :  { %vm2587_vm4 = vmor %vm2585_vm1, %vm2586_vm5 }
0x3dae   :  { %v2582_v23 = vsub.f32 1.0, %v2581_v11 }
0x3db0   :  { %v2583_v53 = vmul.f32 %v3246_v58, %v2582_v23 }
0x3db2   :  { %v2584_v31 = vadd.f32 %v3246_v58, %v2583_v53 }
0x3db4   :  { %v2588_v42 = vsel %vm2587_vm4, %v3246_v58, %v2584_v31 }
0x3db5   :  { %v2593_v5 = vsel %vm2590_vm11, %v2592_v9, %v2588_v42  ;;  %v2677_v9 = vld [vmem:[%s4407_s15 + $0x10] sm:$0xff] }
0x3db6   :  { %v2596_v38 = vmul.f32 %v2593_v5, %v4322_v13  ;;  %2697 = vmatpush.msra.mxu2 %v2677_v9 }
0x3db8   :  { %2698 = vmatpush.msra.mxu2 %v2676_v57 }
0x3dba   :  { %2699 = vmatpush.msra.mxu2 %v2675_v63 }
0x3dfb   :  { %v2599_v62 = vpop.permute.xlu2 %2598 }
0x3dfc   :  { %v2601_v41 = vmul.f32 %v2599_v62, %v2593_v5 }
0x3dfe   :  { %2603 = vrot.lane.b32.xlu0 %v2601_v41, %s3376_s3 }
0x3e06   :  { %2105 = vrot.lane.b32.xlu0 %v3248_v12, %s3369_s18 }
0x3e70   :  { %v2604_v56 = vpop.permute.xlu0 %2603 }
0x3e71   :  { %v4325_v28 = vadd.f32 %v2604_v56, %v2596_v38 }
0x3e73   :  { %3249 = vtanh.f32 %v4325_v28 }
0x3e74   :  { %3251 = vpow2.f32 %v2914_v19 }
0x3e78   :  { %v2106_v51 = vpop.permute.xlu0 %2105 }
0x3e79   :  { %v3250_v8 = vpop.eup %3249 }
0x3e7a   :  { %2609 = vrot.lane.b32.xlu1 %v3250_v8, %s3369_s18  ;;  %v3252_v10 = vpop.eup %3251 }
0x3e7b   :  { %v2086_v35 = vadd.f32 1.0, %v3252_v10 }
0x3e7d   :  { %3253 = vrcp.f32 %v2086_v35  ;;  %v2098_v16 = vand.u32 2147483648, %v2086_v35  ;;  %vm2092_vm6 = vweird.f32 %v2086_v35  ;;  %v2096_v1 = vand.u32 2147483647, %v2086_v35 }
0x3e7f   :  { %v2099_v43 = vor.u32 1.1754944e-38, %v2098_v16  ;;  %vm2097_vm8 = vcmp.eq.f32.partialorder %v2096_v1, 8.507059e+37 }
0x3e83   :  { %v3254_v52 = vpop.eup %3253 }
0x3e84   :  { %v2088_v22 = vmul.f32 %v3254_v52, %v2086_v35  ;;  %vm2093_vm10 = vweird.f32 %v3254_v52  ;;  %v3008_v35 = vld [vmem:[%s4408_s16] ss:$0 sm:$0xff] }
0x3e85   :  { %vm2094_vm7 = vmor %vm2092_vm6, %vm2093_vm10 }
0x3e86   :  { %v2089_v14 = vsub.f32 1.0, %v2088_v22 }
0x3e88   :  { %v2090_v24 = vmul.f32 %v3254_v52, %v2089_v14 }
0x3e8a   :  { %v2091_v49 = vadd.f32 %v3254_v52, %v2090_v24 }
0x3e8c   :  { %v2095_v46 = vsel %vm2094_vm7, %v3254_v52, %v2091_v49 }
0x3e8d   :  { %v2100_v44 = vsel %vm2097_vm8, %v2099_v43, %v2095_v46 }
0x3e8e   :  { %v2108_v2 = vmul.f32 %v2106_v51, %v2100_v44 }
0x3eec   :  { %v2610_v40 = vpop.permute.xlu1 %2609 }
0x3eed   :  { %v2612_v45 = vmul.f32 %v2610_v40, %v2593_v5 }
0x3eef   :  { %v4331_v6 = vsel %vm482_vm2, %v2612_v45, %v2553_v27  ;;  %v2061_v27 = vsel %vm852_vm14, %v4229_v7, %v4226_v0 }
0x3ef0   :  { %v2615_v17 = vpack.c.bf16 %v4331_v6, %v4331_v6  ;;  %v2103_v21 = vmul.f32 %v2100_v44, %v2061_v27 }
0x3ef2   :  { %2617 = vrot.lane.b32.xlu2 %v2615_v17, %s3376_s3 }
0x3efa   :  { %2110 = vrot.lane.b32.xlu2 %v2108_v2, %s3376_s3 }
0x3f4c   :  { %v2618_v25 = vpop.permute.xlu2 %2617 }
0x3f4d   :  { %2956 = vmatmul.msk.bf16.vlgmr.msra.gmra.mxu0 %vm292_vm3, %v2618_v25 }
0x3f54   :  { %v2111_v30 = vpop.permute.xlu2 %2110 }
0x3f55   :  { %v2113_v59 = vadd.f32 %v2111_v30, %v2103_v21 }
0x3fca   :  { %v2631_v20 = vpop.f32.mrf.mxu0 }
0x3fcb   :  { %v2635_v29 = vadd.f32 %v2631_v20, %v2167_v54 }
0x3fcd   :  { %3255 = vtanh.f32 %v2635_v29  ;;  %v2957_v37 = vmul.f32 -1.442695, %v2635_v29 }
0x3fce   :  { %3257 = vtanh.f32 %v2113_v59 }
0x3fcf   :  { %3259 = vpow2.f32 %v2957_v37 }
0x3fd2   :  { %v2633_v32 = vpop.f32.mrf.mxu0 }
0x3fd3   :  { %v3256_v47 = vpop.eup %3255 }
0x3fd4   :  { %2658 = vrot.lane.b32.xlu1 %v3256_v47, %s3369_s18  ;;  %v3258_v33 = vpop.eup %3257 }
0x3fd5   :  { %v3260_v60 = vpop.eup %3259 }
0x3fd6   :  { %v2639_v34 = vadd.f32 1.0, %v3260_v60 }
0x3fd8   :  { %3261 = vrcp.f32 %v2639_v34  ;;  %v2651_v3 = vand.u32 2147483648, %v2639_v34  ;;  %vm2645_vm13 = vweird.f32 %v2639_v34  ;;  %v2649_v58 = vand.u32 2147483647, %v2639_v34 }
0x3fda   :  { %v2652_v23 = vor.u32 1.1754944e-38, %v2651_v3  ;;  %vm2650_vm9 = vcmp.eq.f32.partialorder %v2649_v58, 8.507059e+37 }
0x3fdc   :  { %2116 = vrot.lane.b32.xlu1 %v3258_v33, %s3369_s18 }
0x3fde   :  { %v3262_v61 = vpop.eup %3261 }
0x3fdf   :  { %v2641_v18 = vmul.f32 %v3262_v61, %v2639_v34  ;;  %vm2646_vm14 = vweird.f32 %v3262_v61 }
0x3fe0   :  { %vm2647_vm12 = vmor %vm2645_vm13, %vm2646_vm14 }
0x3fe1   :  { %v2642_v48 = vsub.f32 1.0, %v2641_v18 }
0x3fe3   :  { %v2643_v0 = vmul.f32 %v3262_v61, %v2642_v48 }
0x3fe5   :  { %v2644_v7 = vadd.f32 %v3262_v61, %v2643_v0 }
0x3fe7   :  { %v2648_v11 = vsel %vm2647_vm12, %v3262_v61, %v2644_v7 }
0x3fe8   :  { %v2653_v31 = vsel %vm2650_vm9, %v2652_v23, %v2648_v11 }
0x4046   :  { %v2659_v53 = vpop.permute.xlu1 %2658 }
0x4047   :  { %v2661_v39 = vmul.f32 %v2659_v53, %v2653_v31 }
0x4049   :  { %2663 = vrot.lane.b32.xlu0 %v2661_v39, %s3376_s3 }
0x404e   :  { %v2117_v15 = vpop.permute.xlu1 %2116 }
0x404f   :  { %v2119_v42 = vmul.f32 %v2117_v15, %v2100_v44 }
0x4051   :  { %v2120_v50 = vsel %vm926_vm15, %v2119_v42, %v4237_v26  ;;  %v2614_v26 = vsel %vm482_vm2, %v4325_v28, %v4322_v13  ;;  %vm4416_vm15 = vcmp.eq.s32.totalorder %v3581_v55, 1  ;;  %v2710_v13 = vld [vmem:[%s4407_s15 + $0x30] sm:$0xff]  ;;  %v2709_v28 = vld [vmem:[%s4407_s15 + $0x28] sm:$0xff]  ;;  %v2708_v55 = vld [vmem:[%s4407_s15 + $0x20] sm:$0xff] }
0x4052   :  { %2680 = vrot.lane.b32.xlu0 %v2120_v50, %s3376_s3  ;;  %v2656_v62 = vmul.f32 %v2653_v31, %v2614_v26  ;;  %2730 = vmatpush.msrb.mxu3 %v2710_v13 }
0x4054   :  { %2731 = vmatpush.msrb.mxu3 %v2709_v28 }
0x4056   :  { %2732 = vmatpush.msrb.mxu3 %v2708_v55 }
0x40bb   :  { %v2664_v5 = vpop.permute.xlu0 %2663 }
0x40bc   :  { %v2666_v41 = vadd.f32 %v2664_v5, %v2656_v62 }
0x40be   :  { %3263 = vtanh.f32 %v2666_v41 }
0x40c4   :  { %v3264_v12 = vpop.eup %3263  ;;  %v2681_v38 = vpop.permute.xlu0 %2680 }
0x40c5   :  { %2958 = vmatmul.msk.f32.vlgmr.msra.gmra.mxu2 %vm292_vm3, %v2681_v38  ;;  %2669 = vrot.lane.b32.xlu2 %v3264_v12, %s3369_s18 }
0x411f   :  { %v2670_v56 = vpop.permute.xlu2 %2669 }
0x4120   :  { %v2672_v8 = vmul.f32 %v2670_v56, %v2653_v31 }
0x4122   :  { %v2673_v19 = vsel %vm4416_vm15, %v2672_v8, %v4331_v6 }
0x4123   :  { %2713 = vrot.lane.b32.xlu1 %v2673_v19, %s3376_s3 }
0x4148   :  { %v2701_v52 = vpop.f32.mrf.mxu2 }
0x4149   :  { %v2707_v22 = vadd.f32 %v3008_v35, %v2701_v52 }
0x4195   :  { %v2714_v10 = vpop.permute.xlu1 %2713 }
0x4196   :  { %2959 = vmatmul.msk.f32.vlgmr.msrb.gmra.mxu3 %vm292_vm3, %v2714_v10 }
0x4219   :  { %v2734_v14 = vpop.f32.mrf.mxu3 }
0x421a   :  { %v2737_v24 = vadd.f32 %v2734_v14, %v2707_v22 }
0x421c   :  { %2738 = vst [vmem:[%s4409_s17] sm:$0xff] %v2737_v24 }
0x421d   :  { %2743 = vsyncpa [#allocation4], 1 }
0x421e   :  { %2744 = vsyncpa [#allocation6], 1 }
0x421f   :  { %2745 = vsyncpa [#allocation9], 1 }

</bundles_post_ra>
